<compile_context>
chip_gen: v6e
topology: v6e:2x2x1
jax: 0.10.0
libtpu: 0.0.40
codegen_flags: <defaults>
</compile_context>

<pallas_src>
import math
from functools import partial

import jax
import jax.numpy as jnp
from jax.experimental import pallas as pl
from jax.experimental.pallas import tpu as pltpu


# ----------------------------------------------------------------------------
# Fused kernel: embedding + bidirectional multi-layer GRU + head, all in VMEM.
#
# refs layout (positional):
#   [0]  ids        (T*BP, 1) int32, row = t*BP + b (time-major, sublane-padded)
#   [1]  embedding  (V, E)
#   for each layer l:
#        [2+4l] wih (2, D_in, 3H)   [3+4l] bih (2, 1, 3H)
#        [4+4l] whh (2, H, 3H)      [5+4l] bhh (2, 1, 3H)     (dir 0 = fwd, 1 = bwd)
#   then fc_w (2H, 50), fc_b (1, 50), fc1_w (50, out), fc1_b (1, out)
#   then o_ref (B, out)
#   then scratch: seqf (T*BP, H), seqb (T*BP, H)   (current layer's fwd/bwd outputs)
# ----------------------------------------------------------------------------
def lstm_gru_fused_kernel(*refs, num_layers, T, B, BP, H):
    ids_ref, emb_ref = refs[0], refs[1]
    base = 2 + 4 * num_layers
    fcw_ref, fcb_ref, fc1w_ref, fc1b_ref = refs[base], refs[base + 1], refs[base + 2], refs[base + 3]
    o_ref = refs[base + 4]
    seqf_ref, seqb_ref = refs[base + 5], refs[base + 6]

    V = emb_ref.shape[0]
    R = T * BP                       # padded, time-major row count
    f32 = jnp.float32

    def mm(a, b):
        return jnp.dot(a, b, preferred_element_type=f32)

    # ---- embedding: one-hot (R, V) @ (V, E) on the MXU (replaces XLA gather) ----
    onehot = (jax.lax.broadcasted_iota(jnp.int32, (R, V), 1) == ids_ref[...]).astype(f32)
    x_emb = mm(onehot, emb_ref[...])                                   # (R, E)

    def gru_cell(xg, hg, h):
        # PyTorch gate order: r | z | n
        r = jax.nn.sigmoid(xg[:, 0:H] + hg[:, 0:H])
        z = jax.nn.sigmoid(xg[:, H:2 * H] + hg[:, H:2 * H])
        n = jnp.tanh(xg[:, 2 * H:3 * H] + r * hg[:, 2 * H:3 * H])
        return (1.0 - z) * n + z * h

    h_f = h_b_first = None
    for l in range(num_layers):
        wih_ref, bih_ref, whh_ref, bhh_ref = refs[2 + 4 * l: 6 + 4 * l]
        last_layer = l == num_layers - 1

        # -- input projection for every timestep & both directions: batched
        #    matmuls, hoisted off the serial recurrence chain. --
        bih_f, bih_b = bih_ref[0], bih_ref[1]                          # (1, 3H)
        if l == 0:
            xg_f_all = mm(x_emb, wih_ref[0]) + bih_f                   # (R, 3H)
            xg_b_all = mm(x_emb, wih_ref[1]) + bih_b
        else:
            in_f = seqf_ref[...]                                       # (R, H) prev fwd outputs
            in_b = seqb_ref[...]                                       # (R, H) prev bwd outputs
            w_f, w_b = wih_ref[0], wih_ref[1]                          # (2H, 3H); rows 0:H act on
            #                                                            the fwd half, H:2H on bwd
            xg_f_all = mm(in_f, w_f[0:H]) + mm(in_b, w_f[H:2 * H]) + bih_f
            xg_b_all = mm(in_f, w_b[0:H]) + mm(in_b, w_b[H:2 * H]) + bih_b

        # -- hoisted recurrent weights / biases (loaded once per layer) --
        whh_f, whh_b = whh_ref[0], whh_ref[1]                          # (H, 3H)
        bhh_f, bhh_b = bhh_ref[0], bhh_ref[1]                          # (1, 3H)

        # -- recurrence: fully unrolled static loop, fwd & bwd chains interleaved.
        #    The bwd chain walks t = T-1 .. 0 (in-kernel reversal) and writes its
        #    output back at the original time index.  Only r_out[:, -1, :] is
        #    consumed downstream, so the top layer's bwd direction needs 1 step. --
        h_f = jnp.zeros((BP, H), f32)
        h_b = jnp.zeros((BP, H), f32)
        n_bwd = 1 if last_layer else T
        for s in range(T):
            tf, tb = s, T - 1 - s
            hg_f = mm(h_f, whh_f) + bhh_f
            h_f = gru_cell(xg_f_all[tf * BP:(tf + 1) * BP], hg_f, h_f)
            if s < n_bwd:
                hg_b = mm(h_b, whh_b) + bhh_b
                h_b = gru_cell(xg_b_all[tb * BP:(tb + 1) * BP], hg_b, h_b)
                if s == 0:
                    h_b_first = h_b       # bwd state after its 1st step == r_out[:, -1, H:2H]
            if not last_layer:
                # aligned (8, H) block stores into the next layer's input buffers
                seqf_ref[tf * BP:(tf + 1) * BP, :] = h_f
                seqb_ref[tb * BP:(tb + 1) * BP, :] = h_b

    # ---- head fused onto the last timestep: fc -> LayerNorm([B, 50]) -> fc1 ----
    last_f = h_f[0:B]                     # drop sublane padding before the cross-batch LN
    last_b = h_b_first[0:B]
    # fc on [fwd | bwd] without a lane concat: split fc_w rows into fwd/bwd halves.
    h1 = mm(last_f, fcw_ref[0:H, :]) + mm(last_b, fcw_ref[H:2 * H, :]) + fcb_ref[...]   # (B, 50)
    # fresh nn.LayerNorm([B, 50]) => gamma=1, beta=0, biased moments over ALL B*50 elems.
    n_elems = h1.shape[0] * h1.shape[1]
    mu = jnp.sum(jnp.sum(h1, axis=1, keepdims=True), axis=0, keepdims=True) / n_elems
    d = h1 - mu
    var = jnp.sum(jnp.sum(d * d, axis=1, keepdims=True), axis=0, keepdims=True) / n_elems
    hn = d * jax.lax.rsqrt(var + 1e-5)
    o_ref[...] = (mm(hn, fc1w_ref[...]) + fc1b_ref[...]).astype(o_ref.dtype)


# ----------------------------------------------------------------------------
# Wrapper: one pallas_call for the whole forward.
# ----------------------------------------------------------------------------
def lstm_net_forward(x_idx, params):
    B, T = x_idx.shape
    num_layers = len(params["gru"])
    H = params["gru"][0]["whh"].shape[1]
    out_dim = params["fc1_w"].shape[1]
    BP = ((B + 7) // 8) * 8               # pad batch to the 8-sublane tile (free on TPU)

    # time-major, sublane-padded token ids: row = t*BP + b (16 int32s of layout plumbing)
    ids = jnp.zeros((T, BP), jnp.int32).at[:, :B].set(jnp.transpose(x_idx).astype(jnp.int32))
    ids = ids.reshape(T * BP, 1)

    args = [ids, params["embedding"]]
    for layer in params["gru"]:
        args += [layer["wih"], layer["bih"], layer["whh"], layer["bhh"]]
    args += [params["fc_w"], params["fc_b"], params["fc1_w"], params["fc1_b"]]

    vmem = pl.BlockSpec(memory_space=pltpu.MemorySpace.VMEM)
    kernel = partial(lstm_gru_fused_kernel,
                     num_layers=num_layers, T=T, B=B, BP=BP, H=H)
    return pl.pallas_call(
        kernel,
        out_shape=jax.ShapeDtypeStruct((B, out_dim), jnp.float32),
        in_specs=[vmem] * len(args),
        out_specs=vmem,
        scratch_shapes=[pltpu.VMEM((T * BP, H), jnp.float32),
                        pltpu.VMEM((T * BP, H), jnp.float32)],
    )(*args)


# ----------------------------------------------------------------------------
# Pure-JAX reference (mirrors the PyTorch module directly) for validation.
# ----------------------------------------------------------------------------
def lstm_net_reference(x_idx, params):
    emb = params["embedding"][x_idx].astype(jnp.float32)      # (B, T, E)
    B, T, _ = emb.shape
    H = params["gru"][0]["whh"].shape[1]
    x = emb
    for layer in params["gru"]:
        outs = []
        for d in range(2):                                    # 0 = fwd, 1 = bwd
            w_ih, b_ih = layer["wih"][d], layer["bih"][d]
            w_hh, b_hh = layer["whh"][d], layer["bhh"][d]
            xs = x[:, ::-1, :] if d == 1 else x
            h = jnp.zeros((B, H), jnp.float32)
            hs = []
            for t in range(T):
                xg = xs[:, t, :] @ w_ih + b_ih
                hg = h @ w_hh + b_hh
                r = jax.nn.sigmoid(xg[:, :H] + hg[:, :H])
                z = jax.nn.sigmoid(xg[:, H:2 * H] + hg[:, H:2 * H])
                n = jnp.tanh(xg[:, 2 * H:] + r * hg[:, 2 * H:])
                h = (1.0 - z) * n + z * h
                hs.append(h)
            out = jnp.stack(hs, axis=1)                       # (B, T, H)
            if d == 1:
                out = out[:, ::-1, :]
            outs.append(out)
        x = jnp.concatenate(outs, axis=-1)                    # (B, T, 2H)
    last = x[:, -1, :]
    h1 = last @ params["fc_w"] + params["fc_b"]
    mu = jnp.mean(h1)
    var = jnp.mean(jnp.square(h1 - mu))
    hn = (h1 - mu) * jax.lax.rsqrt(var + 1e-5)
    return hn @ params["fc1_w"] + params["fc1_b"]


# ----------------------------------------------------------------------------
# Deterministic synthetic parameters (PyTorch-like init, pre-transposed layouts).
# ----------------------------------------------------------------------------
def init_params(key, vocab_size, embedding_dim, hidden_dim, layer_dim, output_dim):
    def u(k, shape, scale):
        return jax.random.uniform(k, shape, jnp.float32, -scale, scale)

    keys = iter(jax.random.split(key, 8 * layer_dim + 8))
    params = {"embedding": jax.random.normal(next(keys), (vocab_size, embedding_dim),
                                             jnp.float32)}
    s = 1.0 / math.sqrt(hidden_dim)
    gru = []
    for l in range(layer_dim):
        d_in = embedding_dim if l == 0 else 2 * hidden_dim
        wih, bih, whh, bhh = [], [], [], []
        for _dir in range(2):                                 # 0 = fwd, 1 = bwd
            w_ih = u(next(keys), (3 * hidden_dim, d_in), s)   # PyTorch layout (3H, D_in)
            w_hh = u(next(keys), (3 * hidden_dim, hidden_dim), s)
            b_ih = u(next(keys), (3 * hidden_dim,), s)
            b_hh = u(next(keys), (3 * hidden_dim,), s)
            wih.append(w_ih.T)                                # stored (D_in, 3H)
            whh.append(w_hh.T)                                # stored (H, 3H)
            bih.append(b_ih[None, :])
            bhh.append(b_hh[None, :])
        gru.append({"wih": jnp.stack(wih), "bih": jnp.stack(bih),
                    "whh": jnp.stack(whh), "bhh": jnp.stack(bhh)})
    params["gru"] = gru

    s_fc = 1.0 / math.sqrt(2 * hidden_dim)
    params["fc_w"] = u(next(keys), (50, 2 * hidden_dim), s_fc).T      # (2H, 50)
    params["fc_b"] = u(next(keys), (50,), s_fc)[None, :]
    s_fc1 = 1.0 / math.sqrt(50)
    params["fc1_w"] = u(next(keys), (output_dim, 50), s_fc1).T        # (50, out)
    params["fc1_b"] = u(next(keys), (output_dim,), s_fc1)[None, :]
    return params


if __name__ == "__main__":
    # Small shapes consistent with the module's forward.
    VOCAB_SIZE, EMBEDDING_DIM, HIDDEN_DIM, LAYER_DIM, OUTPUT_DIM = 50, 16, 32, 3, 2
    BATCH, SEQ = 2, 8

    root = jax.random.PRNGKey(0)
    k_params, k_tokens = jax.random.split(root)
    params = init_params(k_params, VOCAB_SIZE, EMBEDDING_DIM,
                         HIDDEN_DIM, LAYER_DIM, OUTPUT_DIM)
    x_idx = jax.random.randint(k_tokens, (BATCH, SEQ), 0, VOCAB_SIZE, dtype=jnp.int32)

    out = jax.block_until_ready(jax.jit(lstm_net_forward)(x_idx, params))
    assert out.shape == (BATCH, OUTPUT_DIM), out.shape
    assert out.dtype == jnp.float32, out.dtype
    assert bool(jnp.all(jnp.isfinite(out)))

    with jax.default_matmul_precision("highest"):
        ref = jax.block_until_ready(lstm_net_reference(x_idx, params))
    max_err = float(jnp.max(jnp.abs(out - ref)))
    assert max_err < 5e-2, f"kernel vs reference mismatch: max abs err = {max_err}"

    print("KERNEL_OK")
</pallas_src>

<mosaic_0001>
module attributes {stable_mosaic.version = 11 : i64} {
  func.func @lstm_gru_fused_kernel(%arg0: memref<64x1xi32, #tpu.memory_space<vmem>>, %arg1: memref<50x16xf32, #tpu.memory_space<vmem>>, %arg2: memref<2x16x96xf32, #tpu.memory_space<vmem>>, %arg3: memref<2x1x96xf32, #tpu.memory_space<vmem>>, %arg4: memref<2x32x96xf32, #tpu.memory_space<vmem>>, %arg5: memref<2x1x96xf32, #tpu.memory_space<vmem>>, %arg6: memref<2x64x96xf32, #tpu.memory_space<vmem>>, %arg7: memref<2x1x96xf32, #tpu.memory_space<vmem>>, %arg8: memref<2x32x96xf32, #tpu.memory_space<vmem>>, %arg9: memref<2x1x96xf32, #tpu.memory_space<vmem>>, %arg10: memref<2x64x96xf32, #tpu.memory_space<vmem>>, %arg11: memref<2x1x96xf32, #tpu.memory_space<vmem>>, %arg12: memref<2x32x96xf32, #tpu.memory_space<vmem>>, %arg13: memref<2x1x96xf32, #tpu.memory_space<vmem>>, %arg14: memref<64x50xf32, #tpu.memory_space<vmem>>, %arg15: memref<1x50xf32, #tpu.memory_space<vmem>>, %arg16: memref<50x2xf32, #tpu.memory_space<vmem>>, %arg17: memref<1x2xf32, #tpu.memory_space<vmem>>, %arg18: memref<2x2xf32, #tpu.memory_space<vmem>>, %arg19: memref<64x32xf32, #tpu.memory_space<vmem>>, %arg20: memref<64x32xf32, #tpu.memory_space<vmem>>) attributes {dimension_semantics = [], scalar_prefetch = 0 : i64, scratch_operands = 2 : i64, tpu.core_type = #tpu.core_type<tc>} {
    %0 = tpu.iota {dimensions = array<i32: 1>} : vector<64x50xi32>
    %c0 = arith.constant 0 : index
    %c0_0 = arith.constant 0 : index
    %1 = vector.load %arg0[%c0, %c0_0] : memref<64x1xi32, #tpu.memory_space<vmem>>, vector<64x1xi32>
    %2 = vector.broadcast %1 : vector<64x1xi32> to vector<64x50xi32>
    %3 = arith.cmpi eq, %0, %2 : vector<64x50xi32>
    %4 = arith.extui %3 : vector<64x50xi1> to vector<64x50xi32>
    %5 = arith.sitofp %4 : vector<64x50xi32> to vector<64x50xf32>
    %c0_1 = arith.constant 0 : index
    %c0_2 = arith.constant 0 : index
    %6 = vector.load %arg1[%c0_1, %c0_2] : memref<50x16xf32, #tpu.memory_space<vmem>>, vector<50x16xf32>
    %cst = arith.constant dense<0.000000e+00> : vector<64x16xf32>
    %7 = tpu.matmul %5, %6, %cst {dimension_numbers = #tpu.dot_dimension_numbers<[1], [0], [0], [1], [0, 0, 1, 1], [], []>} : vector<64x50xf32>, vector<50x16xf32>, vector<64x16xf32> -> vector<64x16xf32>
    %c0_3 = arith.constant 0 : index
    %c0_4 = arith.constant 0 : index
    %c0_5 = arith.constant 0 : index
    %8 = vector.load %arg3[%c0_3, %c0_4, %c0_5] : memref<2x1x96xf32, #tpu.memory_space<vmem>>, vector<1x1x96xf32>
    %9 = vector.shape_cast %8 : vector<1x1x96xf32> to vector<1x96xf32>
    %c1 = arith.constant 1 : index
    %c0_6 = arith.constant 0 : index
    %c0_7 = arith.constant 0 : index
    %10 = vector.load %arg3[%c1, %c0_6, %c0_7] : memref<2x1x96xf32, #tpu.memory_space<vmem>>, vector<1x1x96xf32>
    %11 = vector.shape_cast %10 : vector<1x1x96xf32> to vector<1x96xf32>
    %c0_8 = arith.constant 0 : index
    %c0_9 = arith.constant 0 : index
    %c0_10 = arith.constant 0 : index
    %12 = vector.load %arg2[%c0_8, %c0_9, %c0_10] : memref<2x16x96xf32, #tpu.memory_space<vmem>>, vector<1x16x96xf32>
    %13 = vector.shape_cast %12 : vector<1x16x96xf32> to vector<16x96xf32>
    %cst_11 = arith.constant dense<0.000000e+00> : vector<64x96xf32>
    %14 = tpu.matmul %7, %13, %cst_11 {dimension_numbers = #tpu.dot_dimension_numbers<[1], [0], [0], [1], [0, 0, 1, 1], [], []>} : vector<64x16xf32>, vector<16x96xf32>, vector<64x96xf32> -> vector<64x96xf32>
    %15 = vector.broadcast %9 : vector<1x96xf32> to vector<64x96xf32>
    %16 = arith.addf %14, %15 : vector<64x96xf32>
    %c1_12 = arith.constant 1 : index
    %c0_13 = arith.constant 0 : index
    %c0_14 = arith.constant 0 : index
    %17 = vector.load %arg2[%c1_12, %c0_13, %c0_14] : memref<2x16x96xf32, #tpu.memory_space<vmem>>, vector<1x16x96xf32>
    %18 = vector.shape_cast %17 : vector<1x16x96xf32> to vector<16x96xf32>
    %cst_15 = arith.constant dense<0.000000e+00> : vector<64x96xf32>
    %19 = tpu.matmul %7, %18, %cst_15 {dimension_numbers = #tpu.dot_dimension_numbers<[1], [0], [0], [1], [0, 0, 1, 1], [], []>} : vector<64x16xf32>, vector<16x96xf32>, vector<64x96xf32> -> vector<64x96xf32>
    %20 = vector.broadcast %11 : vector<1x96xf32> to vector<64x96xf32>
    %21 = arith.addf %19, %20 : vector<64x96xf32>
    %c0_16 = arith.constant 0 : index
    %c0_17 = arith.constant 0 : index
    %c0_18 = arith.constant 0 : index
    %22 = vector.load %arg4[%c0_16, %c0_17, %c0_18] : memref<2x32x96xf32, #tpu.memory_space<vmem>>, vector<1x32x96xf32>
    %23 = vector.shape_cast %22 : vector<1x32x96xf32> to vector<32x96xf32>
    %c1_19 = arith.constant 1 : index
    %c0_20 = arith.constant 0 : index
    %c0_21 = arith.constant 0 : index
    %24 = vector.load %arg4[%c1_19, %c0_20, %c0_21] : memref<2x32x96xf32, #tpu.memory_space<vmem>>, vector<1x32x96xf32>
    %25 = vector.shape_cast %24 : vector<1x32x96xf32> to vector<32x96xf32>
    %c0_22 = arith.constant 0 : index
    %c0_23 = arith.constant 0 : index
    %c0_24 = arith.constant 0 : index
    %26 = vector.load %arg5[%c0_22, %c0_23, %c0_24] : memref<2x1x96xf32, #tpu.memory_space<vmem>>, vector<1x1x96xf32>
    %27 = vector.shape_cast %26 : vector<1x1x96xf32> to vector<1x96xf32>
    %c1_25 = arith.constant 1 : index
    %c0_26 = arith.constant 0 : index
    %c0_27 = arith.constant 0 : index
    %28 = vector.load %arg5[%c1_25, %c0_26, %c0_27] : memref<2x1x96xf32, #tpu.memory_space<vmem>>, vector<1x1x96xf32>
    %29 = vector.shape_cast %28 : vector<1x1x96xf32> to vector<1x96xf32>
    %cst_28 = arith.constant 0.000000e+00 : f32
    %30 = vector.broadcast %cst_28 : f32 to vector<8x32xf32>
    %cst_29 = arith.constant 0.000000e+00 : f32
    %31 = vector.broadcast %cst_29 : f32 to vector<8x32xf32>
    %cst_30 = arith.constant dense<0.000000e+00> : vector<8x96xf32>
    %32 = tpu.matmul %30, %23, %cst_30 {dimension_numbers = #tpu.dot_dimension_numbers<[1], [0], [0], [1], [0, 0, 1, 1], [], []>} : vector<8x32xf32>, vector<32x96xf32>, vector<8x96xf32> -> vector<8x96xf32>
    %33 = vector.broadcast %27 : vector<1x96xf32> to vector<8x96xf32>
    %34 = arith.addf %32, %33 : vector<8x96xf32>
    %35 = vector.extract_strided_slice %16 {offsets = [0, 0], sizes = [8, 96], strides = [1, 1]} : vector<64x96xf32> to vector<8x96xf32>
    %36 = vector.extract_strided_slice %35 {offsets = [0, 0], sizes = [8, 32], strides = [1, 1]} : vector<8x96xf32> to vector<8x32xf32>
    %37 = vector.extract_strided_slice %34 {offsets = [0, 0], sizes = [8, 32], strides = [1, 1]} : vector<8x96xf32> to vector<8x32xf32>
    %38 = arith.addf %36, %37 : vector<8x32xf32>
    %39 = arith.negf %38 : vector<8x32xf32>
    %40 = math.exp %39 : vector<8x32xf32>
    %cst_31 = arith.constant 1.000000e+00 : f32
    %41 = vector.broadcast %cst_31 : f32 to vector<8x32xf32>
    %42 = arith.addf %41, %40 : vector<8x32xf32>
    %43 = arith.divf %41, %42 : vector<8x32xf32>
    %44 = vector.extract_strided_slice %35 {offsets = [0, 32], sizes = [8, 32], strides = [1, 1]} : vector<8x96xf32> to vector<8x32xf32>
    %45 = vector.extract_strided_slice %34 {offsets = [0, 32], sizes = [8, 32], strides = [1, 1]} : vector<8x96xf32> to vector<8x32xf32>
    %46 = arith.addf %44, %45 : vector<8x32xf32>
    %47 = arith.negf %46 : vector<8x32xf32>
    %48 = math.exp %47 : vector<8x32xf32>
    %cst_32 = arith.constant 1.000000e+00 : f32
    %49 = vector.broadcast %cst_32 : f32 to vector<8x32xf32>
    %50 = arith.addf %49, %48 : vector<8x32xf32>
    %51 = arith.divf %49, %50 : vector<8x32xf32>
    %52 = vector.extract_strided_slice %35 {offsets = [0, 64], sizes = [8, 32], strides = [1, 1]} : vector<8x96xf32> to vector<8x32xf32>
    %53 = vector.extract_strided_slice %34 {offsets = [0, 64], sizes = [8, 32], strides = [1, 1]} : vector<8x96xf32> to vector<8x32xf32>
    %54 = arith.mulf %43, %53 : vector<8x32xf32>
    %55 = arith.addf %52, %54 : vector<8x32xf32>
    %56 = math.tanh %55 : vector<8x32xf32>
    %cst_33 = arith.constant 1.000000e+00 : f32
    %57 = vector.broadcast %cst_33 : f32 to vector<8x32xf32>
    %58 = arith.subf %57, %51 : vector<8x32xf32>
    %59 = arith.mulf %58, %56 : vector<8x32xf32>
    %60 = arith.mulf %51, %30 : vector<8x32xf32>
    %61 = arith.addf %59, %60 : vector<8x32xf32>
    %cst_34 = arith.constant dense<0.000000e+00> : vector<8x96xf32>
    %62 = tpu.matmul %31, %25, %cst_34 {dimension_numbers = #tpu.dot_dimension_numbers<[1], [0], [0], [1], [0, 0, 1, 1], [], []>} : vector<8x32xf32>, vector<32x96xf32>, vector<8x96xf32> -> vector<8x96xf32>
    %63 = vector.broadcast %29 : vector<1x96xf32> to vector<8x96xf32>
    %64 = arith.addf %62, %63 : vector<8x96xf32>
    %65 = vector.extract_strided_slice %21 {offsets = [56, 0], sizes = [8, 96], strides = [1, 1]} : vector<64x96xf32> to vector<8x96xf32>
    %66 = vector.extract_strided_slice %65 {offsets = [0, 0], sizes = [8, 32], strides = [1, 1]} : vector<8x96xf32> to vector<8x32xf32>
    %67 = vector.extract_strided_slice %64 {offsets = [0, 0], sizes = [8, 32], strides = [1, 1]} : vector<8x96xf32> to vector<8x32xf32>
    %68 = arith.addf %66, %67 : vector<8x32xf32>
    %69 = arith.negf %68 : vector<8x32xf32>
    %70 = math.exp %69 : vector<8x32xf32>
    %cst_35 = arith.constant 1.000000e+00 : f32
    %71 = vector.broadcast %cst_35 : f32 to vector<8x32xf32>
    %72 = arith.addf %71, %70 : vector<8x32xf32>
    %73 = arith.divf %71, %72 : vector<8x32xf32>
    %74 = vector.extract_strided_slice %65 {offsets = [0, 32], sizes = [8, 32], strides = [1, 1]} : vector<8x96xf32> to vector<8x32xf32>
    %75 = vector.extract_strided_slice %64 {offsets = [0, 32], sizes = [8, 32], strides = [1, 1]} : vector<8x96xf32> to vector<8x32xf32>
    %76 = arith.addf %74, %75 : vector<8x32xf32>
    %77 = arith.negf %76 : vector<8x32xf32>
    %78 = math.exp %77 : vector<8x32xf32>
    %cst_36 = arith.constant 1.000000e+00 : f32
    %79 = vector.broadcast %cst_36 : f32 to vector<8x32xf32>
    %80 = arith.addf %79, %78 : vector<8x32xf32>
    %81 = arith.divf %79, %80 : vector<8x32xf32>
    %82 = vector.extract_strided_slice %65 {offsets = [0, 64], sizes = [8, 32], strides = [1, 1]} : vector<8x96xf32> to vector<8x32xf32>
    %83 = vector.extract_strided_slice %64 {offsets = [0, 64], sizes = [8, 32], strides = [1, 1]} : vector<8x96xf32> to vector<8x32xf32>
    %84 = arith.mulf %73, %83 : vector<8x32xf32>
    %85 = arith.addf %82, %84 : vector<8x32xf32>
    %86 = math.tanh %85 : vector<8x32xf32>
    %cst_37 = arith.constant 1.000000e+00 : f32
    %87 = vector.broadcast %cst_37 : f32 to vector<8x32xf32>
    %88 = arith.subf %87, %81 : vector<8x32xf32>
    %89 = arith.mulf %88, %86 : vector<8x32xf32>
    %90 = arith.mulf %81, %31 : vector<8x32xf32>
    %91 = arith.addf %89, %90 : vector<8x32xf32>
    %c0_38 = arith.constant 0 : index
    %c0_39 = arith.constant 0 : index
    %92 = vector.load %arg19[%c0_38, %c0_39] : memref<64x32xf32, #tpu.memory_space<vmem>>, vector<8x32xf32>
    tpu.vector_store %arg19[%c0_38, %c0_39], %61 {strides = array<i32>} : memref<64x32xf32, #tpu.memory_space<vmem>>, vector<8x32xf32>,
    %c56 = arith.constant 56 : index
    %c0_40 = arith.constant 0 : index
    %93 = vector.load %arg20[%c56, %c0_40] : memref<64x32xf32, #tpu.memory_space<vmem>>, vector<8x32xf32>
    tpu.vector_store %arg20[%c56, %c0_40], %91 {strides = array<i32>} : memref<64x32xf32, #tpu.memory_space<vmem>>, vector<8x32xf32>,
    %cst_41 = arith.constant dense<0.000000e+00> : vector<8x96xf32>
    %94 = tpu.matmul %61, %23, %cst_41 {dimension_numbers = #tpu.dot_dimension_numbers<[1], [0], [0], [1], [0, 0, 1, 1], [], []>} : vector<8x32xf32>, vector<32x96xf32>, vector<8x96xf32> -> vector<8x96xf32>
    %95 = vector.broadcast %27 : vector<1x96xf32> to vector<8x96xf32>
    %96 = arith.addf %94, %95 : vector<8x96xf32>
    %97 = vector.extract_strided_slice %16 {offsets = [8, 0], sizes = [8, 96], strides = [1, 1]} : vector<64x96xf32> to vector<8x96xf32>
    %98 = vector.extract_strided_slice %97 {offsets = [0, 0], sizes = [8, 32], strides = [1, 1]} : vector<8x96xf32> to vector<8x32xf32>
    %99 = vector.extract_strided_slice %96 {offsets = [0, 0], sizes = [8, 32], strides = [1, 1]} : vector<8x96xf32> to vector<8x32xf32>
    %100 = arith.addf %98, %99 : vector<8x32xf32>
    %101 = arith.negf %100 : vector<8x32xf32>
    %102 = math.exp %101 : vector<8x32xf32>
    %cst_42 = arith.constant 1.000000e+00 : f32
    %103 = vector.broadcast %cst_42 : f32 to vector<8x32xf32>
    %104 = arith.addf %103, %102 : vector<8x32xf32>
    %105 = arith.divf %103, %104 : vector<8x32xf32>
    %106 = vector.extract_strided_slice %97 {offsets = [0, 32], sizes = [8, 32], strides = [1, 1]} : vector<8x96xf32> to vector<8x32xf32>
    %107 = vector.extract_strided_slice %96 {offsets = [0, 32], sizes = [8, 32], strides = [1, 1]} : vector<8x96xf32> to vector<8x32xf32>
    %108 = arith.addf %106, %107 : vector<8x32xf32>
    %109 = arith.negf %108 : vector<8x32xf32>
    %110 = math.exp %109 : vector<8x32xf32>
    %cst_43 = arith.constant 1.000000e+00 : f32
    %111 = vector.broadcast %cst_43 : f32 to vector<8x32xf32>
    %112 = arith.addf %111, %110 : vector<8x32xf32>
    %113 = arith.divf %111, %112 : vector<8x32xf32>
    %114 = vector.extract_strided_slice %97 {offsets = [0, 64], sizes = [8, 32], strides = [1, 1]} : vector<8x96xf32> to vector<8x32xf32>
    %115 = vector.extract_strided_slice %96 {offsets = [0, 64], sizes = [8, 32], strides = [1, 1]} : vector<8x96xf32> to vector<8x32xf32>
    %116 = arith.mulf %105, %115 : vector<8x32xf32>
    %117 = arith.addf %114, %116 : vector<8x32xf32>
    %118 = math.tanh %117 : vector<8x32xf32>
    %cst_44 = arith.constant 1.000000e+00 : f32
    %119 = vector.broadcast %cst_44 : f32 to vector<8x32xf32>
    %120 = arith.subf %119, %113 : vector<8x32xf32>
    %121 = arith.mulf %120, %118 : vector<8x32xf32>
    %122 = arith.mulf %113, %61 : vector<8x32xf32>
    %123 = arith.addf %121, %122 : vector<8x32xf32>
    %cst_45 = arith.constant dense<0.000000e+00> : vector<8x96xf32>
    %124 = tpu.matmul %91, %25, %cst_45 {dimension_numbers = #tpu.dot_dimension_numbers<[1], [0], [0], [1], [0, 0, 1, 1], [], []>} : vector<8x32xf32>, vector<32x96xf32>, vector<8x96xf32> -> vector<8x96xf32>
    %125 = vector.broadcast %29 : vector<1x96xf32> to vector<8x96xf32>
    %126 = arith.addf %124, %125 : vector<8x96xf32>
    %127 = vector.extract_strided_slice %21 {offsets = [48, 0], sizes = [8, 96], strides = [1, 1]} : vector<64x96xf32> to vector<8x96xf32>
    %128 = vector.extract_strided_slice %127 {offsets = [0, 0], sizes = [8, 32], strides = [1, 1]} : vector<8x96xf32> to vector<8x32xf32>
    %129 = vector.extract_strided_slice %126 {offsets = [0, 0], sizes = [8, 32], strides = [1, 1]} : vector<8x96xf32> to vector<8x32xf32>
    %130 = arith.addf %128, %129 : vector<8x32xf32>
    %131 = arith.negf %130 : vector<8x32xf32>
    %132 = math.exp %131 : vector<8x32xf32>
    %cst_46 = arith.constant 1.000000e+00 : f32
    %133 = vector.broadcast %cst_46 : f32 to vector<8x32xf32>
    %134 = arith.addf %133, %132 : vector<8x32xf32>
    %135 = arith.divf %133, %134 : vector<8x32xf32>
    %136 = vector.extract_strided_slice %127 {offsets = [0, 32], sizes = [8, 32], strides = [1, 1]} : vector<8x96xf32> to vector<8x32xf32>
    %137 = vector.extract_strided_slice %126 {offsets = [0, 32], sizes = [8, 32], strides = [1, 1]} : vector<8x96xf32> to vector<8x32xf32>
    %138 = arith.addf %136, %137 : vector<8x32xf32>
    %139 = arith.negf %138 : vector<8x32xf32>
    %140 = math.exp %139 : vector<8x32xf32>
    %cst_47 = arith.constant 1.000000e+00 : f32
    %141 = vector.broadcast %cst_47 : f32 to vector<8x32xf32>
    %142 = arith.addf %141, %140 : vector<8x32xf32>
    %143 = arith.divf %141, %142 : vector<8x32xf32>
    %144 = vector.extract_strided_slice %127 {offsets = [0, 64], sizes = [8, 32], strides = [1, 1]} : vector<8x96xf32> to vector<8x32xf32>
    %145 = vector.extract_strided_slice %126 {offsets = [0, 64], sizes = [8, 32], strides = [1, 1]} : vector<8x96xf32> to vector<8x32xf32>
    %146 = arith.mulf %135, %145 : vector<8x32xf32>
    %147 = arith.addf %144, %146 : vector<8x32xf32>
    %148 = math.tanh %147 : vector<8x32xf32>
    %cst_48 = arith.constant 1.000000e+00 : f32
    %149 = vector.broadcast %cst_48 : f32 to vector<8x32xf32>
    %150 = arith.subf %149, %143 : vector<8x32xf32>
    %151 = arith.mulf %150, %148 : vector<8x32xf32>
    %152 = arith.mulf %143, %91 : vector<8x32xf32>
    %153 = arith.addf %151, %152 : vector<8x32xf32>
    %c8 = arith.constant 8 : index
    %c0_49 = arith.constant 0 : index
    %154 = vector.load %arg19[%c8, %c0_49] : memref<64x32xf32, #tpu.memory_space<vmem>>, vector<8x32xf32>
    tpu.vector_store %arg19[%c8, %c0_49], %123 {strides = array<i32>} : memref<64x32xf32, #tpu.memory_space<vmem>>, vector<8x32xf32>,
    %c48 = arith.constant 48 : index
    %c0_50 = arith.constant 0 : index
    %155 = vector.load %arg20[%c48, %c0_50] : memref<64x32xf32, #tpu.memory_space<vmem>>, vector<8x32xf32>
    tpu.vector_store %arg20[%c48, %c0_50], %153 {strides = array<i32>} : memref<64x32xf32, #tpu.memory_space<vmem>>, vector<8x32xf32>,
    %cst_51 = arith.constant dense<0.000000e+00> : vector<8x96xf32>
    %156 = tpu.matmul %123, %23, %cst_51 {dimension_numbers = #tpu.dot_dimension_numbers<[1], [0], [0], [1], [0, 0, 1, 1], [], []>} : vector<8x32xf32>, vector<32x96xf32>, vector<8x96xf32> -> vector<8x96xf32>
    %157 = vector.broadcast %27 : vector<1x96xf32> to vector<8x96xf32>
    %158 = arith.addf %156, %157 : vector<8x96xf32>
    %159 = vector.extract_strided_slice %16 {offsets = [16, 0], sizes = [8, 96], strides = [1, 1]} : vector<64x96xf32> to vector<8x96xf32>
    %160 = vector.extract_strided_slice %159 {offsets = [0, 0], sizes = [8, 32], strides = [1, 1]} : vector<8x96xf32> to vector<8x32xf32>
    %161 = vector.extract_strided_slice %158 {offsets = [0, 0], sizes = [8, 32], strides = [1, 1]} : vector<8x96xf32> to vector<8x32xf32>
    %162 = arith.addf %160, %161 : vector<8x32xf32>
    %163 = arith.negf %162 : vector<8x32xf32>
    %164 = math.exp %163 : vector<8x32xf32>
    %cst_52 = arith.constant 1.000000e+00 : f32
    %165 = vector.broadcast %cst_52 : f32 to vector<8x32xf32>
    %166 = arith.addf %165, %164 : vector<8x32xf32>
    %167 = arith.divf %165, %166 : vector<8x32xf32>
    %168 = vector.extract_strided_slice %159 {offsets = [0, 32], sizes = [8, 32], strides = [1, 1]} : vector<8x96xf32> to vector<8x32xf32>
    %169 = vector.extract_strided_slice %158 {offsets = [0, 32], sizes = [8, 32], strides = [1, 1]} : vector<8x96xf32> to vector<8x32xf32>
    %170 = arith.addf %168, %169 : vector<8x32xf32>
    %171 = arith.negf %170 : vector<8x32xf32>
    %172 = math.exp %171 : vector<8x32xf32>
    %cst_53 = arith.constant 1.000000e+00 : f32
    %173 = vector.broadcast %cst_53 : f32 to vector<8x32xf32>
    %174 = arith.addf %173, %172 : vector<8x32xf32>
    %175 = arith.divf %173, %174 : vector<8x32xf32>
    %176 = vector.extract_strided_slice %159 {offsets = [0, 64], sizes = [8, 32], strides = [1, 1]} : vector<8x96xf32> to vector<8x32xf32>
    %177 = vector.extract_strided_slice %158 {offsets = [0, 64], sizes = [8, 32], strides = [1, 1]} : vector<8x96xf32> to vector<8x32xf32>
    %178 = arith.mulf %167, %177 : vector<8x32xf32>
    %179 = arith.addf %176, %178 : vector<8x32xf32>
    %180 = math.tanh %179 : vector<8x32xf32>
    %cst_54 = arith.constant 1.000000e+00 : f32
    %181 = vector.broadcast %cst_54 : f32 to vector<8x32xf32>
    %182 = arith.subf %181, %175 : vector<8x32xf32>
    %183 = arith.mulf %182, %180 : vector<8x32xf32>
    %184 = arith.mulf %175, %123 : vector<8x32xf32>
    %185 = arith.addf %183, %184 : vector<8x32xf32>
    %cst_55 = arith.constant dense<0.000000e+00> : vector<8x96xf32>
    %186 = tpu.matmul %153, %25, %cst_55 {dimension_numbers = #tpu.dot_dimension_numbers<[1], [0], [0], [1], [0, 0, 1, 1], [], []>} : vector<8x32xf32>, vector<32x96xf32>, vector<8x96xf32> -> vector<8x96xf32>
    %187 = vector.broadcast %29 : vector<1x96xf32> to vector<8x96xf32>
    %188 = arith.addf %186, %187 : vector<8x96xf32>
    %189 = vector.extract_strided_slice %21 {offsets = [40, 0], sizes = [8, 96], strides = [1, 1]} : vector<64x96xf32> to vector<8x96xf32>
    %190 = vector.extract_strided_slice %189 {offsets = [0, 0], sizes = [8, 32], strides = [1, 1]} : vector<8x96xf32> to vector<8x32xf32>
    %191 = vector.extract_strided_slice %188 {offsets = [0, 0], sizes = [8, 32], strides = [1, 1]} : vector<8x96xf32> to vector<8x32xf32>
    %192 = arith.addf %190, %191 : vector<8x32xf32>
    %193 = arith.negf %192 : vector<8x32xf32>
    %194 = math.exp %193 : vector<8x32xf32>
    %cst_56 = arith.constant 1.000000e+00 : f32
    %195 = vector.broadcast %cst_56 : f32 to vector<8x32xf32>
    %196 = arith.addf %195, %194 : vector<8x32xf32>
    %197 = arith.divf %195, %196 : vector<8x32xf32>
    %198 = vector.extract_strided_slice %189 {offsets = [0, 32], sizes = [8, 32], strides = [1, 1]} : vector<8x96xf32> to vector<8x32xf32>
    %199 = vector.extract_strided_slice %188 {offsets = [0, 32], sizes = [8, 32], strides = [1, 1]} : vector<8x96xf32> to vector<8x32xf32>
    %200 = arith.addf %198, %199 : vector<8x32xf32>
    %201 = arith.negf %200 : vector<8x32xf32>
    %202 = math.exp %201 : vector<8x32xf32>
    %cst_57 = arith.constant 1.000000e+00 : f32
    %203 = vector.broadcast %cst_57 : f32 to vector<8x32xf32>
    %204 = arith.addf %203, %202 : vector<8x32xf32>
    %205 = arith.divf %203, %204 : vector<8x32xf32>
    %206 = vector.extract_strided_slice %189 {offsets = [0, 64], sizes = [8, 32], strides = [1, 1]} : vector<8x96xf32> to vector<8x32xf32>
    %207 = vector.extract_strided_slice %188 {offsets = [0, 64], sizes = [8, 32], strides = [1, 1]} : vector<8x96xf32> to vector<8x32xf32>
    %208 = arith.mulf %197, %207 : vector<8x32xf32>
    %209 = arith.addf %206, %208 : vector<8x32xf32>
    %210 = math.tanh %209 : vector<8x32xf32>
    %cst_58 = arith.constant 1.000000e+00 : f32
    %211 = vector.broadcast %cst_58 : f32 to vector<8x32xf32>
    %212 = arith.subf %211, %205 : vector<8x32xf32>
    %213 = arith.mulf %212, %210 : vector<8x32xf32>
    %214 = arith.mulf %205, %153 : vector<8x32xf32>
    %215 = arith.addf %213, %214 : vector<8x32xf32>
    %c16 = arith.constant 16 : index
    %c0_59 = arith.constant 0 : index
    %216 = vector.load %arg19[%c16, %c0_59] : memref<64x32xf32, #tpu.memory_space<vmem>>, vector<8x32xf32>
    tpu.vector_store %arg19[%c16, %c0_59], %185 {strides = array<i32>} : memref<64x32xf32, #tpu.memory_space<vmem>>, vector<8x32xf32>,
    %c40 = arith.constant 40 : index
    %c0_60 = arith.constant 0 : index
    %217 = vector.load %arg20[%c40, %c0_60] : memref<64x32xf32, #tpu.memory_space<vmem>>, vector<8x32xf32>
    tpu.vector_store %arg20[%c40, %c0_60], %215 {strides = array<i32>} : memref<64x32xf32, #tpu.memory_space<vmem>>, vector<8x32xf32>,
    %cst_61 = arith.constant dense<0.000000e+00> : vector<8x96xf32>
    %218 = tpu.matmul %185, %23, %cst_61 {dimension_numbers = #tpu.dot_dimension_numbers<[1], [0], [0], [1], [0, 0, 1, 1], [], []>} : vector<8x32xf32>, vector<32x96xf32>, vector<8x96xf32> -> vector<8x96xf32>
    %219 = vector.broadcast %27 : vector<1x96xf32> to vector<8x96xf32>
    %220 = arith.addf %218, %219 : vector<8x96xf32>
    %221 = vector.extract_strided_slice %16 {offsets = [24, 0], sizes = [8, 96], strides = [1, 1]} : vector<64x96xf32> to vector<8x96xf32>
    %222 = vector.extract_strided_slice %221 {offsets = [0, 0], sizes = [8, 32], strides = [1, 1]} : vector<8x96xf32> to vector<8x32xf32>
    %223 = vector.extract_strided_slice %220 {offsets = [0, 0], sizes = [8, 32], strides = [1, 1]} : vector<8x96xf32> to vector<8x32xf32>
    %224 = arith.addf %222, %223 : vector<8x32xf32>
    %225 = arith.negf %224 : vector<8x32xf32>
    %226 = math.exp %225 : vector<8x32xf32>
    %cst_62 = arith.constant 1.000000e+00 : f32
    %227 = vector.broadcast %cst_62 : f32 to vector<8x32xf32>
    %228 = arith.addf %227, %226 : vector<8x32xf32>
    %229 = arith.divf %227, %228 : vector<8x32xf32>
    %230 = vector.extract_strided_slice %221 {offsets = [0, 32], sizes = [8, 32], strides = [1, 1]} : vector<8x96xf32> to vector<8x32xf32>
    %231 = vector.extract_strided_slice %220 {offsets = [0, 32], sizes = [8, 32], strides = [1, 1]} : vector<8x96xf32> to vector<8x32xf32>
    %232 = arith.addf %230, %231 : vector<8x32xf32>
    %233 = arith.negf %232 : vector<8x32xf32>
    %234 = math.exp %233 : vector<8x32xf32>
    %cst_63 = arith.constant 1.000000e+00 : f32
    %235 = vector.broadcast %cst_63 : f32 to vector<8x32xf32>
    %236 = arith.addf %235, %234 : vector<8x32xf32>
    %237 = arith.divf %235, %236 : vector<8x32xf32>
    %238 = vector.extract_strided_slice %221 {offsets = [0, 64], sizes = [8, 32], strides = [1, 1]} : vector<8x96xf32> to vector<8x32xf32>
    %239 = vector.extract_strided_slice %220 {offsets = [0, 64], sizes = [8, 32], strides = [1, 1]} : vector<8x96xf32> to vector<8x32xf32>
    %240 = arith.mulf %229, %239 : vector<8x32xf32>
    %241 = arith.addf %238, %240 : vector<8x32xf32>
    %242 = math.tanh %241 : vector<8x32xf32>
    %cst_64 = arith.constant 1.000000e+00 : f32
    %243 = vector.broadcast %cst_64 : f32 to vector<8x32xf32>
    %244 = arith.subf %243, %237 : vector<8x32xf32>
    %245 = arith.mulf %244, %242 : vector<8x32xf32>
    %246 = arith.mulf %237, %185 : vector<8x32xf32>
    %247 = arith.addf %245, %246 : vector<8x32xf32>
    %cst_65 = arith.constant dense<0.000000e+00> : vector<8x96xf32>
    %248 = tpu.matmul %215, %25, %cst_65 {dimension_numbers = #tpu.dot_dimension_numbers<[1], [0], [0], [1], [0, 0, 1, 1], [], []>} : vector<8x32xf32>, vector<32x96xf32>, vector<8x96xf32> -> vector<8x96xf32>
    %249 = vector.broadcast %29 : vector<1x96xf32> to vector<8x96xf32>
    %250 = arith.addf %248, %249 : vector<8x96xf32>
    %251 = vector.extract_strided_slice %21 {offsets = [32, 0], sizes = [8, 96], strides = [1, 1]} : vector<64x96xf32> to vector<8x96xf32>
    %252 = vector.extract_strided_slice %251 {offsets = [0, 0], sizes = [8, 32], strides = [1, 1]} : vector<8x96xf32> to vector<8x32xf32>
    %253 = vector.extract_strided_slice %250 {offsets = [0, 0], sizes = [8, 32], strides = [1, 1]} : vector<8x96xf32> to vector<8x32xf32>
    %254 = arith.addf %252, %253 : vector<8x32xf32>
    %255 = arith.negf %254 : vector<8x32xf32>
    %256 = math.exp %255 : vector<8x32xf32>
    %cst_66 = arith.constant 1.000000e+00 : f32
    %257 = vector.broadcast %cst_66 : f32 to vector<8x32xf32>
    %258 = arith.addf %257, %256 : vector<8x32xf32>
    %259 = arith.divf %257, %258 : vector<8x32xf32>
    %260 = vector.extract_strided_slice %251 {offsets = [0, 32], sizes = [8, 32], strides = [1, 1]} : vector<8x96xf32> to vector<8x32xf32>
    %261 = vector.extract_strided_slice %250 {offsets = [0, 32], sizes = [8, 32], strides = [1, 1]} : vector<8x96xf32> to vector<8x32xf32>
    %262 = arith.addf %260, %261 : vector<8x32xf32>
    %263 = arith.negf %262 : vector<8x32xf32>
    %264 = math.exp %263 : vector<8x32xf32>
    %cst_67 = arith.constant 1.000000e+00 : f32
    %265 = vector.broadcast %cst_67 : f32 to vector<8x32xf32>
    %266 = arith.addf %265, %264 : vector<8x32xf32>
    %267 = arith.divf %265, %266 : vector<8x32xf32>
    %268 = vector.extract_strided_slice %251 {offsets = [0, 64], sizes = [8, 32], strides = [1, 1]} : vector<8x96xf32> to vector<8x32xf32>
    %269 = vector.extract_strided_slice %250 {offsets = [0, 64], sizes = [8, 32], strides = [1, 1]} : vector<8x96xf32> to vector<8x32xf32>
    %270 = arith.mulf %259, %269 : vector<8x32xf32>
    %271 = arith.addf %268, %270 : vector<8x32xf32>
    %272 = math.tanh %271 : vector<8x32xf32>
    %cst_68 = arith.constant 1.000000e+00 : f32
    %273 = vector.broadcast %cst_68 : f32 to vector<8x32xf32>
    %274 = arith.subf %273, %267 : vector<8x32xf32>
    %275 = arith.mulf %274, %272 : vector<8x32xf32>
    %276 = arith.mulf %267, %215 : vector<8x32xf32>
    %277 = arith.addf %275, %276 : vector<8x32xf32>
    %c24 = arith.constant 24 : index
    %c0_69 = arith.constant 0 : index
    %278 = vector.load %arg19[%c24, %c0_69] : memref<64x32xf32, #tpu.memory_space<vmem>>, vector<8x32xf32>
    tpu.vector_store %arg19[%c24, %c0_69], %247 {strides = array<i32>} : memref<64x32xf32, #tpu.memory_space<vmem>>, vector<8x32xf32>,
    %c32 = arith.constant 32 : index
    %c0_70 = arith.constant 0 : index
    %279 = vector.load %arg20[%c32, %c0_70] : memref<64x32xf32, #tpu.memory_space<vmem>>, vector<8x32xf32>
    tpu.vector_store %arg20[%c32, %c0_70], %277 {strides = array<i32>} : memref<64x32xf32, #tpu.memory_space<vmem>>, vector<8x32xf32>,
    %cst_71 = arith.constant dense<0.000000e+00> : vector<8x96xf32>
    %280 = tpu.matmul %247, %23, %cst_71 {dimension_numbers = #tpu.dot_dimension_numbers<[1], [0], [0], [1], [0, 0, 1, 1], [], []>} : vector<8x32xf32>, vector<32x96xf32>, vector<8x96xf32> -> vector<8x96xf32>
    %281 = vector.broadcast %27 : vector<1x96xf32> to vector<8x96xf32>
    %282 = arith.addf %280, %281 : vector<8x96xf32>
    %283 = vector.extract_strided_slice %16 {offsets = [32, 0], sizes = [8, 96], strides = [1, 1]} : vector<64x96xf32> to vector<8x96xf32>
    %284 = vector.extract_strided_slice %283 {offsets = [0, 0], sizes = [8, 32], strides = [1, 1]} : vector<8x96xf32> to vector<8x32xf32>
    %285 = vector.extract_strided_slice %282 {offsets = [0, 0], sizes = [8, 32], strides = [1, 1]} : vector<8x96xf32> to vector<8x32xf32>
    %286 = arith.addf %284, %285 : vector<8x32xf32>
    %287 = arith.negf %286 : vector<8x32xf32>
    %288 = math.exp %287 : vector<8x32xf32>
    %cst_72 = arith.constant 1.000000e+00 : f32
    %289 = vector.broadcast %cst_72 : f32 to vector<8x32xf32>
    %290 = arith.addf %289, %288 : vector<8x32xf32>
    %291 = arith.divf %289, %290 : vector<8x32xf32>
    %292 = vector.extract_strided_slice %283 {offsets = [0, 32], sizes = [8, 32], strides = [1, 1]} : vector<8x96xf32> to vector<8x32xf32>
    %293 = vector.extract_strided_slice %282 {offsets = [0, 32], sizes = [8, 32], strides = [1, 1]} : vector<8x96xf32> to vector<8x32xf32>
    %294 = arith.addf %292, %293 : vector<8x32xf32>
    %295 = arith.negf %294 : vector<8x32xf32>
    %296 = math.exp %295 : vector<8x32xf32>
    %cst_73 = arith.constant 1.000000e+00 : f32
    %297 = vector.broadcast %cst_73 : f32 to vector<8x32xf32>
    %298 = arith.addf %297, %296 : vector<8x32xf32>
    %299 = arith.divf %297, %298 : vector<8x32xf32>
    %300 = vector.extract_strided_slice %283 {offsets = [0, 64], sizes = [8, 32], strides = [1, 1]} : vector<8x96xf32> to vector<8x32xf32>
    %301 = vector.extract_strided_slice %282 {offsets = [0, 64], sizes = [8, 32], strides = [1, 1]} : vector<8x96xf32> to vector<8x32xf32>
    %302 = arith.mulf %291, %301 : vector<8x32xf32>
    %303 = arith.addf %300, %302 : vector<8x32xf32>
    %304 = math.tanh %303 : vector<8x32xf32>
    %cst_74 = arith.constant 1.000000e+00 : f32
    %305 = vector.broadcast %cst_74 : f32 to vector<8x32xf32>
    %306 = arith.subf %305, %299 : vector<8x32xf32>
    %307 = arith.mulf %306, %304 : vector<8x32xf32>
    %308 = arith.mulf %299, %247 : vector<8x32xf32>
    %309 = arith.addf %307, %308 : vector<8x32xf32>
    %cst_75 = arith.constant dense<0.000000e+00> : vector<8x96xf32>
    %310 = tpu.matmul %277, %25, %cst_75 {dimension_numbers = #tpu.dot_dimension_numbers<[1], [0], [0], [1], [0, 0, 1, 1], [], []>} : vector<8x32xf32>, vector<32x96xf32>, vector<8x96xf32> -> vector<8x96xf32>
    %311 = vector.broadcast %29 : vector<1x96xf32> to vector<8x96xf32>
    %312 = arith.addf %310, %311 : vector<8x96xf32>
    %313 = vector.extract_strided_slice %21 {offsets = [24, 0], sizes = [8, 96], strides = [1, 1]} : vector<64x96xf32> to vector<8x96xf32>
    %314 = vector.extract_strided_slice %313 {offsets = [0, 0], sizes = [8, 32], strides = [1, 1]} : vector<8x96xf32> to vector<8x32xf32>
    %315 = vector.extract_strided_slice %312 {offsets = [0, 0], sizes = [8, 32], strides = [1, 1]} : vector<8x96xf32> to vector<8x32xf32>
    %316 = arith.addf %314, %315 : vector<8x32xf32>
    %317 = arith.negf %316 : vector<8x32xf32>
    %318 = math.exp %317 : vector<8x32xf32>
    %cst_76 = arith.constant 1.000000e+00 : f32
    %319 = vector.broadcast %cst_76 : f32 to vector<8x32xf32>
    %320 = arith.addf %319, %318 : vector<8x32xf32>
    %321 = arith.divf %319, %320 : vector<8x32xf32>
    %322 = vector.extract_strided_slice %313 {offsets = [0, 32], sizes = [8, 32], strides = [1, 1]} : vector<8x96xf32> to vector<8x32xf32>
    %323 = vector.extract_strided_slice %312 {offsets = [0, 32], sizes = [8, 32], strides = [1, 1]} : vector<8x96xf32> to vector<8x32xf32>
    %324 = arith.addf %322, %323 : vector<8x32xf32>
    %325 = arith.negf %324 : vector<8x32xf32>
    %326 = math.exp %325 : vector<8x32xf32>
    %cst_77 = arith.constant 1.000000e+00 : f32
    %327 = vector.broadcast %cst_77 : f32 to vector<8x32xf32>
    %328 = arith.addf %327, %326 : vector<8x32xf32>
    %329 = arith.divf %327, %328 : vector<8x32xf32>
    %330 = vector.extract_strided_slice %313 {offsets = [0, 64], sizes = [8, 32], strides = [1, 1]} : vector<8x96xf32> to vector<8x32xf32>
    %331 = vector.extract_strided_slice %312 {offsets = [0, 64], sizes = [8, 32], strides = [1, 1]} : vector<8x96xf32> to vector<8x32xf32>
    %332 = arith.mulf %321, %331 : vector<8x32xf32>
    %333 = arith.addf %330, %332 : vector<8x32xf32>
    %334 = math.tanh %333 : vector<8x32xf32>
    %cst_78 = arith.constant 1.000000e+00 : f32
    %335 = vector.broadcast %cst_78 : f32 to vector<8x32xf32>
    %336 = arith.subf %335, %329 : vector<8x32xf32>
    %337 = arith.mulf %336, %334 : vector<8x32xf32>
    %338 = arith.mulf %329, %277 : vector<8x32xf32>
    %339 = arith.addf %337, %338 : vector<8x32xf32>
    %c32_79 = arith.constant 32 : index
    %c0_80 = arith.constant 0 : index
    %340 = vector.load %arg19[%c32_79, %c0_80] : memref<64x32xf32, #tpu.memory_space<vmem>>, vector<8x32xf32>
    tpu.vector_store %arg19[%c32_79, %c0_80], %309 {strides = array<i32>} : memref<64x32xf32, #tpu.memory_space<vmem>>, vector<8x32xf32>,
    %c24_81 = arith.constant 24 : index
    %c0_82 = arith.constant 0 : index
    %341 = vector.load %arg20[%c24_81, %c0_82] : memref<64x32xf32, #tpu.memory_space<vmem>>, vector<8x32xf32>
    tpu.vector_store %arg20[%c24_81, %c0_82], %339 {strides = array<i32>} : memref<64x32xf32, #tpu.memory_space<vmem>>, vector<8x32xf32>,
    %cst_83 = arith.constant dense<0.000000e+00> : vector<8x96xf32>
    %342 = tpu.matmul %309, %23, %cst_83 {dimension_numbers = #tpu.dot_dimension_numbers<[1], [0], [0], [1], [0, 0, 1, 1], [], []>} : vector<8x32xf32>, vector<32x96xf32>, vector<8x96xf32> -> vector<8x96xf32>
    %343 = vector.broadcast %27 : vector<1x96xf32> to vector<8x96xf32>
    %344 = arith.addf %342, %343 : vector<8x96xf32>
    %345 = vector.extract_strided_slice %16 {offsets = [40, 0], sizes = [8, 96], strides = [1, 1]} : vector<64x96xf32> to vector<8x96xf32>
    %346 = vector.extract_strided_slice %345 {offsets = [0, 0], sizes = [8, 32], strides = [1, 1]} : vector<8x96xf32> to vector<8x32xf32>
    %347 = vector.extract_strided_slice %344 {offsets = [0, 0], sizes = [8, 32], strides = [1, 1]} : vector<8x96xf32> to vector<8x32xf32>
    %348 = arith.addf %346, %347 : vector<8x32xf32>
    %349 = arith.negf %348 : vector<8x32xf32>
    %350 = math.exp %349 : vector<8x32xf32>
    %cst_84 = arith.constant 1.000000e+00 : f32
    %351 = vector.broadcast %cst_84 : f32 to vector<8x32xf32>
    %352 = arith.addf %351, %350 : vector<8x32xf32>
    %353 = arith.divf %351, %352 : vector<8x32xf32>
    %354 = vector.extract_strided_slice %345 {offsets = [0, 32], sizes = [8, 32], strides = [1, 1]} : vector<8x96xf32> to vector<8x32xf32>
    %355 = vector.extract_strided_slice %344 {offsets = [0, 32], sizes = [8, 32], strides = [1, 1]} : vector<8x96xf32> to vector<8x32xf32>
    %356 = arith.addf %354, %355 : vector<8x32xf32>
    %357 = arith.negf %356 : vector<8x32xf32>
    %358 = math.exp %357 : vector<8x32xf32>
    %cst_85 = arith.constant 1.000000e+00 : f32
    %359 = vector.broadcast %cst_85 : f32 to vector<8x32xf32>
    %360 = arith.addf %359, %358 : vector<8x32xf32>
    %361 = arith.divf %359, %360 : vector<8x32xf32>
    %362 = vector.extract_strided_slice %345 {offsets = [0, 64], sizes = [8, 32], strides = [1, 1]} : vector<8x96xf32> to vector<8x32xf32>
    %363 = vector.extract_strided_slice %344 {offsets = [0, 64], sizes = [8, 32], strides = [1, 1]} : vector<8x96xf32> to vector<8x32xf32>
    %364 = arith.mulf %353, %363 : vector<8x32xf32>
    %365 = arith.addf %362, %364 : vector<8x32xf32>
    %366 = math.tanh %365 : vector<8x32xf32>
    %cst_86 = arith.constant 1.000000e+00 : f32
    %367 = vector.broadcast %cst_86 : f32 to vector<8x32xf32>
    %368 = arith.subf %367, %361 : vector<8x32xf32>
    %369 = arith.mulf %368, %366 : vector<8x32xf32>
    %370 = arith.mulf %361, %309 : vector<8x32xf32>
    %371 = arith.addf %369, %370 : vector<8x32xf32>
    %cst_87 = arith.constant dense<0.000000e+00> : vector<8x96xf32>
    %372 = tpu.matmul %339, %25, %cst_87 {dimension_numbers = #tpu.dot_dimension_numbers<[1], [0], [0], [1], [0, 0, 1, 1], [], []>} : vector<8x32xf32>, vector<32x96xf32>, vector<8x96xf32> -> vector<8x96xf32>
    %373 = vector.broadcast %29 : vector<1x96xf32> to vector<8x96xf32>
    %374 = arith.addf %372, %373 : vector<8x96xf32>
    %375 = vector.extract_strided_slice %21 {offsets = [16, 0], sizes = [8, 96], strides = [1, 1]} : vector<64x96xf32> to vector<8x96xf32>
    %376 = vector.extract_strided_slice %375 {offsets = [0, 0], sizes = [8, 32], strides = [1, 1]} : vector<8x96xf32> to vector<8x32xf32>
    %377 = vector.extract_strided_slice %374 {offsets = [0, 0], sizes = [8, 32], strides = [1, 1]} : vector<8x96xf32> to vector<8x32xf32>
    %378 = arith.addf %376, %377 : vector<8x32xf32>
    %379 = arith.negf %378 : vector<8x32xf32>
    %380 = math.exp %379 : vector<8x32xf32>
    %cst_88 = arith.constant 1.000000e+00 : f32
    %381 = vector.broadcast %cst_88 : f32 to vector<8x32xf32>
    %382 = arith.addf %381, %380 : vector<8x32xf32>
    %383 = arith.divf %381, %382 : vector<8x32xf32>
    %384 = vector.extract_strided_slice %375 {offsets = [0, 32], sizes = [8, 32], strides = [1, 1]} : vector<8x96xf32> to vector<8x32xf32>
    %385 = vector.extract_strided_slice %374 {offsets = [0, 32], sizes = [8, 32], strides = [1, 1]} : vector<8x96xf32> to vector<8x32xf32>
    %386 = arith.addf %384, %385 : vector<8x32xf32>
    %387 = arith.negf %386 : vector<8x32xf32>
    %388 = math.exp %387 : vector<8x32xf32>
    %cst_89 = arith.constant 1.000000e+00 : f32
    %389 = vector.broadcast %cst_89 : f32 to vector<8x32xf32>
    %390 = arith.addf %389, %388 : vector<8x32xf32>
    %391 = arith.divf %389, %390 : vector<8x32xf32>
    %392 = vector.extract_strided_slice %375 {offsets = [0, 64], sizes = [8, 32], strides = [1, 1]} : vector<8x96xf32> to vector<8x32xf32>
    %393 = vector.extract_strided_slice %374 {offsets = [0, 64], sizes = [8, 32], strides = [1, 1]} : vector<8x96xf32> to vector<8x32xf32>
    %394 = arith.mulf %383, %393 : vector<8x32xf32>
    %395 = arith.addf %392, %394 : vector<8x32xf32>
    %396 = math.tanh %395 : vector<8x32xf32>
    %cst_90 = arith.constant 1.000000e+00 : f32
    %397 = vector.broadcast %cst_90 : f32 to vector<8x32xf32>
    %398 = arith.subf %397, %391 : vector<8x32xf32>
    %399 = arith.mulf %398, %396 : vector<8x32xf32>
    %400 = arith.mulf %391, %339 : vector<8x32xf32>
    %401 = arith.addf %399, %400 : vector<8x32xf32>
    %c40_91 = arith.constant 40 : index
    %c0_92 = arith.constant 0 : index
    %402 = vector.load %arg19[%c40_91, %c0_92] : memref<64x32xf32, #tpu.memory_space<vmem>>, vector<8x32xf32>
    tpu.vector_store %arg19[%c40_91, %c0_92], %371 {strides = array<i32>} : memref<64x32xf32, #tpu.memory_space<vmem>>, vector<8x32xf32>,
    %c16_93 = arith.constant 16 : index
    %c0_94 = arith.constant 0 : index
    %403 = vector.load %arg20[%c16_93, %c0_94] : memref<64x32xf32, #tpu.memory_space<vmem>>, vector<8x32xf32>
    tpu.vector_store %arg20[%c16_93, %c0_94], %401 {strides = array<i32>} : memref<64x32xf32, #tpu.memory_space<vmem>>, vector<8x32xf32>,
    %cst_95 = arith.constant dense<0.000000e+00> : vector<8x96xf32>
    %404 = tpu.matmul %371, %23, %cst_95 {dimension_numbers = #tpu.dot_dimension_numbers<[1], [0], [0], [1], [0, 0, 1, 1], [], []>} : vector<8x32xf32>, vector<32x96xf32>, vector<8x96xf32> -> vector<8x96xf32>
    %405 = vector.broadcast %27 : vector<1x96xf32> to vector<8x96xf32>
    %406 = arith.addf %404, %405 : vector<8x96xf32>
    %407 = vector.extract_strided_slice %16 {offsets = [48, 0], sizes = [8, 96], strides = [1, 1]} : vector<64x96xf32> to vector<8x96xf32>
    %408 = vector.extract_strided_slice %407 {offsets = [0, 0], sizes = [8, 32], strides = [1, 1]} : vector<8x96xf32> to vector<8x32xf32>
    %409 = vector.extract_strided_slice %406 {offsets = [0, 0], sizes = [8, 32], strides = [1, 1]} : vector<8x96xf32> to vector<8x32xf32>
    %410 = arith.addf %408, %409 : vector<8x32xf32>
    %411 = arith.negf %410 : vector<8x32xf32>
    %412 = math.exp %411 : vector<8x32xf32>
    %cst_96 = arith.constant 1.000000e+00 : f32
    %413 = vector.broadcast %cst_96 : f32 to vector<8x32xf32>
    %414 = arith.addf %413, %412 : vector<8x32xf32>
    %415 = arith.divf %413, %414 : vector<8x32xf32>
    %416 = vector.extract_strided_slice %407 {offsets = [0, 32], sizes = [8, 32], strides = [1, 1]} : vector<8x96xf32> to vector<8x32xf32>
    %417 = vector.extract_strided_slice %406 {offsets = [0, 32], sizes = [8, 32], strides = [1, 1]} : vector<8x96xf32> to vector<8x32xf32>
    %418 = arith.addf %416, %417 : vector<8x32xf32>
    %419 = arith.negf %418 : vector<8x32xf32>
    %420 = math.exp %419 : vector<8x32xf32>
    %cst_97 = arith.constant 1.000000e+00 : f32
    %421 = vector.broadcast %cst_97 : f32 to vector<8x32xf32>
    %422 = arith.addf %421, %420 : vector<8x32xf32>
    %423 = arith.divf %421, %422 : vector<8x32xf32>
    %424 = vector.extract_strided_slice %407 {offsets = [0, 64], sizes = [8, 32], strides = [1, 1]} : vector<8x96xf32> to vector<8x32xf32>
    %425 = vector.extract_strided_slice %406 {offsets = [0, 64], sizes = [8, 32], strides = [1, 1]} : vector<8x96xf32> to vector<8x32xf32>
    %426 = arith.mulf %415, %425 : vector<8x32xf32>
    %427 = arith.addf %424, %426 : vector<8x32xf32>
    %428 = math.tanh %427 : vector<8x32xf32>
    %cst_98 = arith.constant 1.000000e+00 : f32
    %429 = vector.broadcast %cst_98 : f32 to vector<8x32xf32>
    %430 = arith.subf %429, %423 : vector<8x32xf32>
    %431 = arith.mulf %430, %428 : vector<8x32xf32>
    %432 = arith.mulf %423, %371 : vector<8x32xf32>
    %433 = arith.addf %431, %432 : vector<8x32xf32>
    %cst_99 = arith.constant dense<0.000000e+00> : vector<8x96xf32>
    %434 = tpu.matmul %401, %25, %cst_99 {dimension_numbers = #tpu.dot_dimension_numbers<[1], [0], [0], [1], [0, 0, 1, 1], [], []>} : vector<8x32xf32>, vector<32x96xf32>, vector<8x96xf32> -> vector<8x96xf32>
    %435 = vector.broadcast %29 : vector<1x96xf32> to vector<8x96xf32>
    %436 = arith.addf %434, %435 : vector<8x96xf32>
    %437 = vector.extract_strided_slice %21 {offsets = [8, 0], sizes = [8, 96], strides = [1, 1]} : vector<64x96xf32> to vector<8x96xf32>
    %438 = vector.extract_strided_slice %437 {offsets = [0, 0], sizes = [8, 32], strides = [1, 1]} : vector<8x96xf32> to vector<8x32xf32>
    %439 = vector.extract_strided_slice %436 {offsets = [0, 0], sizes = [8, 32], strides = [1, 1]} : vector<8x96xf32> to vector<8x32xf32>
    %440 = arith.addf %438, %439 : vector<8x32xf32>
    %441 = arith.negf %440 : vector<8x32xf32>
    %442 = math.exp %441 : vector<8x32xf32>
    %cst_100 = arith.constant 1.000000e+00 : f32
    %443 = vector.broadcast %cst_100 : f32 to vector<8x32xf32>
    %444 = arith.addf %443, %442 : vector<8x32xf32>
    %445 = arith.divf %443, %444 : vector<8x32xf32>
    %446 = vector.extract_strided_slice %437 {offsets = [0, 32], sizes = [8, 32], strides = [1, 1]} : vector<8x96xf32> to vector<8x32xf32>
    %447 = vector.extract_strided_slice %436 {offsets = [0, 32], sizes = [8, 32], strides = [1, 1]} : vector<8x96xf32> to vector<8x32xf32>
    %448 = arith.addf %446, %447 : vector<8x32xf32>
    %449 = arith.negf %448 : vector<8x32xf32>
    %450 = math.exp %449 : vector<8x32xf32>
    %cst_101 = arith.constant 1.000000e+00 : f32
    %451 = vector.broadcast %cst_101 : f32 to vector<8x32xf32>
    %452 = arith.addf %451, %450 : vector<8x32xf32>
    %453 = arith.divf %451, %452 : vector<8x32xf32>
    %454 = vector.extract_strided_slice %437 {offsets = [0, 64], sizes = [8, 32], strides = [1, 1]} : vector<8x96xf32> to vector<8x32xf32>
    %455 = vector.extract_strided_slice %436 {offsets = [0, 64], sizes = [8, 32], strides = [1, 1]} : vector<8x96xf32> to vector<8x32xf32>
    %456 = arith.mulf %445, %455 : vector<8x32xf32>
    %457 = arith.addf %454, %456 : vector<8x32xf32>
    %458 = math.tanh %457 : vector<8x32xf32>
    %cst_102 = arith.constant 1.000000e+00 : f32
    %459 = vector.broadcast %cst_102 : f32 to vector<8x32xf32>
    %460 = arith.subf %459, %453 : vector<8x32xf32>
    %461 = arith.mulf %460, %458 : vector<8x32xf32>
    %462 = arith.mulf %453, %401 : vector<8x32xf32>
    %463 = arith.addf %461, %462 : vector<8x32xf32>
    %c48_103 = arith.constant 48 : index
    %c0_104 = arith.constant 0 : index
    %464 = vector.load %arg19[%c48_103, %c0_104] : memref<64x32xf32, #tpu.memory_space<vmem>>, vector<8x32xf32>
    tpu.vector_store %arg19[%c48_103, %c0_104], %433 {strides = array<i32>} : memref<64x32xf32, #tpu.memory_space<vmem>>, vector<8x32xf32>,
    %c8_105 = arith.constant 8 : index
    %c0_106 = arith.constant 0 : index
    %465 = vector.load %arg20[%c8_105, %c0_106] : memref<64x32xf32, #tpu.memory_space<vmem>>, vector<8x32xf32>
    tpu.vector_store %arg20[%c8_105, %c0_106], %463 {strides = array<i32>} : memref<64x32xf32, #tpu.memory_space<vmem>>, vector<8x32xf32>,
    %cst_107 = arith.constant dense<0.000000e+00> : vector<8x96xf32>
    %466 = tpu.matmul %433, %23, %cst_107 {dimension_numbers = #tpu.dot_dimension_numbers<[1], [0], [0], [1], [0, 0, 1, 1], [], []>} : vector<8x32xf32>, vector<32x96xf32>, vector<8x96xf32> -> vector<8x96xf32>
    %467 = vector.broadcast %27 : vector<1x96xf32> to vector<8x96xf32>
    %468 = arith.addf %466, %467 : vector<8x96xf32>
    %469 = vector.extract_strided_slice %16 {offsets = [56, 0], sizes = [8, 96], strides = [1, 1]} : vector<64x96xf32> to vector<8x96xf32>
    %470 = vector.extract_strided_slice %469 {offsets = [0, 0], sizes = [8, 32], strides = [1, 1]} : vector<8x96xf32> to vector<8x32xf32>
    %471 = vector.extract_strided_slice %468 {offsets = [0, 0], sizes = [8, 32], strides = [1, 1]} : vector<8x96xf32> to vector<8x32xf32>
    %472 = arith.addf %470, %471 : vector<8x32xf32>
    %473 = arith.negf %472 : vector<8x32xf32>
    %474 = math.exp %473 : vector<8x32xf32>
    %cst_108 = arith.constant 1.000000e+00 : f32
    %475 = vector.broadcast %cst_108 : f32 to vector<8x32xf32>
    %476 = arith.addf %475, %474 : vector<8x32xf32>
    %477 = arith.divf %475, %476 : vector<8x32xf32>
    %478 = vector.extract_strided_slice %469 {offsets = [0, 32], sizes = [8, 32], strides = [1, 1]} : vector<8x96xf32> to vector<8x32xf32>
    %479 = vector.extract_strided_slice %468 {offsets = [0, 32], sizes = [8, 32], strides = [1, 1]} : vector<8x96xf32> to vector<8x32xf32>
    %480 = arith.addf %478, %479 : vector<8x32xf32>
    %481 = arith.negf %480 : vector<8x32xf32>
    %482 = math.exp %481 : vector<8x32xf32>
    %cst_109 = arith.constant 1.000000e+00 : f32
    %483 = vector.broadcast %cst_109 : f32 to vector<8x32xf32>
    %484 = arith.addf %483, %482 : vector<8x32xf32>
    %485 = arith.divf %483, %484 : vector<8x32xf32>
    %486 = vector.extract_strided_slice %469 {offsets = [0, 64], sizes = [8, 32], strides = [1, 1]} : vector<8x96xf32> to vector<8x32xf32>
    %487 = vector.extract_strided_slice %468 {offsets = [0, 64], sizes = [8, 32], strides = [1, 1]} : vector<8x96xf32> to vector<8x32xf32>
    %488 = arith.mulf %477, %487 : vector<8x32xf32>
    %489 = arith.addf %486, %488 : vector<8x32xf32>
    %490 = math.tanh %489 : vector<8x32xf32>
    %cst_110 = arith.constant 1.000000e+00 : f32
    %491 = vector.broadcast %cst_110 : f32 to vector<8x32xf32>
    %492 = arith.subf %491, %485 : vector<8x32xf32>
    %493 = arith.mulf %492, %490 : vector<8x32xf32>
    %494 = arith.mulf %485, %433 : vector<8x32xf32>
    %495 = arith.addf %493, %494 : vector<8x32xf32>
    %cst_111 = arith.constant dense<0.000000e+00> : vector<8x96xf32>
    %496 = tpu.matmul %463, %25, %cst_111 {dimension_numbers = #tpu.dot_dimension_numbers<[1], [0], [0], [1], [0, 0, 1, 1], [], []>} : vector<8x32xf32>, vector<32x96xf32>, vector<8x96xf32> -> vector<8x96xf32>
    %497 = vector.broadcast %29 : vector<1x96xf32> to vector<8x96xf32>
    %498 = arith.addf %496, %497 : vector<8x96xf32>
    %499 = vector.extract_strided_slice %21 {offsets = [0, 0], sizes = [8, 96], strides = [1, 1]} : vector<64x96xf32> to vector<8x96xf32>
    %500 = vector.extract_strided_slice %499 {offsets = [0, 0], sizes = [8, 32], strides = [1, 1]} : vector<8x96xf32> to vector<8x32xf32>
    %501 = vector.extract_strided_slice %498 {offsets = [0, 0], sizes = [8, 32], strides = [1, 1]} : vector<8x96xf32> to vector<8x32xf32>
    %502 = arith.addf %500, %501 : vector<8x32xf32>
    %503 = arith.negf %502 : vector<8x32xf32>
    %504 = math.exp %503 : vector<8x32xf32>
    %cst_112 = arith.constant 1.000000e+00 : f32
    %505 = vector.broadcast %cst_112 : f32 to vector<8x32xf32>
    %506 = arith.addf %505, %504 : vector<8x32xf32>
    %507 = arith.divf %505, %506 : vector<8x32xf32>
    %508 = vector.extract_strided_slice %499 {offsets = [0, 32], sizes = [8, 32], strides = [1, 1]} : vector<8x96xf32> to vector<8x32xf32>
    %509 = vector.extract_strided_slice %498 {offsets = [0, 32], sizes = [8, 32], strides = [1, 1]} : vector<8x96xf32> to vector<8x32xf32>
    %510 = arith.addf %508, %509 : vector<8x32xf32>
    %511 = arith.negf %510 : vector<8x32xf32>
    %512 = math.exp %511 : vector<8x32xf32>
    %cst_113 = arith.constant 1.000000e+00 : f32
    %513 = vector.broadcast %cst_113 : f32 to vector<8x32xf32>
    %514 = arith.addf %513, %512 : vector<8x32xf32>
    %515 = arith.divf %513, %514 : vector<8x32xf32>
    %516 = vector.extract_strided_slice %499 {offsets = [0, 64], sizes = [8, 32], strides = [1, 1]} : vector<8x96xf32> to vector<8x32xf32>
    %517 = vector.extract_strided_slice %498 {offsets = [0, 64], sizes = [8, 32], strides = [1, 1]} : vector<8x96xf32> to vector<8x32xf32>
    %518 = arith.mulf %507, %517 : vector<8x32xf32>
    %519 = arith.addf %516, %518 : vector<8x32xf32>
    %520 = math.tanh %519 : vector<8x32xf32>
    %cst_114 = arith.constant 1.000000e+00 : f32
    %521 = vector.broadcast %cst_114 : f32 to vector<8x32xf32>
    %522 = arith.subf %521, %515 : vector<8x32xf32>
    %523 = arith.mulf %522, %520 : vector<8x32xf32>
    %524 = arith.mulf %515, %463 : vector<8x32xf32>
    %525 = arith.addf %523, %524 : vector<8x32xf32>
    %c56_115 = arith.constant 56 : index
    %c0_116 = arith.constant 0 : index
    %526 = vector.load %arg19[%c56_115, %c0_116] : memref<64x32xf32, #tpu.memory_space<vmem>>, vector<8x32xf32>
    tpu.vector_store %arg19[%c56_115, %c0_116], %495 {strides = array<i32>} : memref<64x32xf32, #tpu.memory_space<vmem>>, vector<8x32xf32>,
    %c0_117 = arith.constant 0 : index
    %c0_118 = arith.constant 0 : index
    %527 = vector.load %arg20[%c0_117, %c0_118] : memref<64x32xf32, #tpu.memory_space<vmem>>, vector<8x32xf32>
    tpu.vector_store %arg20[%c0_117, %c0_118], %525 {strides = array<i32>} : memref<64x32xf32, #tpu.memory_space<vmem>>, vector<8x32xf32>,
    %c0_119 = arith.constant 0 : index
    %c0_120 = arith.constant 0 : index
    %c0_121 = arith.constant 0 : index
    %528 = vector.load %arg7[%c0_119, %c0_120, %c0_121] : memref<2x1x96xf32, #tpu.memory_space<vmem>>, vector<1x1x96xf32>
    %529 = vector.shape_cast %528 : vector<1x1x96xf32> to vector<1x96xf32>
    %c1_122 = arith.constant 1 : index
    %c0_123 = arith.constant 0 : index
    %c0_124 = arith.constant 0 : index
    %530 = vector.load %arg7[%c1_122, %c0_123, %c0_124] : memref<2x1x96xf32, #tpu.memory_space<vmem>>, vector<1x1x96xf32>
    %531 = vector.shape_cast %530 : vector<1x1x96xf32> to vector<1x96xf32>
    %c0_125 = arith.constant 0 : index
    %c0_126 = arith.constant 0 : index
    %532 = vector.load %arg19[%c0_125, %c0_126] : memref<64x32xf32, #tpu.memory_space<vmem>>, vector<64x32xf32>
    %c0_127 = arith.constant 0 : index
    %c0_128 = arith.constant 0 : index
    %533 = vector.load %arg20[%c0_127, %c0_128] : memref<64x32xf32, #tpu.memory_space<vmem>>, vector<64x32xf32>
    %c0_129 = arith.constant 0 : index
    %c0_130 = arith.constant 0 : index
    %c0_131 = arith.constant 0 : index
    %534 = vector.load %arg6[%c0_129, %c0_130, %c0_131] : memref<2x64x96xf32, #tpu.memory_space<vmem>>, vector<1x64x96xf32>
    %535 = vector.shape_cast %534 : vector<1x64x96xf32> to vector<64x96xf32>
    %c1_132 = arith.constant 1 : index
    %c0_133 = arith.constant 0 : index
    %c0_134 = arith.constant 0 : index
    %536 = vector.load %arg6[%c1_132, %c0_133, %c0_134] : memref<2x64x96xf32, #tpu.memory_space<vmem>>, vector<1x64x96xf32>
    %537 = vector.shape_cast %536 : vector<1x64x96xf32> to vector<64x96xf32>
    %538 = vector.extract_strided_slice %535 {offsets = [0, 0], sizes = [32, 96], strides = [1, 1]} : vector<64x96xf32> to vector<32x96xf32>
    %cst_135 = arith.constant dense<0.000000e+00> : vector<64x96xf32>
    %539 = tpu.matmul %532, %538, %cst_135 {dimension_numbers = #tpu.dot_dimension_numbers<[1], [0], [0], [1], [0, 0, 1, 1], [], []>} : vector<64x32xf32>, vector<32x96xf32>, vector<64x96xf32> -> vector<64x96xf32>
    %540 = vector.extract_strided_slice %535 {offsets = [32, 0], sizes = [32, 96], strides = [1, 1]} : vector<64x96xf32> to vector<32x96xf32>
    %cst_136 = arith.constant dense<0.000000e+00> : vector<64x96xf32>
    %541 = tpu.matmul %533, %540, %cst_136 {dimension_numbers = #tpu.dot_dimension_numbers<[1], [0], [0], [1], [0, 0, 1, 1], [], []>} : vector<64x32xf32>, vector<32x96xf32>, vector<64x96xf32> -> vector<64x96xf32>
    %542 = arith.addf %539, %541 : vector<64x96xf32>
    %543 = vector.broadcast %529 : vector<1x96xf32> to vector<64x96xf32>
    %544 = arith.addf %542, %543 : vector<64x96xf32>
    %545 = vector.extract_strided_slice %537 {offsets = [0, 0], sizes = [32, 96], strides = [1, 1]} : vector<64x96xf32> to vector<32x96xf32>
    %cst_137 = arith.constant dense<0.000000e+00> : vector<64x96xf32>
    %546 = tpu.matmul %532, %545, %cst_137 {dimension_numbers = #tpu.dot_dimension_numbers<[1], [0], [0], [1], [0, 0, 1, 1], [], []>} : vector<64x32xf32>, vector<32x96xf32>, vector<64x96xf32> -> vector<64x96xf32>
    %547 = vector.extract_strided_slice %537 {offsets = [32, 0], sizes = [32, 96], strides = [1, 1]} : vector<64x96xf32> to vector<32x96xf32>
    %cst_138 = arith.constant dense<0.000000e+00> : vector<64x96xf32>
    %548 = tpu.matmul %533, %547, %cst_138 {dimension_numbers = #tpu.dot_dimension_numbers<[1], [0], [0], [1], [0, 0, 1, 1], [], []>} : vector<64x32xf32>, vector<32x96xf32>, vector<64x96xf32> -> vector<64x96xf32>
    %549 = arith.addf %546, %548 : vector<64x96xf32>
    %550 = vector.broadcast %531 : vector<1x96xf32> to vector<64x96xf32>
    %551 = arith.addf %549, %550 : vector<64x96xf32>
    %c0_139 = arith.constant 0 : index
    %c0_140 = arith.constant 0 : index
    %c0_141 = arith.constant 0 : index
    %552 = vector.load %arg8[%c0_139, %c0_140, %c0_141] : memref<2x32x96xf32, #tpu.memory_space<vmem>>, vector<1x32x96xf32>
    %553 = vector.shape_cast %552 : vector<1x32x96xf32> to vector<32x96xf32>
    %c1_142 = arith.constant 1 : index
    %c0_143 = arith.constant 0 : index
    %c0_144 = arith.constant 0 : index
    %554 = vector.load %arg8[%c1_142, %c0_143, %c0_144] : memref<2x32x96xf32, #tpu.memory_space<vmem>>, vector<1x32x96xf32>
    %555 = vector.shape_cast %554 : vector<1x32x96xf32> to vector<32x96xf32>
    %c0_145 = arith.constant 0 : index
    %c0_146 = arith.constant 0 : index
    %c0_147 = arith.constant 0 : index
    %556 = vector.load %arg9[%c0_145, %c0_146, %c0_147] : memref<2x1x96xf32, #tpu.memory_space<vmem>>, vector<1x1x96xf32>
    %557 = vector.shape_cast %556 : vector<1x1x96xf32> to vector<1x96xf32>
    %c1_148 = arith.constant 1 : index
    %c0_149 = arith.constant 0 : index
    %c0_150 = arith.constant 0 : index
    %558 = vector.load %arg9[%c1_148, %c0_149, %c0_150] : memref<2x1x96xf32, #tpu.memory_space<vmem>>, vector<1x1x96xf32>
    %559 = vector.shape_cast %558 : vector<1x1x96xf32> to vector<1x96xf32>
    %cst_151 = arith.constant 0.000000e+00 : f32
    %560 = vector.broadcast %cst_151 : f32 to vector<8x32xf32>
    %cst_152 = arith.constant 0.000000e+00 : f32
    %561 = vector.broadcast %cst_152 : f32 to vector<8x32xf32>
    %cst_153 = arith.constant dense<0.000000e+00> : vector<8x96xf32>
    %562 = tpu.matmul %560, %553, %cst_153 {dimension_numbers = #tpu.dot_dimension_numbers<[1], [0], [0], [1], [0, 0, 1, 1], [], []>} : vector<8x32xf32>, vector<32x96xf32>, vector<8x96xf32> -> vector<8x96xf32>
    %563 = vector.broadcast %557 : vector<1x96xf32> to vector<8x96xf32>
    %564 = arith.addf %562, %563 : vector<8x96xf32>
    %565 = vector.extract_strided_slice %544 {offsets = [0, 0], sizes = [8, 96], strides = [1, 1]} : vector<64x96xf32> to vector<8x96xf32>
    %566 = vector.extract_strided_slice %565 {offsets = [0, 0], sizes = [8, 32], strides = [1, 1]} : vector<8x96xf32> to vector<8x32xf32>
    %567 = vector.extract_strided_slice %564 {offsets = [0, 0], sizes = [8, 32], strides = [1, 1]} : vector<8x96xf32> to vector<8x32xf32>
    %568 = arith.addf %566, %567 : vector<8x32xf32>
    %569 = arith.negf %568 : vector<8x32xf32>
    %570 = math.exp %569 : vector<8x32xf32>
    %cst_154 = arith.constant 1.000000e+00 : f32
    %571 = vector.broadcast %cst_154 : f32 to vector<8x32xf32>
    %572 = arith.addf %571, %570 : vector<8x32xf32>
    %573 = arith.divf %571, %572 : vector<8x32xf32>
    %574 = vector.extract_strided_slice %565 {offsets = [0, 32], sizes = [8, 32], strides = [1, 1]} : vector<8x96xf32> to vector<8x32xf32>
    %575 = vector.extract_strided_slice %564 {offsets = [0, 32], sizes = [8, 32], strides = [1, 1]} : vector<8x96xf32> to vector<8x32xf32>
    %576 = arith.addf %574, %575 : vector<8x32xf32>
    %577 = arith.negf %576 : vector<8x32xf32>
    %578 = math.exp %577 : vector<8x32xf32>
    %cst_155 = arith.constant 1.000000e+00 : f32
    %579 = vector.broadcast %cst_155 : f32 to vector<8x32xf32>
    %580 = arith.addf %579, %578 : vector<8x32xf32>
    %581 = arith.divf %579, %580 : vector<8x32xf32>
    %582 = vector.extract_strided_slice %565 {offsets = [0, 64], sizes = [8, 32], strides = [1, 1]} : vector<8x96xf32> to vector<8x32xf32>
    %583 = vector.extract_strided_slice %564 {offsets = [0, 64], sizes = [8, 32], strides = [1, 1]} : vector<8x96xf32> to vector<8x32xf32>
    %584 = arith.mulf %573, %583 : vector<8x32xf32>
    %585 = arith.addf %582, %584 : vector<8x32xf32>
    %586 = math.tanh %585 : vector<8x32xf32>
    %cst_156 = arith.constant 1.000000e+00 : f32
    %587 = vector.broadcast %cst_156 : f32 to vector<8x32xf32>
    %588 = arith.subf %587, %581 : vector<8x32xf32>
    %589 = arith.mulf %588, %586 : vector<8x32xf32>
    %590 = arith.mulf %581, %560 : vector<8x32xf32>
    %591 = arith.addf %589, %590 : vector<8x32xf32>
    %cst_157 = arith.constant dense<0.000000e+00> : vector<8x96xf32>
    %592 = tpu.matmul %561, %555, %cst_157 {dimension_numbers = #tpu.dot_dimension_numbers<[1], [0], [0], [1], [0, 0, 1, 1], [], []>} : vector<8x32xf32>, vector<32x96xf32>, vector<8x96xf32> -> vector<8x96xf32>
    %593 = vector.broadcast %559 : vector<1x96xf32> to vector<8x96xf32>
    %594 = arith.addf %592, %593 : vector<8x96xf32>
    %595 = vector.extract_strided_slice %551 {offsets = [56, 0], sizes = [8, 96], strides = [1, 1]} : vector<64x96xf32> to vector<8x96xf32>
    %596 = vector.extract_strided_slice %595 {offsets = [0, 0], sizes = [8, 32], strides = [1, 1]} : vector<8x96xf32> to vector<8x32xf32>
    %597 = vector.extract_strided_slice %594 {offsets = [0, 0], sizes = [8, 32], strides = [1, 1]} : vector<8x96xf32> to vector<8x32xf32>
    %598 = arith.addf %596, %597 : vector<8x32xf32>
    %599 = arith.negf %598 : vector<8x32xf32>
    %600 = math.exp %599 : vector<8x32xf32>
    %cst_158 = arith.constant 1.000000e+00 : f32
    %601 = vector.broadcast %cst_158 : f32 to vector<8x32xf32>
    %602 = arith.addf %601, %600 : vector<8x32xf32>
    %603 = arith.divf %601, %602 : vector<8x32xf32>
    %604 = vector.extract_strided_slice %595 {offsets = [0, 32], sizes = [8, 32], strides = [1, 1]} : vector<8x96xf32> to vector<8x32xf32>
    %605 = vector.extract_strided_slice %594 {offsets = [0, 32], sizes = [8, 32], strides = [1, 1]} : vector<8x96xf32> to vector<8x32xf32>
    %606 = arith.addf %604, %605 : vector<8x32xf32>
    %607 = arith.negf %606 : vector<8x32xf32>
    %608 = math.exp %607 : vector<8x32xf32>
    %cst_159 = arith.constant 1.000000e+00 : f32
    %609 = vector.broadcast %cst_159 : f32 to vector<8x32xf32>
    %610 = arith.addf %609, %608 : vector<8x32xf32>
    %611 = arith.divf %609, %610 : vector<8x32xf32>
    %612 = vector.extract_strided_slice %595 {offsets = [0, 64], sizes = [8, 32], strides = [1, 1]} : vector<8x96xf32> to vector<8x32xf32>
    %613 = vector.extract_strided_slice %594 {offsets = [0, 64], sizes = [8, 32], strides = [1, 1]} : vector<8x96xf32> to vector<8x32xf32>
    %614 = arith.mulf %603, %613 : vector<8x32xf32>
    %615 = arith.addf %612, %614 : vector<8x32xf32>
    %616 = math.tanh %615 : vector<8x32xf32>
    %cst_160 = arith.constant 1.000000e+00 : f32
    %617 = vector.broadcast %cst_160 : f32 to vector<8x32xf32>
    %618 = arith.subf %617, %611 : vector<8x32xf32>
    %619 = arith.mulf %618, %616 : vector<8x32xf32>
    %620 = arith.mulf %611, %561 : vector<8x32xf32>
    %621 = arith.addf %619, %620 : vector<8x32xf32>
    %c0_161 = arith.constant 0 : index
    %c0_162 = arith.constant 0 : index
    %622 = vector.load %arg19[%c0_161, %c0_162] : memref<64x32xf32, #tpu.memory_space<vmem>>, vector<8x32xf32>
    tpu.vector_store %arg19[%c0_161, %c0_162], %591 {strides = array<i32>} : memref<64x32xf32, #tpu.memory_space<vmem>>, vector<8x32xf32>,
    %c56_163 = arith.constant 56 : index
    %c0_164 = arith.constant 0 : index
    %623 = vector.load %arg20[%c56_163, %c0_164] : memref<64x32xf32, #tpu.memory_space<vmem>>, vector<8x32xf32>
    tpu.vector_store %arg20[%c56_163, %c0_164], %621 {strides = array<i32>} : memref<64x32xf32, #tpu.memory_space<vmem>>, vector<8x32xf32>,
    %cst_165 = arith.constant dense<0.000000e+00> : vector<8x96xf32>
    %624 = tpu.matmul %591, %553, %cst_165 {dimension_numbers = #tpu.dot_dimension_numbers<[1], [0], [0], [1], [0, 0, 1, 1], [], []>} : vector<8x32xf32>, vector<32x96xf32>, vector<8x96xf32> -> vector<8x96xf32>
    %625 = vector.broadcast %557 : vector<1x96xf32> to vector<8x96xf32>
    %626 = arith.addf %624, %625 : vector<8x96xf32>
    %627 = vector.extract_strided_slice %544 {offsets = [8, 0], sizes = [8, 96], strides = [1, 1]} : vector<64x96xf32> to vector<8x96xf32>
    %628 = vector.extract_strided_slice %627 {offsets = [0, 0], sizes = [8, 32], strides = [1, 1]} : vector<8x96xf32> to vector<8x32xf32>
    %629 = vector.extract_strided_slice %626 {offsets = [0, 0], sizes = [8, 32], strides = [1, 1]} : vector<8x96xf32> to vector<8x32xf32>
    %630 = arith.addf %628, %629 : vector<8x32xf32>
    %631 = arith.negf %630 : vector<8x32xf32>
    %632 = math.exp %631 : vector<8x32xf32>
    %cst_166 = arith.constant 1.000000e+00 : f32
    %633 = vector.broadcast %cst_166 : f32 to vector<8x32xf32>
    %634 = arith.addf %633, %632 : vector<8x32xf32>
    %635 = arith.divf %633, %634 : vector<8x32xf32>
    %636 = vector.extract_strided_slice %627 {offsets = [0, 32], sizes = [8, 32], strides = [1, 1]} : vector<8x96xf32> to vector<8x32xf32>
    %637 = vector.extract_strided_slice %626 {offsets = [0, 32], sizes = [8, 32], strides = [1, 1]} : vector<8x96xf32> to vector<8x32xf32>
    %638 = arith.addf %636, %637 : vector<8x32xf32>
    %639 = arith.negf %638 : vector<8x32xf32>
    %640 = math.exp %639 : vector<8x32xf32>
    %cst_167 = arith.constant 1.000000e+00 : f32
    %641 = vector.broadcast %cst_167 : f32 to vector<8x32xf32>
    %642 = arith.addf %641, %640 : vector<8x32xf32>
    %643 = arith.divf %641, %642 : vector<8x32xf32>
    %644 = vector.extract_strided_slice %627 {offsets = [0, 64], sizes = [8, 32], strides = [1, 1]} : vector<8x96xf32> to vector<8x32xf32>
    %645 = vector.extract_strided_slice %626 {offsets = [0, 64], sizes = [8, 32], strides = [1, 1]} : vector<8x96xf32> to vector<8x32xf32>
    %646 = arith.mulf %635, %645 : vector<8x32xf32>
    %647 = arith.addf %644, %646 : vector<8x32xf32>
    %648 = math.tanh %647 : vector<8x32xf32>
    %cst_168 = arith.constant 1.000000e+00 : f32
    %649 = vector.broadcast %cst_168 : f32 to vector<8x32xf32>
    %650 = arith.subf %649, %643 : vector<8x32xf32>
    %651 = arith.mulf %650, %648 : vector<8x32xf32>
    %652 = arith.mulf %643, %591 : vector<8x32xf32>
    %653 = arith.addf %651, %652 : vector<8x32xf32>
    %cst_169 = arith.constant dense<0.000000e+00> : vector<8x96xf32>
    %654 = tpu.matmul %621, %555, %cst_169 {dimension_numbers = #tpu.dot_dimension_numbers<[1], [0], [0], [1], [0, 0, 1, 1], [], []>} : vector<8x32xf32>, vector<32x96xf32>, vector<8x96xf32> -> vector<8x96xf32>
    %655 = vector.broadcast %559 : vector<1x96xf32> to vector<8x96xf32>
    %656 = arith.addf %654, %655 : vector<8x96xf32>
    %657 = vector.extract_strided_slice %551 {offsets = [48, 0], sizes = [8, 96], strides = [1, 1]} : vector<64x96xf32> to vector<8x96xf32>
    %658 = vector.extract_strided_slice %657 {offsets = [0, 0], sizes = [8, 32], strides = [1, 1]} : vector<8x96xf32> to vector<8x32xf32>
    %659 = vector.extract_strided_slice %656 {offsets = [0, 0], sizes = [8, 32], strides = [1, 1]} : vector<8x96xf32> to vector<8x32xf32>
    %660 = arith.addf %658, %659 : vector<8x32xf32>
    %661 = arith.negf %660 : vector<8x32xf32>
    %662 = math.exp %661 : vector<8x32xf32>
    %cst_170 = arith.constant 1.000000e+00 : f32
    %663 = vector.broadcast %cst_170 : f32 to vector<8x32xf32>
    %664 = arith.addf %663, %662 : vector<8x32xf32>
    %665 = arith.divf %663, %664 : vector<8x32xf32>
    %666 = vector.extract_strided_slice %657 {offsets = [0, 32], sizes = [8, 32], strides = [1, 1]} : vector<8x96xf32> to vector<8x32xf32>
    %667 = vector.extract_strided_slice %656 {offsets = [0, 32], sizes = [8, 32], strides = [1, 1]} : vector<8x96xf32> to vector<8x32xf32>
    %668 = arith.addf %666, %667 : vector<8x32xf32>
    %669 = arith.negf %668 : vector<8x32xf32>
    %670 = math.exp %669 : vector<8x32xf32>
    %cst_171 = arith.constant 1.000000e+00 : f32
    %671 = vector.broadcast %cst_171 : f32 to vector<8x32xf32>
    %672 = arith.addf %671, %670 : vector<8x32xf32>
    %673 = arith.divf %671, %672 : vector<8x32xf32>
    %674 = vector.extract_strided_slice %657 {offsets = [0, 64], sizes = [8, 32], strides = [1, 1]} : vector<8x96xf32> to vector<8x32xf32>
    %675 = vector.extract_strided_slice %656 {offsets = [0, 64], sizes = [8, 32], strides = [1, 1]} : vector<8x96xf32> to vector<8x32xf32>
    %676 = arith.mulf %665, %675 : vector<8x32xf32>
    %677 = arith.addf %674, %676 : vector<8x32xf32>
    %678 = math.tanh %677 : vector<8x32xf32>
    %cst_172 = arith.constant 1.000000e+00 : f32
    %679 = vector.broadcast %cst_172 : f32 to vector<8x32xf32>
    %680 = arith.subf %679, %673 : vector<8x32xf32>
    %681 = arith.mulf %680, %678 : vector<8x32xf32>
    %682 = arith.mulf %673, %621 : vector<8x32xf32>
    %683 = arith.addf %681, %682 : vector<8x32xf32>
    %c8_173 = arith.constant 8 : index
    %c0_174 = arith.constant 0 : index
    %684 = vector.load %arg19[%c8_173, %c0_174] : memref<64x32xf32, #tpu.memory_space<vmem>>, vector<8x32xf32>
    tpu.vector_store %arg19[%c8_173, %c0_174], %653 {strides = array<i32>} : memref<64x32xf32, #tpu.memory_space<vmem>>, vector<8x32xf32>,
    %c48_175 = arith.constant 48 : index
    %c0_176 = arith.constant 0 : index
    %685 = vector.load %arg20[%c48_175, %c0_176] : memref<64x32xf32, #tpu.memory_space<vmem>>, vector<8x32xf32>
    tpu.vector_store %arg20[%c48_175, %c0_176], %683 {strides = array<i32>} : memref<64x32xf32, #tpu.memory_space<vmem>>, vector<8x32xf32>,
    %cst_177 = arith.constant dense<0.000000e+00> : vector<8x96xf32>
    %686 = tpu.matmul %653, %553, %cst_177 {dimension_numbers = #tpu.dot_dimension_numbers<[1], [0], [0], [1], [0, 0, 1, 1], [], []>} : vector<8x32xf32>, vector<32x96xf32>, vector<8x96xf32> -> vector<8x96xf32>
    %687 = vector.broadcast %557 : vector<1x96xf32> to vector<8x96xf32>
    %688 = arith.addf %686, %687 : vector<8x96xf32>
    %689 = vector.extract_strided_slice %544 {offsets = [16, 0], sizes = [8, 96], strides = [1, 1]} : vector<64x96xf32> to vector<8x96xf32>
    %690 = vector.extract_strided_slice %689 {offsets = [0, 0], sizes = [8, 32], strides = [1, 1]} : vector<8x96xf32> to vector<8x32xf32>
    %691 = vector.extract_strided_slice %688 {offsets = [0, 0], sizes = [8, 32], strides = [1, 1]} : vector<8x96xf32> to vector<8x32xf32>
    %692 = arith.addf %690, %691 : vector<8x32xf32>
    %693 = arith.negf %692 : vector<8x32xf32>
    %694 = math.exp %693 : vector<8x32xf32>
    %cst_178 = arith.constant 1.000000e+00 : f32
    %695 = vector.broadcast %cst_178 : f32 to vector<8x32xf32>
    %696 = arith.addf %695, %694 : vector<8x32xf32>
    %697 = arith.divf %695, %696 : vector<8x32xf32>
    %698 = vector.extract_strided_slice %689 {offsets = [0, 32], sizes = [8, 32], strides = [1, 1]} : vector<8x96xf32> to vector<8x32xf32>
    %699 = vector.extract_strided_slice %688 {offsets = [0, 32], sizes = [8, 32], strides = [1, 1]} : vector<8x96xf32> to vector<8x32xf32>
    %700 = arith.addf %698, %699 : vector<8x32xf32>
    %701 = arith.negf %700 : vector<8x32xf32>
    %702 = math.exp %701 : vector<8x32xf32>
    %cst_179 = arith.constant 1.000000e+00 : f32
    %703 = vector.broadcast %cst_179 : f32 to vector<8x32xf32>
    %704 = arith.addf %703, %702 : vector<8x32xf32>
    %705 = arith.divf %703, %704 : vector<8x32xf32>
    %706 = vector.extract_strided_slice %689 {offsets = [0, 64], sizes = [8, 32], strides = [1, 1]} : vector<8x96xf32> to vector<8x32xf32>
    %707 = vector.extract_strided_slice %688 {offsets = [0, 64], sizes = [8, 32], strides = [1, 1]} : vector<8x96xf32> to vector<8x32xf32>
    %708 = arith.mulf %697, %707 : vector<8x32xf32>
    %709 = arith.addf %706, %708 : vector<8x32xf32>
    %710 = math.tanh %709 : vector<8x32xf32>
    %cst_180 = arith.constant 1.000000e+00 : f32
    %711 = vector.broadcast %cst_180 : f32 to vector<8x32xf32>
    %712 = arith.subf %711, %705 : vector<8x32xf32>
    %713 = arith.mulf %712, %710 : vector<8x32xf32>
    %714 = arith.mulf %705, %653 : vector<8x32xf32>
    %715 = arith.addf %713, %714 : vector<8x32xf32>
    %cst_181 = arith.constant dense<0.000000e+00> : vector<8x96xf32>
    %716 = tpu.matmul %683, %555, %cst_181 {dimension_numbers = #tpu.dot_dimension_numbers<[1], [0], [0], [1], [0, 0, 1, 1], [], []>} : vector<8x32xf32>, vector<32x96xf32>, vector<8x96xf32> -> vector<8x96xf32>
    %717 = vector.broadcast %559 : vector<1x96xf32> to vector<8x96xf32>
    %718 = arith.addf %716, %717 : vector<8x96xf32>
    %719 = vector.extract_strided_slice %551 {offsets = [40, 0], sizes = [8, 96], strides = [1, 1]} : vector<64x96xf32> to vector<8x96xf32>
    %720 = vector.extract_strided_slice %719 {offsets = [0, 0], sizes = [8, 32], strides = [1, 1]} : vector<8x96xf32> to vector<8x32xf32>
    %721 = vector.extract_strided_slice %718 {offsets = [0, 0], sizes = [8, 32], strides = [1, 1]} : vector<8x96xf32> to vector<8x32xf32>
    %722 = arith.addf %720, %721 : vector<8x32xf32>
    %723 = arith.negf %722 : vector<8x32xf32>
    %724 = math.exp %723 : vector<8x32xf32>
    %cst_182 = arith.constant 1.000000e+00 : f32
    %725 = vector.broadcast %cst_182 : f32 to vector<8x32xf32>
    %726 = arith.addf %725, %724 : vector<8x32xf32>
    %727 = arith.divf %725, %726 : vector<8x32xf32>
    %728 = vector.extract_strided_slice %719 {offsets = [0, 32], sizes = [8, 32], strides = [1, 1]} : vector<8x96xf32> to vector<8x32xf32>
    %729 = vector.extract_strided_slice %718 {offsets = [0, 32], sizes = [8, 32], strides = [1, 1]} : vector<8x96xf32> to vector<8x32xf32>
    %730 = arith.addf %728, %729 : vector<8x32xf32>
    %731 = arith.negf %730 : vector<8x32xf32>
    %732 = math.exp %731 : vector<8x32xf32>
    %cst_183 = arith.constant 1.000000e+00 : f32
    %733 = vector.broadcast %cst_183 : f32 to vector<8x32xf32>
    %734 = arith.addf %733, %732 : vector<8x32xf32>
    %735 = arith.divf %733, %734 : vector<8x32xf32>
    %736 = vector.extract_strided_slice %719 {offsets = [0, 64], sizes = [8, 32], strides = [1, 1]} : vector<8x96xf32> to vector<8x32xf32>
    %737 = vector.extract_strided_slice %718 {offsets = [0, 64], sizes = [8, 32], strides = [1, 1]} : vector<8x96xf32> to vector<8x32xf32>
    %738 = arith.mulf %727, %737 : vector<8x32xf32>
    %739 = arith.addf %736, %738 : vector<8x32xf32>
    %740 = math.tanh %739 : vector<8x32xf32>
    %cst_184 = arith.constant 1.000000e+00 : f32
    %741 = vector.broadcast %cst_184 : f32 to vector<8x32xf32>
    %742 = arith.subf %741, %735 : vector<8x32xf32>
    %743 = arith.mulf %742, %740 : vector<8x32xf32>
    %744 = arith.mulf %735, %683 : vector<8x32xf32>
    %745 = arith.addf %743, %744 : vector<8x32xf32>
    %c16_185 = arith.constant 16 : index
    %c0_186 = arith.constant 0 : index
    %746 = vector.load %arg19[%c16_185, %c0_186] : memref<64x32xf32, #tpu.memory_space<vmem>>, vector<8x32xf32>
    tpu.vector_store %arg19[%c16_185, %c0_186], %715 {strides = array<i32>} : memref<64x32xf32, #tpu.memory_space<vmem>>, vector<8x32xf32>,
    %c40_187 = arith.constant 40 : index
    %c0_188 = arith.constant 0 : index
    %747 = vector.load %arg20[%c40_187, %c0_188] : memref<64x32xf32, #tpu.memory_space<vmem>>, vector<8x32xf32>
    tpu.vector_store %arg20[%c40_187, %c0_188], %745 {strides = array<i32>} : memref<64x32xf32, #tpu.memory_space<vmem>>, vector<8x32xf32>,
    %cst_189 = arith.constant dense<0.000000e+00> : vector<8x96xf32>
    %748 = tpu.matmul %715, %553, %cst_189 {dimension_numbers = #tpu.dot_dimension_numbers<[1], [0], [0], [1], [0, 0, 1, 1], [], []>} : vector<8x32xf32>, vector<32x96xf32>, vector<8x96xf32> -> vector<8x96xf32>
    %749 = vector.broadcast %557 : vector<1x96xf32> to vector<8x96xf32>
    %750 = arith.addf %748, %749 : vector<8x96xf32>
    %751 = vector.extract_strided_slice %544 {offsets = [24, 0], sizes = [8, 96], strides = [1, 1]} : vector<64x96xf32> to vector<8x96xf32>
    %752 = vector.extract_strided_slice %751 {offsets = [0, 0], sizes = [8, 32], strides = [1, 1]} : vector<8x96xf32> to vector<8x32xf32>
    %753 = vector.extract_strided_slice %750 {offsets = [0, 0], sizes = [8, 32], strides = [1, 1]} : vector<8x96xf32> to vector<8x32xf32>
    %754 = arith.addf %752, %753 : vector<8x32xf32>
    %755 = arith.negf %754 : vector<8x32xf32>
    %756 = math.exp %755 : vector<8x32xf32>
    %cst_190 = arith.constant 1.000000e+00 : f32
    %757 = vector.broadcast %cst_190 : f32 to vector<8x32xf32>
    %758 = arith.addf %757, %756 : vector<8x32xf32>
    %759 = arith.divf %757, %758 : vector<8x32xf32>
    %760 = vector.extract_strided_slice %751 {offsets = [0, 32], sizes = [8, 32], strides = [1, 1]} : vector<8x96xf32> to vector<8x32xf32>
    %761 = vector.extract_strided_slice %750 {offsets = [0, 32], sizes = [8, 32], strides = [1, 1]} : vector<8x96xf32> to vector<8x32xf32>
    %762 = arith.addf %760, %761 : vector<8x32xf32>
    %763 = arith.negf %762 : vector<8x32xf32>
    %764 = math.exp %763 : vector<8x32xf32>
    %cst_191 = arith.constant 1.000000e+00 : f32
    %765 = vector.broadcast %cst_191 : f32 to vector<8x32xf32>
    %766 = arith.addf %765, %764 : vector<8x32xf32>
    %767 = arith.divf %765, %766 : vector<8x32xf32>
    %768 = vector.extract_strided_slice %751 {offsets = [0, 64], sizes = [8, 32], strides = [1, 1]} : vector<8x96xf32> to vector<8x32xf32>
    %769 = vector.extract_strided_slice %750 {offsets = [0, 64], sizes = [8, 32], strides = [1, 1]} : vector<8x96xf32> to vector<8x32xf32>
    %770 = arith.mulf %759, %769 : vector<8x32xf32>
    %771 = arith.addf %768, %770 : vector<8x32xf32>
    %772 = math.tanh %771 : vector<8x32xf32>
    %cst_192 = arith.constant 1.000000e+00 : f32
    %773 = vector.broadcast %cst_192 : f32 to vector<8x32xf32>
    %774 = arith.subf %773, %767 : vector<8x32xf32>
    %775 = arith.mulf %774, %772 : vector<8x32xf32>
    %776 = arith.mulf %767, %715 : vector<8x32xf32>
    %777 = arith.addf %775, %776 : vector<8x32xf32>
    %cst_193 = arith.constant dense<0.000000e+00> : vector<8x96xf32>
    %778 = tpu.matmul %745, %555, %cst_193 {dimension_numbers = #tpu.dot_dimension_numbers<[1], [0], [0], [1], [0, 0, 1, 1], [], []>} : vector<8x32xf32>, vector<32x96xf32>, vector<8x96xf32> -> vector<8x96xf32>
    %779 = vector.broadcast %559 : vector<1x96xf32> to vector<8x96xf32>
    %780 = arith.addf %778, %779 : vector<8x96xf32>
    %781 = vector.extract_strided_slice %551 {offsets = [32, 0], sizes = [8, 96], strides = [1, 1]} : vector<64x96xf32> to vector<8x96xf32>
    %782 = vector.extract_strided_slice %781 {offsets = [0, 0], sizes = [8, 32], strides = [1, 1]} : vector<8x96xf32> to vector<8x32xf32>
    %783 = vector.extract_strided_slice %780 {offsets = [0, 0], sizes = [8, 32], strides = [1, 1]} : vector<8x96xf32> to vector<8x32xf32>
    %784 = arith.addf %782, %783 : vector<8x32xf32>
    %785 = arith.negf %784 : vector<8x32xf32>
    %786 = math.exp %785 : vector<8x32xf32>
    %cst_194 = arith.constant 1.000000e+00 : f32
    %787 = vector.broadcast %cst_194 : f32 to vector<8x32xf32>
    %788 = arith.addf %787, %786 : vector<8x32xf32>
    %789 = arith.divf %787, %788 : vector<8x32xf32>
    %790 = vector.extract_strided_slice %781 {offsets = [0, 32], sizes = [8, 32], strides = [1, 1]} : vector<8x96xf32> to vector<8x32xf32>
    %791 = vector.extract_strided_slice %780 {offsets = [0, 32], sizes = [8, 32], strides = [1, 1]} : vector<8x96xf32> to vector<8x32xf32>
    %792 = arith.addf %790, %791 : vector<8x32xf32>
    %793 = arith.negf %792 : vector<8x32xf32>
    %794 = math.exp %793 : vector<8x32xf32>
    %cst_195 = arith.constant 1.000000e+00 : f32
    %795 = vector.broadcast %cst_195 : f32 to vector<8x32xf32>
    %796 = arith.addf %795, %794 : vector<8x32xf32>
    %797 = arith.divf %795, %796 : vector<8x32xf32>
    %798 = vector.extract_strided_slice %781 {offsets = [0, 64], sizes = [8, 32], strides = [1, 1]} : vector<8x96xf32> to vector<8x32xf32>
    %799 = vector.extract_strided_slice %780 {offsets = [0, 64], sizes = [8, 32], strides = [1, 1]} : vector<8x96xf32> to vector<8x32xf32>
    %800 = arith.mulf %789, %799 : vector<8x32xf32>
    %801 = arith.addf %798, %800 : vector<8x32xf32>
    %802 = math.tanh %801 : vector<8x32xf32>
    %cst_196 = arith.constant 1.000000e+00 : f32
    %803 = vector.broadcast %cst_196 : f32 to vector<8x32xf32>
    %804 = arith.subf %803, %797 : vector<8x32xf32>
    %805 = arith.mulf %804, %802 : vector<8x32xf32>
    %806 = arith.mulf %797, %745 : vector<8x32xf32>
    %807 = arith.addf %805, %806 : vector<8x32xf32>
    %c24_197 = arith.constant 24 : index
    %c0_198 = arith.constant 0 : index
    %808 = vector.load %arg19[%c24_197, %c0_198] : memref<64x32xf32, #tpu.memory_space<vmem>>, vector<8x32xf32>
    tpu.vector_store %arg19[%c24_197, %c0_198], %777 {strides = array<i32>} : memref<64x32xf32, #tpu.memory_space<vmem>>, vector<8x32xf32>,
    %c32_199 = arith.constant 32 : index
    %c0_200 = arith.constant 0 : index
    %809 = vector.load %arg20[%c32_199, %c0_200] : memref<64x32xf32, #tpu.memory_space<vmem>>, vector<8x32xf32>
    tpu.vector_store %arg20[%c32_199, %c0_200], %807 {strides = array<i32>} : memref<64x32xf32, #tpu.memory_space<vmem>>, vector<8x32xf32>,
    %cst_201 = arith.constant dense<0.000000e+00> : vector<8x96xf32>
    %810 = tpu.matmul %777, %553, %cst_201 {dimension_numbers = #tpu.dot_dimension_numbers<[1], [0], [0], [1], [0, 0, 1, 1], [], []>} : vector<8x32xf32>, vector<32x96xf32>, vector<8x96xf32> -> vector<8x96xf32>
    %811 = vector.broadcast %557 : vector<1x96xf32> to vector<8x96xf32>
    %812 = arith.addf %810, %811 : vector<8x96xf32>
    %813 = vector.extract_strided_slice %544 {offsets = [32, 0], sizes = [8, 96], strides = [1, 1]} : vector<64x96xf32> to vector<8x96xf32>
    %814 = vector.extract_strided_slice %813 {offsets = [0, 0], sizes = [8, 32], strides = [1, 1]} : vector<8x96xf32> to vector<8x32xf32>
    %815 = vector.extract_strided_slice %812 {offsets = [0, 0], sizes = [8, 32], strides = [1, 1]} : vector<8x96xf32> to vector<8x32xf32>
    %816 = arith.addf %814, %815 : vector<8x32xf32>
    %817 = arith.negf %816 : vector<8x32xf32>
    %818 = math.exp %817 : vector<8x32xf32>
    %cst_202 = arith.constant 1.000000e+00 : f32
    %819 = vector.broadcast %cst_202 : f32 to vector<8x32xf32>
    %820 = arith.addf %819, %818 : vector<8x32xf32>
    %821 = arith.divf %819, %820 : vector<8x32xf32>
    %822 = vector.extract_strided_slice %813 {offsets = [0, 32], sizes = [8, 32], strides = [1, 1]} : vector<8x96xf32> to vector<8x32xf32>
    %823 = vector.extract_strided_slice %812 {offsets = [0, 32], sizes = [8, 32], strides = [1, 1]} : vector<8x96xf32> to vector<8x32xf32>
    %824 = arith.addf %822, %823 : vector<8x32xf32>
    %825 = arith.negf %824 : vector<8x32xf32>
    %826 = math.exp %825 : vector<8x32xf32>
    %cst_203 = arith.constant 1.000000e+00 : f32
    %827 = vector.broadcast %cst_203 : f32 to vector<8x32xf32>
    %828 = arith.addf %827, %826 : vector<8x32xf32>
    %829 = arith.divf %827, %828 : vector<8x32xf32>
    %830 = vector.extract_strided_slice %813 {offsets = [0, 64], sizes = [8, 32], strides = [1, 1]} : vector<8x96xf32> to vector<8x32xf32>
    %831 = vector.extract_strided_slice %812 {offsets = [0, 64], sizes = [8, 32], strides = [1, 1]} : vector<8x96xf32> to vector<8x32xf32>
    %832 = arith.mulf %821, %831 : vector<8x32xf32>
    %833 = arith.addf %830, %832 : vector<8x32xf32>
    %834 = math.tanh %833 : vector<8x32xf32>
    %cst_204 = arith.constant 1.000000e+00 : f32
    %835 = vector.broadcast %cst_204 : f32 to vector<8x32xf32>
    %836 = arith.subf %835, %829 : vector<8x32xf32>
    %837 = arith.mulf %836, %834 : vector<8x32xf32>
    %838 = arith.mulf %829, %777 : vector<8x32xf32>
    %839 = arith.addf %837, %838 : vector<8x32xf32>
    %cst_205 = arith.constant dense<0.000000e+00> : vector<8x96xf32>
    %840 = tpu.matmul %807, %555, %cst_205 {dimension_numbers = #tpu.dot_dimension_numbers<[1], [0], [0], [1], [0, 0, 1, 1], [], []>} : vector<8x32xf32>, vector<32x96xf32>, vector<8x96xf32> -> vector<8x96xf32>
    %841 = vector.broadcast %559 : vector<1x96xf32> to vector<8x96xf32>
    %842 = arith.addf %840, %841 : vector<8x96xf32>
    %843 = vector.extract_strided_slice %551 {offsets = [24, 0], sizes = [8, 96], strides = [1, 1]} : vector<64x96xf32> to vector<8x96xf32>
    %844 = vector.extract_strided_slice %843 {offsets = [0, 0], sizes = [8, 32], strides = [1, 1]} : vector<8x96xf32> to vector<8x32xf32>
    %845 = vector.extract_strided_slice %842 {offsets = [0, 0], sizes = [8, 32], strides = [1, 1]} : vector<8x96xf32> to vector<8x32xf32>
    %846 = arith.addf %844, %845 : vector<8x32xf32>
    %847 = arith.negf %846 : vector<8x32xf32>
    %848 = math.exp %847 : vector<8x32xf32>
    %cst_206 = arith.constant 1.000000e+00 : f32
    %849 = vector.broadcast %cst_206 : f32 to vector<8x32xf32>
    %850 = arith.addf %849, %848 : vector<8x32xf32>
    %851 = arith.divf %849, %850 : vector<8x32xf32>
    %852 = vector.extract_strided_slice %843 {offsets = [0, 32], sizes = [8, 32], strides = [1, 1]} : vector<8x96xf32> to vector<8x32xf32>
    %853 = vector.extract_strided_slice %842 {offsets = [0, 32], sizes = [8, 32], strides = [1, 1]} : vector<8x96xf32> to vector<8x32xf32>
    %854 = arith.addf %852, %853 : vector<8x32xf32>
    %855 = arith.negf %854 : vector<8x32xf32>
    %856 = math.exp %855 : vector<8x32xf32>
    %cst_207 = arith.constant 1.000000e+00 : f32
    %857 = vector.broadcast %cst_207 : f32 to vector<8x32xf32>
    %858 = arith.addf %857, %856 : vector<8x32xf32>
    %859 = arith.divf %857, %858 : vector<8x32xf32>
    %860 = vector.extract_strided_slice %843 {offsets = [0, 64], sizes = [8, 32], strides = [1, 1]} : vector<8x96xf32> to vector<8x32xf32>
    %861 = vector.extract_strided_slice %842 {offsets = [0, 64], sizes = [8, 32], strides = [1, 1]} : vector<8x96xf32> to vector<8x32xf32>
    %862 = arith.mulf %851, %861 : vector<8x32xf32>
    %863 = arith.addf %860, %862 : vector<8x32xf32>
    %864 = math.tanh %863 : vector<8x32xf32>
    %cst_208 = arith.constant 1.000000e+00 : f32
    %865 = vector.broadcast %cst_208 : f32 to vector<8x32xf32>
    %866 = arith.subf %865, %859 : vector<8x32xf32>
    %867 = arith.mulf %866, %864 : vector<8x32xf32>
    %868 = arith.mulf %859, %807 : vector<8x32xf32>
    %869 = arith.addf %867, %868 : vector<8x32xf32>
    %c32_209 = arith.constant 32 : index
    %c0_210 = arith.constant 0 : index
    %870 = vector.load %arg19[%c32_209, %c0_210] : memref<64x32xf32, #tpu.memory_space<vmem>>, vector<8x32xf32>
    tpu.vector_store %arg19[%c32_209, %c0_210], %839 {strides = array<i32>} : memref<64x32xf32, #tpu.memory_space<vmem>>, vector<8x32xf32>,
    %c24_211 = arith.constant 24 : index
    %c0_212 = arith.constant 0 : index
    %871 = vector.load %arg20[%c24_211, %c0_212] : memref<64x32xf32, #tpu.memory_space<vmem>>, vector<8x32xf32>
    tpu.vector_store %arg20[%c24_211, %c0_212], %869 {strides = array<i32>} : memref<64x32xf32, #tpu.memory_space<vmem>>, vector<8x32xf32>,
    %cst_213 = arith.constant dense<0.000000e+00> : vector<8x96xf32>
    %872 = tpu.matmul %839, %553, %cst_213 {dimension_numbers = #tpu.dot_dimension_numbers<[1], [0], [0], [1], [0, 0, 1, 1], [], []>} : vector<8x32xf32>, vector<32x96xf32>, vector<8x96xf32> -> vector<8x96xf32>
    %873 = vector.broadcast %557 : vector<1x96xf32> to vector<8x96xf32>
    %874 = arith.addf %872, %873 : vector<8x96xf32>
    %875 = vector.extract_strided_slice %544 {offsets = [40, 0], sizes = [8, 96], strides = [1, 1]} : vector<64x96xf32> to vector<8x96xf32>
    %876 = vector.extract_strided_slice %875 {offsets = [0, 0], sizes = [8, 32], strides = [1, 1]} : vector<8x96xf32> to vector<8x32xf32>
    %877 = vector.extract_strided_slice %874 {offsets = [0, 0], sizes = [8, 32], strides = [1, 1]} : vector<8x96xf32> to vector<8x32xf32>
    %878 = arith.addf %876, %877 : vector<8x32xf32>
    %879 = arith.negf %878 : vector<8x32xf32>
    %880 = math.exp %879 : vector<8x32xf32>
    %cst_214 = arith.constant 1.000000e+00 : f32
    %881 = vector.broadcast %cst_214 : f32 to vector<8x32xf32>
    %882 = arith.addf %881, %880 : vector<8x32xf32>
    %883 = arith.divf %881, %882 : vector<8x32xf32>
    %884 = vector.extract_strided_slice %875 {offsets = [0, 32], sizes = [8, 32], strides = [1, 1]} : vector<8x96xf32> to vector<8x32xf32>
    %885 = vector.extract_strided_slice %874 {offsets = [0, 32], sizes = [8, 32], strides = [1, 1]} : vector<8x96xf32> to vector<8x32xf32>
    %886 = arith.addf %884, %885 : vector<8x32xf32>
    %887 = arith.negf %886 : vector<8x32xf32>
    %888 = math.exp %887 : vector<8x32xf32>
    %cst_215 = arith.constant 1.000000e+00 : f32
    %889 = vector.broadcast %cst_215 : f32 to vector<8x32xf32>
    %890 = arith.addf %889, %888 : vector<8x32xf32>
    %891 = arith.divf %889, %890 : vector<8x32xf32>
    %892 = vector.extract_strided_slice %875 {offsets = [0, 64], sizes = [8, 32], strides = [1, 1]} : vector<8x96xf32> to vector<8x32xf32>
    %893 = vector.extract_strided_slice %874 {offsets = [0, 64], sizes = [8, 32], strides = [1, 1]} : vector<8x96xf32> to vector<8x32xf32>
    %894 = arith.mulf %883, %893 : vector<8x32xf32>
    %895 = arith.addf %892, %894 : vector<8x32xf32>
    %896 = math.tanh %895 : vector<8x32xf32>
    %cst_216 = arith.constant 1.000000e+00 : f32
    %897 = vector.broadcast %cst_216 : f32 to vector<8x32xf32>
    %898 = arith.subf %897, %891 : vector<8x32xf32>
    %899 = arith.mulf %898, %896 : vector<8x32xf32>
    %900 = arith.mulf %891, %839 : vector<8x32xf32>
    %901 = arith.addf %899, %900 : vector<8x32xf32>
    %cst_217 = arith.constant dense<0.000000e+00> : vector<8x96xf32>
    %902 = tpu.matmul %869, %555, %cst_217 {dimension_numbers = #tpu.dot_dimension_numbers<[1], [0], [0], [1], [0, 0, 1, 1], [], []>} : vector<8x32xf32>, vector<32x96xf32>, vector<8x96xf32> -> vector<8x96xf32>
    %903 = vector.broadcast %559 : vector<1x96xf32> to vector<8x96xf32>
    %904 = arith.addf %902, %903 : vector<8x96xf32>
    %905 = vector.extract_strided_slice %551 {offsets = [16, 0], sizes = [8, 96], strides = [1, 1]} : vector<64x96xf32> to vector<8x96xf32>
    %906 = vector.extract_strided_slice %905 {offsets = [0, 0], sizes = [8, 32], strides = [1, 1]} : vector<8x96xf32> to vector<8x32xf32>
    %907 = vector.extract_strided_slice %904 {offsets = [0, 0], sizes = [8, 32], strides = [1, 1]} : vector<8x96xf32> to vector<8x32xf32>
    %908 = arith.addf %906, %907 : vector<8x32xf32>
    %909 = arith.negf %908 : vector<8x32xf32>
    %910 = math.exp %909 : vector<8x32xf32>
    %cst_218 = arith.constant 1.000000e+00 : f32
    %911 = vector.broadcast %cst_218 : f32 to vector<8x32xf32>
    %912 = arith.addf %911, %910 : vector<8x32xf32>
    %913 = arith.divf %911, %912 : vector<8x32xf32>
    %914 = vector.extract_strided_slice %905 {offsets = [0, 32], sizes = [8, 32], strides = [1, 1]} : vector<8x96xf32> to vector<8x32xf32>
    %915 = vector.extract_strided_slice %904 {offsets = [0, 32], sizes = [8, 32], strides = [1, 1]} : vector<8x96xf32> to vector<8x32xf32>
    %916 = arith.addf %914, %915 : vector<8x32xf32>
    %917 = arith.negf %916 : vector<8x32xf32>
    %918 = math.exp %917 : vector<8x32xf32>
    %cst_219 = arith.constant 1.000000e+00 : f32
    %919 = vector.broadcast %cst_219 : f32 to vector<8x32xf32>
    %920 = arith.addf %919, %918 : vector<8x32xf32>
    %921 = arith.divf %919, %920 : vector<8x32xf32>
    %922 = vector.extract_strided_slice %905 {offsets = [0, 64], sizes = [8, 32], strides = [1, 1]} : vector<8x96xf32> to vector<8x32xf32>
    %923 = vector.extract_strided_slice %904 {offsets = [0, 64], sizes = [8, 32], strides = [1, 1]} : vector<8x96xf32> to vector<8x32xf32>
    %924 = arith.mulf %913, %923 : vector<8x32xf32>
    %925 = arith.addf %922, %924 : vector<8x32xf32>
    %926 = math.tanh %925 : vector<8x32xf32>
    %cst_220 = arith.constant 1.000000e+00 : f32
    %927 = vector.broadcast %cst_220 : f32 to vector<8x32xf32>
    %928 = arith.subf %927, %921 : vector<8x32xf32>
    %929 = arith.mulf %928, %926 : vector<8x32xf32>
    %930 = arith.mulf %921, %869 : vector<8x32xf32>
    %931 = arith.addf %929, %930 : vector<8x32xf32>
    %c40_221 = arith.constant 40 : index
    %c0_222 = arith.constant 0 : index
    %932 = vector.load %arg19[%c40_221, %c0_222] : memref<64x32xf32, #tpu.memory_space<vmem>>, vector<8x32xf32>
    tpu.vector_store %arg19[%c40_221, %c0_222], %901 {strides = array<i32>} : memref<64x32xf32, #tpu.memory_space<vmem>>, vector<8x32xf32>,
    %c16_223 = arith.constant 16 : index
    %c0_224 = arith.constant 0 : index
    %933 = vector.load %arg20[%c16_223, %c0_224] : memref<64x32xf32, #tpu.memory_space<vmem>>, vector<8x32xf32>
    tpu.vector_store %arg20[%c16_223, %c0_224], %931 {strides = array<i32>} : memref<64x32xf32, #tpu.memory_space<vmem>>, vector<8x32xf32>,
    %cst_225 = arith.constant dense<0.000000e+00> : vector<8x96xf32>
    %934 = tpu.matmul %901, %553, %cst_225 {dimension_numbers = #tpu.dot_dimension_numbers<[1], [0], [0], [1], [0, 0, 1, 1], [], []>} : vector<8x32xf32>, vector<32x96xf32>, vector<8x96xf32> -> vector<8x96xf32>
    %935 = vector.broadcast %557 : vector<1x96xf32> to vector<8x96xf32>
    %936 = arith.addf %934, %935 : vector<8x96xf32>
    %937 = vector.extract_strided_slice %544 {offsets = [48, 0], sizes = [8, 96], strides = [1, 1]} : vector<64x96xf32> to vector<8x96xf32>
    %938 = vector.extract_strided_slice %937 {offsets = [0, 0], sizes = [8, 32], strides = [1, 1]} : vector<8x96xf32> to vector<8x32xf32>
    %939 = vector.extract_strided_slice %936 {offsets = [0, 0], sizes = [8, 32], strides = [1, 1]} : vector<8x96xf32> to vector<8x32xf32>
    %940 = arith.addf %938, %939 : vector<8x32xf32>
    %941 = arith.negf %940 : vector<8x32xf32>
    %942 = math.exp %941 : vector<8x32xf32>
    %cst_226 = arith.constant 1.000000e+00 : f32
    %943 = vector.broadcast %cst_226 : f32 to vector<8x32xf32>
    %944 = arith.addf %943, %942 : vector<8x32xf32>
    %945 = arith.divf %943, %944 : vector<8x32xf32>
    %946 = vector.extract_strided_slice %937 {offsets = [0, 32], sizes = [8, 32], strides = [1, 1]} : vector<8x96xf32> to vector<8x32xf32>
    %947 = vector.extract_strided_slice %936 {offsets = [0, 32], sizes = [8, 32], strides = [1, 1]} : vector<8x96xf32> to vector<8x32xf32>
    %948 = arith.addf %946, %947 : vector<8x32xf32>
    %949 = arith.negf %948 : vector<8x32xf32>
    %950 = math.exp %949 : vector<8x32xf32>
    %cst_227 = arith.constant 1.000000e+00 : f32
    %951 = vector.broadcast %cst_227 : f32 to vector<8x32xf32>
    %952 = arith.addf %951, %950 : vector<8x32xf32>
    %953 = arith.divf %951, %952 : vector<8x32xf32>
    %954 = vector.extract_strided_slice %937 {offsets = [0, 64], sizes = [8, 32], strides = [1, 1]} : vector<8x96xf32> to vector<8x32xf32>
    %955 = vector.extract_strided_slice %936 {offsets = [0, 64], sizes = [8, 32], strides = [1, 1]} : vector<8x96xf32> to vector<8x32xf32>
    %956 = arith.mulf %945, %955 : vector<8x32xf32>
    %957 = arith.addf %954, %956 : vector<8x32xf32>
    %958 = math.tanh %957 : vector<8x32xf32>
    %cst_228 = arith.constant 1.000000e+00 : f32
    %959 = vector.broadcast %cst_228 : f32 to vector<8x32xf32>
    %960 = arith.subf %959, %953 : vector<8x32xf32>
    %961 = arith.mulf %960, %958 : vector<8x32xf32>
    %962 = arith.mulf %953, %901 : vector<8x32xf32>
    %963 = arith.addf %961, %962 : vector<8x32xf32>
    %cst_229 = arith.constant dense<0.000000e+00> : vector<8x96xf32>
    %964 = tpu.matmul %931, %555, %cst_229 {dimension_numbers = #tpu.dot_dimension_numbers<[1], [0], [0], [1], [0, 0, 1, 1], [], []>} : vector<8x32xf32>, vector<32x96xf32>, vector<8x96xf32> -> vector<8x96xf32>
    %965 = vector.broadcast %559 : vector<1x96xf32> to vector<8x96xf32>
    %966 = arith.addf %964, %965 : vector<8x96xf32>
    %967 = vector.extract_strided_slice %551 {offsets = [8, 0], sizes = [8, 96], strides = [1, 1]} : vector<64x96xf32> to vector<8x96xf32>
    %968 = vector.extract_strided_slice %967 {offsets = [0, 0], sizes = [8, 32], strides = [1, 1]} : vector<8x96xf32> to vector<8x32xf32>
    %969 = vector.extract_strided_slice %966 {offsets = [0, 0], sizes = [8, 32], strides = [1, 1]} : vector<8x96xf32> to vector<8x32xf32>
    %970 = arith.addf %968, %969 : vector<8x32xf32>
    %971 = arith.negf %970 : vector<8x32xf32>
    %972 = math.exp %971 : vector<8x32xf32>
    %cst_230 = arith.constant 1.000000e+00 : f32
    %973 = vector.broadcast %cst_230 : f32 to vector<8x32xf32>
    %974 = arith.addf %973, %972 : vector<8x32xf32>
    %975 = arith.divf %973, %974 : vector<8x32xf32>
    %976 = vector.extract_strided_slice %967 {offsets = [0, 32], sizes = [8, 32], strides = [1, 1]} : vector<8x96xf32> to vector<8x32xf32>
    %977 = vector.extract_strided_slice %966 {offsets = [0, 32], sizes = [8, 32], strides = [1, 1]} : vector<8x96xf32> to vector<8x32xf32>
    %978 = arith.addf %976, %977 : vector<8x32xf32>
    %979 = arith.negf %978 : vector<8x32xf32>
    %980 = math.exp %979 : vector<8x32xf32>
    %cst_231 = arith.constant 1.000000e+00 : f32
    %981 = vector.broadcast %cst_231 : f32 to vector<8x32xf32>
    %982 = arith.addf %981, %980 : vector<8x32xf32>
    %983 = arith.divf %981, %982 : vector<8x32xf32>
    %984 = vector.extract_strided_slice %967 {offsets = [0, 64], sizes = [8, 32], strides = [1, 1]} : vector<8x96xf32> to vector<8x32xf32>
    %985 = vector.extract_strided_slice %966 {offsets = [0, 64], sizes = [8, 32], strides = [1, 1]} : vector<8x96xf32> to vector<8x32xf32>
    %986 = arith.mulf %975, %985 : vector<8x32xf32>
    %987 = arith.addf %984, %986 : vector<8x32xf32>
    %988 = math.tanh %987 : vector<8x32xf32>
    %cst_232 = arith.constant 1.000000e+00 : f32
    %989 = vector.broadcast %cst_232 : f32 to vector<8x32xf32>
    %990 = arith.subf %989, %983 : vector<8x32xf32>
    %991 = arith.mulf %990, %988 : vector<8x32xf32>
    %992 = arith.mulf %983, %931 : vector<8x32xf32>
    %993 = arith.addf %991, %992 : vector<8x32xf32>
    %c48_233 = arith.constant 48 : index
    %c0_234 = arith.constant 0 : index
    %994 = vector.load %arg19[%c48_233, %c0_234] : memref<64x32xf32, #tpu.memory_space<vmem>>, vector<8x32xf32>
    tpu.vector_store %arg19[%c48_233, %c0_234], %963 {strides = array<i32>} : memref<64x32xf32, #tpu.memory_space<vmem>>, vector<8x32xf32>,
    %c8_235 = arith.constant 8 : index
    %c0_236 = arith.constant 0 : index
    %995 = vector.load %arg20[%c8_235, %c0_236] : memref<64x32xf32, #tpu.memory_space<vmem>>, vector<8x32xf32>
    tpu.vector_store %arg20[%c8_235, %c0_236], %993 {strides = array<i32>} : memref<64x32xf32, #tpu.memory_space<vmem>>, vector<8x32xf32>,
    %cst_237 = arith.constant dense<0.000000e+00> : vector<8x96xf32>
    %996 = tpu.matmul %963, %553, %cst_237 {dimension_numbers = #tpu.dot_dimension_numbers<[1], [0], [0], [1], [0, 0, 1, 1], [], []>} : vector<8x32xf32>, vector<32x96xf32>, vector<8x96xf32> -> vector<8x96xf32>
    %997 = vector.broadcast %557 : vector<1x96xf32> to vector<8x96xf32>
    %998 = arith.addf %996, %997 : vector<8x96xf32>
    %999 = vector.extract_strided_slice %544 {offsets = [56, 0], sizes = [8, 96], strides = [1, 1]} : vector<64x96xf32> to vector<8x96xf32>
    %1000 = vector.extract_strided_slice %999 {offsets = [0, 0], sizes = [8, 32], strides = [1, 1]} : vector<8x96xf32> to vector<8x32xf32>
    %1001 = vector.extract_strided_slice %998 {offsets = [0, 0], sizes = [8, 32], strides = [1, 1]} : vector<8x96xf32> to vector<8x32xf32>
    %1002 = arith.addf %1000, %1001 : vector<8x32xf32>
    %1003 = arith.negf %1002 : vector<8x32xf32>
    %1004 = math.exp %1003 : vector<8x32xf32>
    %cst_238 = arith.constant 1.000000e+00 : f32
    %1005 = vector.broadcast %cst_238 : f32 to vector<8x32xf32>
    %1006 = arith.addf %1005, %1004 : vector<8x32xf32>
    %1007 = arith.divf %1005, %1006 : vector<8x32xf32>
    %1008 = vector.extract_strided_slice %999 {offsets = [0, 32], sizes = [8, 32], strides = [1, 1]} : vector<8x96xf32> to vector<8x32xf32>
    %1009 = vector.extract_strided_slice %998 {offsets = [0, 32], sizes = [8, 32], strides = [1, 1]} : vector<8x96xf32> to vector<8x32xf32>
    %1010 = arith.addf %1008, %1009 : vector<8x32xf32>
    %1011 = arith.negf %1010 : vector<8x32xf32>
    %1012 = math.exp %1011 : vector<8x32xf32>
    %cst_239 = arith.constant 1.000000e+00 : f32
    %1013 = vector.broadcast %cst_239 : f32 to vector<8x32xf32>
    %1014 = arith.addf %1013, %1012 : vector<8x32xf32>
    %1015 = arith.divf %1013, %1014 : vector<8x32xf32>
    %1016 = vector.extract_strided_slice %999 {offsets = [0, 64], sizes = [8, 32], strides = [1, 1]} : vector<8x96xf32> to vector<8x32xf32>
    %1017 = vector.extract_strided_slice %998 {offsets = [0, 64], sizes = [8, 32], strides = [1, 1]} : vector<8x96xf32> to vector<8x32xf32>
    %1018 = arith.mulf %1007, %1017 : vector<8x32xf32>
    %1019 = arith.addf %1016, %1018 : vector<8x32xf32>
    %1020 = math.tanh %1019 : vector<8x32xf32>
    %cst_240 = arith.constant 1.000000e+00 : f32
    %1021 = vector.broadcast %cst_240 : f32 to vector<8x32xf32>
    %1022 = arith.subf %1021, %1015 : vector<8x32xf32>
    %1023 = arith.mulf %1022, %1020 : vector<8x32xf32>
    %1024 = arith.mulf %1015, %963 : vector<8x32xf32>
    %1025 = arith.addf %1023, %1024 : vector<8x32xf32>
    %cst_241 = arith.constant dense<0.000000e+00> : vector<8x96xf32>
    %1026 = tpu.matmul %993, %555, %cst_241 {dimension_numbers = #tpu.dot_dimension_numbers<[1], [0], [0], [1], [0, 0, 1, 1], [], []>} : vector<8x32xf32>, vector<32x96xf32>, vector<8x96xf32> -> vector<8x96xf32>
    %1027 = vector.broadcast %559 : vector<1x96xf32> to vector<8x96xf32>
    %1028 = arith.addf %1026, %1027 : vector<8x96xf32>
    %1029 = vector.extract_strided_slice %551 {offsets = [0, 0], sizes = [8, 96], strides = [1, 1]} : vector<64x96xf32> to vector<8x96xf32>
    %1030 = vector.extract_strided_slice %1029 {offsets = [0, 0], sizes = [8, 32], strides = [1, 1]} : vector<8x96xf32> to vector<8x32xf32>
    %1031 = vector.extract_strided_slice %1028 {offsets = [0, 0], sizes = [8, 32], strides = [1, 1]} : vector<8x96xf32> to vector<8x32xf32>
    %1032 = arith.addf %1030, %1031 : vector<8x32xf32>
    %1033 = arith.negf %1032 : vector<8x32xf32>
    %1034 = math.exp %1033 : vector<8x32xf32>
    %cst_242 = arith.constant 1.000000e+00 : f32
    %1035 = vector.broadcast %cst_242 : f32 to vector<8x32xf32>
    %1036 = arith.addf %1035, %1034 : vector<8x32xf32>
    %1037 = arith.divf %1035, %1036 : vector<8x32xf32>
    %1038 = vector.extract_strided_slice %1029 {offsets = [0, 32], sizes = [8, 32], strides = [1, 1]} : vector<8x96xf32> to vector<8x32xf32>
    %1039 = vector.extract_strided_slice %1028 {offsets = [0, 32], sizes = [8, 32], strides = [1, 1]} : vector<8x96xf32> to vector<8x32xf32>
    %1040 = arith.addf %1038, %1039 : vector<8x32xf32>
    %1041 = arith.negf %1040 : vector<8x32xf32>
    %1042 = math.exp %1041 : vector<8x32xf32>
    %cst_243 = arith.constant 1.000000e+00 : f32
    %1043 = vector.broadcast %cst_243 : f32 to vector<8x32xf32>
    %1044 = arith.addf %1043, %1042 : vector<8x32xf32>
    %1045 = arith.divf %1043, %1044 : vector<8x32xf32>
    %1046 = vector.extract_strided_slice %1029 {offsets = [0, 64], sizes = [8, 32], strides = [1, 1]} : vector<8x96xf32> to vector<8x32xf32>
    %1047 = vector.extract_strided_slice %1028 {offsets = [0, 64], sizes = [8, 32], strides = [1, 1]} : vector<8x96xf32> to vector<8x32xf32>
    %1048 = arith.mulf %1037, %1047 : vector<8x32xf32>
    %1049 = arith.addf %1046, %1048 : vector<8x32xf32>
    %1050 = math.tanh %1049 : vector<8x32xf32>
    %cst_244 = arith.constant 1.000000e+00 : f32
    %1051 = vector.broadcast %cst_244 : f32 to vector<8x32xf32>
    %1052 = arith.subf %1051, %1045 : vector<8x32xf32>
    %1053 = arith.mulf %1052, %1050 : vector<8x32xf32>
    %1054 = arith.mulf %1045, %993 : vector<8x32xf32>
    %1055 = arith.addf %1053, %1054 : vector<8x32xf32>
    %c56_245 = arith.constant 56 : index
    %c0_246 = arith.constant 0 : index
    %1056 = vector.load %arg19[%c56_245, %c0_246] : memref<64x32xf32, #tpu.memory_space<vmem>>, vector<8x32xf32>
    tpu.vector_store %arg19[%c56_245, %c0_246], %1025 {strides = array<i32>} : memref<64x32xf32, #tpu.memory_space<vmem>>, vector<8x32xf32>,
    %c0_247 = arith.constant 0 : index
    %c0_248 = arith.constant 0 : index
    %1057 = vector.load %arg20[%c0_247, %c0_248] : memref<64x32xf32, #tpu.memory_space<vmem>>, vector<8x32xf32>
    tpu.vector_store %arg20[%c0_247, %c0_248], %1055 {strides = array<i32>} : memref<64x32xf32, #tpu.memory_space<vmem>>, vector<8x32xf32>,
    %c0_249 = arith.constant 0 : index
    %c0_250 = arith.constant 0 : index
    %c0_251 = arith.constant 0 : index
    %1058 = vector.load %arg11[%c0_249, %c0_250, %c0_251] : memref<2x1x96xf32, #tpu.memory_space<vmem>>, vector<1x1x96xf32>
    %1059 = vector.shape_cast %1058 : vector<1x1x96xf32> to vector<1x96xf32>
    %c1_252 = arith.constant 1 : index
    %c0_253 = arith.constant 0 : index
    %c0_254 = arith.constant 0 : index
    %1060 = vector.load %arg11[%c1_252, %c0_253, %c0_254] : memref<2x1x96xf32, #tpu.memory_space<vmem>>, vector<1x1x96xf32>
    %1061 = vector.shape_cast %1060 : vector<1x1x96xf32> to vector<1x96xf32>
    %c0_255 = arith.constant 0 : index
    %c0_256 = arith.constant 0 : index
    %1062 = vector.load %arg19[%c0_255, %c0_256] : memref<64x32xf32, #tpu.memory_space<vmem>>, vector<64x32xf32>
    %c0_257 = arith.constant 0 : index
    %c0_258 = arith.constant 0 : index
    %1063 = vector.load %arg20[%c0_257, %c0_258] : memref<64x32xf32, #tpu.memory_space<vmem>>, vector<64x32xf32>
    %c0_259 = arith.constant 0 : index
    %c0_260 = arith.constant 0 : index
    %c0_261 = arith.constant 0 : index
    %1064 = vector.load %arg10[%c0_259, %c0_260, %c0_261] : memref<2x64x96xf32, #tpu.memory_space<vmem>>, vector<1x64x96xf32>
    %1065 = vector.shape_cast %1064 : vector<1x64x96xf32> to vector<64x96xf32>
    %c1_262 = arith.constant 1 : index
    %c0_263 = arith.constant 0 : index
    %c0_264 = arith.constant 0 : index
    %1066 = vector.load %arg10[%c1_262, %c0_263, %c0_264] : memref<2x64x96xf32, #tpu.memory_space<vmem>>, vector<1x64x96xf32>
    %1067 = vector.shape_cast %1066 : vector<1x64x96xf32> to vector<64x96xf32>
    %1068 = vector.extract_strided_slice %1065 {offsets = [0, 0], sizes = [32, 96], strides = [1, 1]} : vector<64x96xf32> to vector<32x96xf32>
    %cst_265 = arith.constant dense<0.000000e+00> : vector<64x96xf32>
    %1069 = tpu.matmul %1062, %1068, %cst_265 {dimension_numbers = #tpu.dot_dimension_numbers<[1], [0], [0], [1], [0, 0, 1, 1], [], []>} : vector<64x32xf32>, vector<32x96xf32>, vector<64x96xf32> -> vector<64x96xf32>
    %1070 = vector.extract_strided_slice %1065 {offsets = [32, 0], sizes = [32, 96], strides = [1, 1]} : vector<64x96xf32> to vector<32x96xf32>
    %cst_266 = arith.constant dense<0.000000e+00> : vector<64x96xf32>
    %1071 = tpu.matmul %1063, %1070, %cst_266 {dimension_numbers = #tpu.dot_dimension_numbers<[1], [0], [0], [1], [0, 0, 1, 1], [], []>} : vector<64x32xf32>, vector<32x96xf32>, vector<64x96xf32> -> vector<64x96xf32>
    %1072 = arith.addf %1069, %1071 : vector<64x96xf32>
    %1073 = vector.broadcast %1059 : vector<1x96xf32> to vector<64x96xf32>
    %1074 = arith.addf %1072, %1073 : vector<64x96xf32>
    %1075 = vector.extract_strided_slice %1067 {offsets = [0, 0], sizes = [32, 96], strides = [1, 1]} : vector<64x96xf32> to vector<32x96xf32>
    %cst_267 = arith.constant dense<0.000000e+00> : vector<64x96xf32>
    %1076 = tpu.matmul %1062, %1075, %cst_267 {dimension_numbers = #tpu.dot_dimension_numbers<[1], [0], [0], [1], [0, 0, 1, 1], [], []>} : vector<64x32xf32>, vector<32x96xf32>, vector<64x96xf32> -> vector<64x96xf32>
    %1077 = vector.extract_strided_slice %1067 {offsets = [32, 0], sizes = [32, 96], strides = [1, 1]} : vector<64x96xf32> to vector<32x96xf32>
    %cst_268 = arith.constant dense<0.000000e+00> : vector<64x96xf32>
    %1078 = tpu.matmul %1063, %1077, %cst_268 {dimension_numbers = #tpu.dot_dimension_numbers<[1], [0], [0], [1], [0, 0, 1, 1], [], []>} : vector<64x32xf32>, vector<32x96xf32>, vector<64x96xf32> -> vector<64x96xf32>
    %1079 = arith.addf %1076, %1078 : vector<64x96xf32>
    %1080 = vector.broadcast %1061 : vector<1x96xf32> to vector<64x96xf32>
    %1081 = arith.addf %1079, %1080 : vector<64x96xf32>
    %c0_269 = arith.constant 0 : index
    %c0_270 = arith.constant 0 : index
    %c0_271 = arith.constant 0 : index
    %1082 = vector.load %arg12[%c0_269, %c0_270, %c0_271] : memref<2x32x96xf32, #tpu.memory_space<vmem>>, vector<1x32x96xf32>
    %1083 = vector.shape_cast %1082 : vector<1x32x96xf32> to vector<32x96xf32>
    %c1_272 = arith.constant 1 : index
    %c0_273 = arith.constant 0 : index
    %c0_274 = arith.constant 0 : index
    %1084 = vector.load %arg12[%c1_272, %c0_273, %c0_274] : memref<2x32x96xf32, #tpu.memory_space<vmem>>, vector<1x32x96xf32>
    %1085 = vector.shape_cast %1084 : vector<1x32x96xf32> to vector<32x96xf32>
    %c0_275 = arith.constant 0 : index
    %c0_276 = arith.constant 0 : index
    %c0_277 = arith.constant 0 : index
    %1086 = vector.load %arg13[%c0_275, %c0_276, %c0_277] : memref<2x1x96xf32, #tpu.memory_space<vmem>>, vector<1x1x96xf32>
    %1087 = vector.shape_cast %1086 : vector<1x1x96xf32> to vector<1x96xf32>
    %c1_278 = arith.constant 1 : index
    %c0_279 = arith.constant 0 : index
    %c0_280 = arith.constant 0 : index
    %1088 = vector.load %arg13[%c1_278, %c0_279, %c0_280] : memref<2x1x96xf32, #tpu.memory_space<vmem>>, vector<1x1x96xf32>
    %1089 = vector.shape_cast %1088 : vector<1x1x96xf32> to vector<1x96xf32>
    %cst_281 = arith.constant 0.000000e+00 : f32
    %1090 = vector.broadcast %cst_281 : f32 to vector<8x32xf32>
    %cst_282 = arith.constant 0.000000e+00 : f32
    %1091 = vector.broadcast %cst_282 : f32 to vector<8x32xf32>
    %cst_283 = arith.constant dense<0.000000e+00> : vector<8x96xf32>
    %1092 = tpu.matmul %1090, %1083, %cst_283 {dimension_numbers = #tpu.dot_dimension_numbers<[1], [0], [0], [1], [0, 0, 1, 1], [], []>} : vector<8x32xf32>, vector<32x96xf32>, vector<8x96xf32> -> vector<8x96xf32>
    %1093 = vector.broadcast %1087 : vector<1x96xf32> to vector<8x96xf32>
    %1094 = arith.addf %1092, %1093 : vector<8x96xf32>
    %1095 = vector.extract_strided_slice %1074 {offsets = [0, 0], sizes = [8, 96], strides = [1, 1]} : vector<64x96xf32> to vector<8x96xf32>
    %1096 = vector.extract_strided_slice %1095 {offsets = [0, 0], sizes = [8, 32], strides = [1, 1]} : vector<8x96xf32> to vector<8x32xf32>
    %1097 = vector.extract_strided_slice %1094 {offsets = [0, 0], sizes = [8, 32], strides = [1, 1]} : vector<8x96xf32> to vector<8x32xf32>
    %1098 = arith.addf %1096, %1097 : vector<8x32xf32>
    %1099 = arith.negf %1098 : vector<8x32xf32>
    %1100 = math.exp %1099 : vector<8x32xf32>
    %cst_284 = arith.constant 1.000000e+00 : f32
    %1101 = vector.broadcast %cst_284 : f32 to vector<8x32xf32>
    %1102 = arith.addf %1101, %1100 : vector<8x32xf32>
    %1103 = arith.divf %1101, %1102 : vector<8x32xf32>
    %1104 = vector.extract_strided_slice %1095 {offsets = [0, 32], sizes = [8, 32], strides = [1, 1]} : vector<8x96xf32> to vector<8x32xf32>
    %1105 = vector.extract_strided_slice %1094 {offsets = [0, 32], sizes = [8, 32], strides = [1, 1]} : vector<8x96xf32> to vector<8x32xf32>
    %1106 = arith.addf %1104, %1105 : vector<8x32xf32>
    %1107 = arith.negf %1106 : vector<8x32xf32>
    %1108 = math.exp %1107 : vector<8x32xf32>
    %cst_285 = arith.constant 1.000000e+00 : f32
    %1109 = vector.broadcast %cst_285 : f32 to vector<8x32xf32>
    %1110 = arith.addf %1109, %1108 : vector<8x32xf32>
    %1111 = arith.divf %1109, %1110 : vector<8x32xf32>
    %1112 = vector.extract_strided_slice %1095 {offsets = [0, 64], sizes = [8, 32], strides = [1, 1]} : vector<8x96xf32> to vector<8x32xf32>
    %1113 = vector.extract_strided_slice %1094 {offsets = [0, 64], sizes = [8, 32], strides = [1, 1]} : vector<8x96xf32> to vector<8x32xf32>
    %1114 = arith.mulf %1103, %1113 : vector<8x32xf32>
    %1115 = arith.addf %1112, %1114 : vector<8x32xf32>
    %1116 = math.tanh %1115 : vector<8x32xf32>
    %cst_286 = arith.constant 1.000000e+00 : f32
    %1117 = vector.broadcast %cst_286 : f32 to vector<8x32xf32>
    %1118 = arith.subf %1117, %1111 : vector<8x32xf32>
    %1119 = arith.mulf %1118, %1116 : vector<8x32xf32>
    %1120 = arith.mulf %1111, %1090 : vector<8x32xf32>
    %1121 = arith.addf %1119, %1120 : vector<8x32xf32>
    %cst_287 = arith.constant dense<0.000000e+00> : vector<8x96xf32>
    %1122 = tpu.matmul %1091, %1085, %cst_287 {dimension_numbers = #tpu.dot_dimension_numbers<[1], [0], [0], [1], [0, 0, 1, 1], [], []>} : vector<8x32xf32>, vector<32x96xf32>, vector<8x96xf32> -> vector<8x96xf32>
    %1123 = vector.broadcast %1089 : vector<1x96xf32> to vector<8x96xf32>
    %1124 = arith.addf %1122, %1123 : vector<8x96xf32>
    %1125 = vector.extract_strided_slice %1081 {offsets = [56, 0], sizes = [8, 96], strides = [1, 1]} : vector<64x96xf32> to vector<8x96xf32>
    %1126 = vector.extract_strided_slice %1125 {offsets = [0, 0], sizes = [8, 32], strides = [1, 1]} : vector<8x96xf32> to vector<8x32xf32>
    %1127 = vector.extract_strided_slice %1124 {offsets = [0, 0], sizes = [8, 32], strides = [1, 1]} : vector<8x96xf32> to vector<8x32xf32>
    %1128 = arith.addf %1126, %1127 : vector<8x32xf32>
    %1129 = arith.negf %1128 : vector<8x32xf32>
    %1130 = math.exp %1129 : vector<8x32xf32>
    %cst_288 = arith.constant 1.000000e+00 : f32
    %1131 = vector.broadcast %cst_288 : f32 to vector<8x32xf32>
    %1132 = arith.addf %1131, %1130 : vector<8x32xf32>
    %1133 = arith.divf %1131, %1132 : vector<8x32xf32>
    %1134 = vector.extract_strided_slice %1125 {offsets = [0, 32], sizes = [8, 32], strides = [1, 1]} : vector<8x96xf32> to vector<8x32xf32>
    %1135 = vector.extract_strided_slice %1124 {offsets = [0, 32], sizes = [8, 32], strides = [1, 1]} : vector<8x96xf32> to vector<8x32xf32>
    %1136 = arith.addf %1134, %1135 : vector<8x32xf32>
    %1137 = arith.negf %1136 : vector<8x32xf32>
    %1138 = math.exp %1137 : vector<8x32xf32>
    %cst_289 = arith.constant 1.000000e+00 : f32
    %1139 = vector.broadcast %cst_289 : f32 to vector<8x32xf32>
    %1140 = arith.addf %1139, %1138 : vector<8x32xf32>
    %1141 = arith.divf %1139, %1140 : vector<8x32xf32>
    %1142 = vector.extract_strided_slice %1125 {offsets = [0, 64], sizes = [8, 32], strides = [1, 1]} : vector<8x96xf32> to vector<8x32xf32>
    %1143 = vector.extract_strided_slice %1124 {offsets = [0, 64], sizes = [8, 32], strides = [1, 1]} : vector<8x96xf32> to vector<8x32xf32>
    %1144 = arith.mulf %1133, %1143 : vector<8x32xf32>
    %1145 = arith.addf %1142, %1144 : vector<8x32xf32>
    %1146 = math.tanh %1145 : vector<8x32xf32>
    %cst_290 = arith.constant 1.000000e+00 : f32
    %1147 = vector.broadcast %cst_290 : f32 to vector<8x32xf32>
    %1148 = arith.subf %1147, %1141 : vector<8x32xf32>
    %1149 = arith.mulf %1148, %1146 : vector<8x32xf32>
    %1150 = arith.mulf %1141, %1091 : vector<8x32xf32>
    %1151 = arith.addf %1149, %1150 : vector<8x32xf32>
    %cst_291 = arith.constant dense<0.000000e+00> : vector<8x96xf32>
    %1152 = tpu.matmul %1121, %1083, %cst_291 {dimension_numbers = #tpu.dot_dimension_numbers<[1], [0], [0], [1], [0, 0, 1, 1], [], []>} : vector<8x32xf32>, vector<32x96xf32>, vector<8x96xf32> -> vector<8x96xf32>
    %1153 = vector.broadcast %1087 : vector<1x96xf32> to vector<8x96xf32>
    %1154 = arith.addf %1152, %1153 : vector<8x96xf32>
    %1155 = vector.extract_strided_slice %1074 {offsets = [8, 0], sizes = [8, 96], strides = [1, 1]} : vector<64x96xf32> to vector<8x96xf32>
    %1156 = vector.extract_strided_slice %1155 {offsets = [0, 0], sizes = [8, 32], strides = [1, 1]} : vector<8x96xf32> to vector<8x32xf32>
    %1157 = vector.extract_strided_slice %1154 {offsets = [0, 0], sizes = [8, 32], strides = [1, 1]} : vector<8x96xf32> to vector<8x32xf32>
    %1158 = arith.addf %1156, %1157 : vector<8x32xf32>
    %1159 = arith.negf %1158 : vector<8x32xf32>
    %1160 = math.exp %1159 : vector<8x32xf32>
    %cst_292 = arith.constant 1.000000e+00 : f32
    %1161 = vector.broadcast %cst_292 : f32 to vector<8x32xf32>
    %1162 = arith.addf %1161, %1160 : vector<8x32xf32>
    %1163 = arith.divf %1161, %1162 : vector<8x32xf32>
    %1164 = vector.extract_strided_slice %1155 {offsets = [0, 32], sizes = [8, 32], strides = [1, 1]} : vector<8x96xf32> to vector<8x32xf32>
    %1165 = vector.extract_strided_slice %1154 {offsets = [0, 32], sizes = [8, 32], strides = [1, 1]} : vector<8x96xf32> to vector<8x32xf32>
    %1166 = arith.addf %1164, %1165 : vector<8x32xf32>
    %1167 = arith.negf %1166 : vector<8x32xf32>
    %1168 = math.exp %1167 : vector<8x32xf32>
    %cst_293 = arith.constant 1.000000e+00 : f32
    %1169 = vector.broadcast %cst_293 : f32 to vector<8x32xf32>
    %1170 = arith.addf %1169, %1168 : vector<8x32xf32>
    %1171 = arith.divf %1169, %1170 : vector<8x32xf32>
    %1172 = vector.extract_strided_slice %1155 {offsets = [0, 64], sizes = [8, 32], strides = [1, 1]} : vector<8x96xf32> to vector<8x32xf32>
    %1173 = vector.extract_strided_slice %1154 {offsets = [0, 64], sizes = [8, 32], strides = [1, 1]} : vector<8x96xf32> to vector<8x32xf32>
    %1174 = arith.mulf %1163, %1173 : vector<8x32xf32>
    %1175 = arith.addf %1172, %1174 : vector<8x32xf32>
    %1176 = math.tanh %1175 : vector<8x32xf32>
    %cst_294 = arith.constant 1.000000e+00 : f32
    %1177 = vector.broadcast %cst_294 : f32 to vector<8x32xf32>
    %1178 = arith.subf %1177, %1171 : vector<8x32xf32>
    %1179 = arith.mulf %1178, %1176 : vector<8x32xf32>
    %1180 = arith.mulf %1171, %1121 : vector<8x32xf32>
    %1181 = arith.addf %1179, %1180 : vector<8x32xf32>
    %cst_295 = arith.constant dense<0.000000e+00> : vector<8x96xf32>
    %1182 = tpu.matmul %1181, %1083, %cst_295 {dimension_numbers = #tpu.dot_dimension_numbers<[1], [0], [0], [1], [0, 0, 1, 1], [], []>} : vector<8x32xf32>, vector<32x96xf32>, vector<8x96xf32> -> vector<8x96xf32>
    %1183 = vector.broadcast %1087 : vector<1x96xf32> to vector<8x96xf32>
    %1184 = arith.addf %1182, %1183 : vector<8x96xf32>
    %1185 = vector.extract_strided_slice %1074 {offsets = [16, 0], sizes = [8, 96], strides = [1, 1]} : vector<64x96xf32> to vector<8x96xf32>
    %1186 = vector.extract_strided_slice %1185 {offsets = [0, 0], sizes = [8, 32], strides = [1, 1]} : vector<8x96xf32> to vector<8x32xf32>
    %1187 = vector.extract_strided_slice %1184 {offsets = [0, 0], sizes = [8, 32], strides = [1, 1]} : vector<8x96xf32> to vector<8x32xf32>
    %1188 = arith.addf %1186, %1187 : vector<8x32xf32>
    %1189 = arith.negf %1188 : vector<8x32xf32>
    %1190 = math.exp %1189 : vector<8x32xf32>
    %cst_296 = arith.constant 1.000000e+00 : f32
    %1191 = vector.broadcast %cst_296 : f32 to vector<8x32xf32>
    %1192 = arith.addf %1191, %1190 : vector<8x32xf32>
    %1193 = arith.divf %1191, %1192 : vector<8x32xf32>
    %1194 = vector.extract_strided_slice %1185 {offsets = [0, 32], sizes = [8, 32], strides = [1, 1]} : vector<8x96xf32> to vector<8x32xf32>
    %1195 = vector.extract_strided_slice %1184 {offsets = [0, 32], sizes = [8, 32], strides = [1, 1]} : vector<8x96xf32> to vector<8x32xf32>
    %1196 = arith.addf %1194, %1195 : vector<8x32xf32>
    %1197 = arith.negf %1196 : vector<8x32xf32>
    %1198 = math.exp %1197 : vector<8x32xf32>
    %cst_297 = arith.constant 1.000000e+00 : f32
    %1199 = vector.broadcast %cst_297 : f32 to vector<8x32xf32>
    %1200 = arith.addf %1199, %1198 : vector<8x32xf32>
    %1201 = arith.divf %1199, %1200 : vector<8x32xf32>
    %1202 = vector.extract_strided_slice %1185 {offsets = [0, 64], sizes = [8, 32], strides = [1, 1]} : vector<8x96xf32> to vector<8x32xf32>
    %1203 = vector.extract_strided_slice %1184 {offsets = [0, 64], sizes = [8, 32], strides = [1, 1]} : vector<8x96xf32> to vector<8x32xf32>
    %1204 = arith.mulf %1193, %1203 : vector<8x32xf32>
    %1205 = arith.addf %1202, %1204 : vector<8x32xf32>
    %1206 = math.tanh %1205 : vector<8x32xf32>
    %cst_298 = arith.constant 1.000000e+00 : f32
    %1207 = vector.broadcast %cst_298 : f32 to vector<8x32xf32>
    %1208 = arith.subf %1207, %1201 : vector<8x32xf32>
    %1209 = arith.mulf %1208, %1206 : vector<8x32xf32>
    %1210 = arith.mulf %1201, %1181 : vector<8x32xf32>
    %1211 = arith.addf %1209, %1210 : vector<8x32xf32>
    %cst_299 = arith.constant dense<0.000000e+00> : vector<8x96xf32>
    %1212 = tpu.matmul %1211, %1083, %cst_299 {dimension_numbers = #tpu.dot_dimension_numbers<[1], [0], [0], [1], [0, 0, 1, 1], [], []>} : vector<8x32xf32>, vector<32x96xf32>, vector<8x96xf32> -> vector<8x96xf32>
    %1213 = vector.broadcast %1087 : vector<1x96xf32> to vector<8x96xf32>
    %1214 = arith.addf %1212, %1213 : vector<8x96xf32>
    %1215 = vector.extract_strided_slice %1074 {offsets = [24, 0], sizes = [8, 96], strides = [1, 1]} : vector<64x96xf32> to vector<8x96xf32>
    %1216 = vector.extract_strided_slice %1215 {offsets = [0, 0], sizes = [8, 32], strides = [1, 1]} : vector<8x96xf32> to vector<8x32xf32>
    %1217 = vector.extract_strided_slice %1214 {offsets = [0, 0], sizes = [8, 32], strides = [1, 1]} : vector<8x96xf32> to vector<8x32xf32>
    %1218 = arith.addf %1216, %1217 : vector<8x32xf32>
    %1219 = arith.negf %1218 : vector<8x32xf32>
    %1220 = math.exp %1219 : vector<8x32xf32>
    %cst_300 = arith.constant 1.000000e+00 : f32
    %1221 = vector.broadcast %cst_300 : f32 to vector<8x32xf32>
    %1222 = arith.addf %1221, %1220 : vector<8x32xf32>
    %1223 = arith.divf %1221, %1222 : vector<8x32xf32>
    %1224 = vector.extract_strided_slice %1215 {offsets = [0, 32], sizes = [8, 32], strides = [1, 1]} : vector<8x96xf32> to vector<8x32xf32>
    %1225 = vector.extract_strided_slice %1214 {offsets = [0, 32], sizes = [8, 32], strides = [1, 1]} : vector<8x96xf32> to vector<8x32xf32>
    %1226 = arith.addf %1224, %1225 : vector<8x32xf32>
    %1227 = arith.negf %1226 : vector<8x32xf32>
    %1228 = math.exp %1227 : vector<8x32xf32>
    %cst_301 = arith.constant 1.000000e+00 : f32
    %1229 = vector.broadcast %cst_301 : f32 to vector<8x32xf32>
    %1230 = arith.addf %1229, %1228 : vector<8x32xf32>
    %1231 = arith.divf %1229, %1230 : vector<8x32xf32>
    %1232 = vector.extract_strided_slice %1215 {offsets = [0, 64], sizes = [8, 32], strides = [1, 1]} : vector<8x96xf32> to vector<8x32xf32>
    %1233 = vector.extract_strided_slice %1214 {offsets = [0, 64], sizes = [8, 32], strides = [1, 1]} : vector<8x96xf32> to vector<8x32xf32>
    %1234 = arith.mulf %1223, %1233 : vector<8x32xf32>
    %1235 = arith.addf %1232, %1234 : vector<8x32xf32>
    %1236 = math.tanh %1235 : vector<8x32xf32>
    %cst_302 = arith.constant 1.000000e+00 : f32
    %1237 = vector.broadcast %cst_302 : f32 to vector<8x32xf32>
    %1238 = arith.subf %1237, %1231 : vector<8x32xf32>
    %1239 = arith.mulf %1238, %1236 : vector<8x32xf32>
    %1240 = arith.mulf %1231, %1211 : vector<8x32xf32>
    %1241 = arith.addf %1239, %1240 : vector<8x32xf32>
    %cst_303 = arith.constant dense<0.000000e+00> : vector<8x96xf32>
    %1242 = tpu.matmul %1241, %1083, %cst_303 {dimension_numbers = #tpu.dot_dimension_numbers<[1], [0], [0], [1], [0, 0, 1, 1], [], []>} : vector<8x32xf32>, vector<32x96xf32>, vector<8x96xf32> -> vector<8x96xf32>
    %1243 = vector.broadcast %1087 : vector<1x96xf32> to vector<8x96xf32>
    %1244 = arith.addf %1242, %1243 : vector<8x96xf32>
    %1245 = vector.extract_strided_slice %1074 {offsets = [32, 0], sizes = [8, 96], strides = [1, 1]} : vector<64x96xf32> to vector<8x96xf32>
    %1246 = vector.extract_strided_slice %1245 {offsets = [0, 0], sizes = [8, 32], strides = [1, 1]} : vector<8x96xf32> to vector<8x32xf32>
    %1247 = vector.extract_strided_slice %1244 {offsets = [0, 0], sizes = [8, 32], strides = [1, 1]} : vector<8x96xf32> to vector<8x32xf32>
    %1248 = arith.addf %1246, %1247 : vector<8x32xf32>
    %1249 = arith.negf %1248 : vector<8x32xf32>
    %1250 = math.exp %1249 : vector<8x32xf32>
    %cst_304 = arith.constant 1.000000e+00 : f32
    %1251 = vector.broadcast %cst_304 : f32 to vector<8x32xf32>
    %1252 = arith.addf %1251, %1250 : vector<8x32xf32>
    %1253 = arith.divf %1251, %1252 : vector<8x32xf32>
    %1254 = vector.extract_strided_slice %1245 {offsets = [0, 32], sizes = [8, 32], strides = [1, 1]} : vector<8x96xf32> to vector<8x32xf32>
    %1255 = vector.extract_strided_slice %1244 {offsets = [0, 32], sizes = [8, 32], strides = [1, 1]} : vector<8x96xf32> to vector<8x32xf32>
    %1256 = arith.addf %1254, %1255 : vector<8x32xf32>
    %1257 = arith.negf %1256 : vector<8x32xf32>
    %1258 = math.exp %1257 : vector<8x32xf32>
    %cst_305 = arith.constant 1.000000e+00 : f32
    %1259 = vector.broadcast %cst_305 : f32 to vector<8x32xf32>
    %1260 = arith.addf %1259, %1258 : vector<8x32xf32>
    %1261 = arith.divf %1259, %1260 : vector<8x32xf32>
    %1262 = vector.extract_strided_slice %1245 {offsets = [0, 64], sizes = [8, 32], strides = [1, 1]} : vector<8x96xf32> to vector<8x32xf32>
    %1263 = vector.extract_strided_slice %1244 {offsets = [0, 64], sizes = [8, 32], strides = [1, 1]} : vector<8x96xf32> to vector<8x32xf32>
    %1264 = arith.mulf %1253, %1263 : vector<8x32xf32>
    %1265 = arith.addf %1262, %1264 : vector<8x32xf32>
    %1266 = math.tanh %1265 : vector<8x32xf32>
    %cst_306 = arith.constant 1.000000e+00 : f32
    %1267 = vector.broadcast %cst_306 : f32 to vector<8x32xf32>
    %1268 = arith.subf %1267, %1261 : vector<8x32xf32>
    %1269 = arith.mulf %1268, %1266 : vector<8x32xf32>
    %1270 = arith.mulf %1261, %1241 : vector<8x32xf32>
    %1271 = arith.addf %1269, %1270 : vector<8x32xf32>
    %cst_307 = arith.constant dense<0.000000e+00> : vector<8x96xf32>
    %1272 = tpu.matmul %1271, %1083, %cst_307 {dimension_numbers = #tpu.dot_dimension_numbers<[1], [0], [0], [1], [0, 0, 1, 1], [], []>} : vector<8x32xf32>, vector<32x96xf32>, vector<8x96xf32> -> vector<8x96xf32>
    %1273 = vector.broadcast %1087 : vector<1x96xf32> to vector<8x96xf32>
    %1274 = arith.addf %1272, %1273 : vector<8x96xf32>
    %1275 = vector.extract_strided_slice %1074 {offsets = [40, 0], sizes = [8, 96], strides = [1, 1]} : vector<64x96xf32> to vector<8x96xf32>
    %1276 = vector.extract_strided_slice %1275 {offsets = [0, 0], sizes = [8, 32], strides = [1, 1]} : vector<8x96xf32> to vector<8x32xf32>
    %1277 = vector.extract_strided_slice %1274 {offsets = [0, 0], sizes = [8, 32], strides = [1, 1]} : vector<8x96xf32> to vector<8x32xf32>
    %1278 = arith.addf %1276, %1277 : vector<8x32xf32>
    %1279 = arith.negf %1278 : vector<8x32xf32>
    %1280 = math.exp %1279 : vector<8x32xf32>
    %cst_308 = arith.constant 1.000000e+00 : f32
    %1281 = vector.broadcast %cst_308 : f32 to vector<8x32xf32>
    %1282 = arith.addf %1281, %1280 : vector<8x32xf32>
    %1283 = arith.divf %1281, %1282 : vector<8x32xf32>
    %1284 = vector.extract_strided_slice %1275 {offsets = [0, 32], sizes = [8, 32], strides = [1, 1]} : vector<8x96xf32> to vector<8x32xf32>
    %1285 = vector.extract_strided_slice %1274 {offsets = [0, 32], sizes = [8, 32], strides = [1, 1]} : vector<8x96xf32> to vector<8x32xf32>
    %1286 = arith.addf %1284, %1285 : vector<8x32xf32>
    %1287 = arith.negf %1286 : vector<8x32xf32>
    %1288 = math.exp %1287 : vector<8x32xf32>
    %cst_309 = arith.constant 1.000000e+00 : f32
    %1289 = vector.broadcast %cst_309 : f32 to vector<8x32xf32>
    %1290 = arith.addf %1289, %1288 : vector<8x32xf32>
    %1291 = arith.divf %1289, %1290 : vector<8x32xf32>
    %1292 = vector.extract_strided_slice %1275 {offsets = [0, 64], sizes = [8, 32], strides = [1, 1]} : vector<8x96xf32> to vector<8x32xf32>
    %1293 = vector.extract_strided_slice %1274 {offsets = [0, 64], sizes = [8, 32], strides = [1, 1]} : vector<8x96xf32> to vector<8x32xf32>
    %1294 = arith.mulf %1283, %1293 : vector<8x32xf32>
    %1295 = arith.addf %1292, %1294 : vector<8x32xf32>
    %1296 = math.tanh %1295 : vector<8x32xf32>
    %cst_310 = arith.constant 1.000000e+00 : f32
    %1297 = vector.broadcast %cst_310 : f32 to vector<8x32xf32>
    %1298 = arith.subf %1297, %1291 : vector<8x32xf32>
    %1299 = arith.mulf %1298, %1296 : vector<8x32xf32>
    %1300 = arith.mulf %1291, %1271 : vector<8x32xf32>
    %1301 = arith.addf %1299, %1300 : vector<8x32xf32>
    %cst_311 = arith.constant dense<0.000000e+00> : vector<8x96xf32>
    %1302 = tpu.matmul %1301, %1083, %cst_311 {dimension_numbers = #tpu.dot_dimension_numbers<[1], [0], [0], [1], [0, 0, 1, 1], [], []>} : vector<8x32xf32>, vector<32x96xf32>, vector<8x96xf32> -> vector<8x96xf32>
    %1303 = vector.broadcast %1087 : vector<1x96xf32> to vector<8x96xf32>
    %1304 = arith.addf %1302, %1303 : vector<8x96xf32>
    %1305 = vector.extract_strided_slice %1074 {offsets = [48, 0], sizes = [8, 96], strides = [1, 1]} : vector<64x96xf32> to vector<8x96xf32>
    %1306 = vector.extract_strided_slice %1305 {offsets = [0, 0], sizes = [8, 32], strides = [1, 1]} : vector<8x96xf32> to vector<8x32xf32>
    %1307 = vector.extract_strided_slice %1304 {offsets = [0, 0], sizes = [8, 32], strides = [1, 1]} : vector<8x96xf32> to vector<8x32xf32>
    %1308 = arith.addf %1306, %1307 : vector<8x32xf32>
    %1309 = arith.negf %1308 : vector<8x32xf32>
    %1310 = math.exp %1309 : vector<8x32xf32>
    %cst_312 = arith.constant 1.000000e+00 : f32
    %1311 = vector.broadcast %cst_312 : f32 to vector<8x32xf32>
    %1312 = arith.addf %1311, %1310 : vector<8x32xf32>
    %1313 = arith.divf %1311, %1312 : vector<8x32xf32>
    %1314 = vector.extract_strided_slice %1305 {offsets = [0, 32], sizes = [8, 32], strides = [1, 1]} : vector<8x96xf32> to vector<8x32xf32>
    %1315 = vector.extract_strided_slice %1304 {offsets = [0, 32], sizes = [8, 32], strides = [1, 1]} : vector<8x96xf32> to vector<8x32xf32>
    %1316 = arith.addf %1314, %1315 : vector<8x32xf32>
    %1317 = arith.negf %1316 : vector<8x32xf32>
    %1318 = math.exp %1317 : vector<8x32xf32>
    %cst_313 = arith.constant 1.000000e+00 : f32
    %1319 = vector.broadcast %cst_313 : f32 to vector<8x32xf32>
    %1320 = arith.addf %1319, %1318 : vector<8x32xf32>
    %1321 = arith.divf %1319, %1320 : vector<8x32xf32>
    %1322 = vector.extract_strided_slice %1305 {offsets = [0, 64], sizes = [8, 32], strides = [1, 1]} : vector<8x96xf32> to vector<8x32xf32>
    %1323 = vector.extract_strided_slice %1304 {offsets = [0, 64], sizes = [8, 32], strides = [1, 1]} : vector<8x96xf32> to vector<8x32xf32>
    %1324 = arith.mulf %1313, %1323 : vector<8x32xf32>
    %1325 = arith.addf %1322, %1324 : vector<8x32xf32>
    %1326 = math.tanh %1325 : vector<8x32xf32>
    %cst_314 = arith.constant 1.000000e+00 : f32
    %1327 = vector.broadcast %cst_314 : f32 to vector<8x32xf32>
    %1328 = arith.subf %1327, %1321 : vector<8x32xf32>
    %1329 = arith.mulf %1328, %1326 : vector<8x32xf32>
    %1330 = arith.mulf %1321, %1301 : vector<8x32xf32>
    %1331 = arith.addf %1329, %1330 : vector<8x32xf32>
    %cst_315 = arith.constant dense<0.000000e+00> : vector<8x96xf32>
    %1332 = tpu.matmul %1331, %1083, %cst_315 {dimension_numbers = #tpu.dot_dimension_numbers<[1], [0], [0], [1], [0, 0, 1, 1], [], []>} : vector<8x32xf32>, vector<32x96xf32>, vector<8x96xf32> -> vector<8x96xf32>
    %1333 = vector.broadcast %1087 : vector<1x96xf32> to vector<8x96xf32>
    %1334 = arith.addf %1332, %1333 : vector<8x96xf32>
    %1335 = vector.extract_strided_slice %1074 {offsets = [56, 0], sizes = [8, 96], strides = [1, 1]} : vector<64x96xf32> to vector<8x96xf32>
    %1336 = vector.extract_strided_slice %1335 {offsets = [0, 0], sizes = [8, 32], strides = [1, 1]} : vector<8x96xf32> to vector<8x32xf32>
    %1337 = vector.extract_strided_slice %1334 {offsets = [0, 0], sizes = [8, 32], strides = [1, 1]} : vector<8x96xf32> to vector<8x32xf32>
    %1338 = arith.addf %1336, %1337 : vector<8x32xf32>
    %1339 = arith.negf %1338 : vector<8x32xf32>
    %1340 = math.exp %1339 : vector<8x32xf32>
    %cst_316 = arith.constant 1.000000e+00 : f32
    %1341 = vector.broadcast %cst_316 : f32 to vector<8x32xf32>
    %1342 = arith.addf %1341, %1340 : vector<8x32xf32>
    %1343 = arith.divf %1341, %1342 : vector<8x32xf32>
    %1344 = vector.extract_strided_slice %1335 {offsets = [0, 32], sizes = [8, 32], strides = [1, 1]} : vector<8x96xf32> to vector<8x32xf32>
    %1345 = vector.extract_strided_slice %1334 {offsets = [0, 32], sizes = [8, 32], strides = [1, 1]} : vector<8x96xf32> to vector<8x32xf32>
    %1346 = arith.addf %1344, %1345 : vector<8x32xf32>
    %1347 = arith.negf %1346 : vector<8x32xf32>
    %1348 = math.exp %1347 : vector<8x32xf32>
    %cst_317 = arith.constant 1.000000e+00 : f32
    %1349 = vector.broadcast %cst_317 : f32 to vector<8x32xf32>
    %1350 = arith.addf %1349, %1348 : vector<8x32xf32>
    %1351 = arith.divf %1349, %1350 : vector<8x32xf32>
    %1352 = vector.extract_strided_slice %1335 {offsets = [0, 64], sizes = [8, 32], strides = [1, 1]} : vector<8x96xf32> to vector<8x32xf32>
    %1353 = vector.extract_strided_slice %1334 {offsets = [0, 64], sizes = [8, 32], strides = [1, 1]} : vector<8x96xf32> to vector<8x32xf32>
    %1354 = arith.mulf %1343, %1353 : vector<8x32xf32>
    %1355 = arith.addf %1352, %1354 : vector<8x32xf32>
    %1356 = math.tanh %1355 : vector<8x32xf32>
    %cst_318 = arith.constant 1.000000e+00 : f32
    %1357 = vector.broadcast %cst_318 : f32 to vector<8x32xf32>
    %1358 = arith.subf %1357, %1351 : vector<8x32xf32>
    %1359 = arith.mulf %1358, %1356 : vector<8x32xf32>
    %1360 = arith.mulf %1351, %1331 : vector<8x32xf32>
    %1361 = arith.addf %1359, %1360 : vector<8x32xf32>
    %1362 = vector.extract_strided_slice %1361 {offsets = [0, 0], sizes = [2, 32], strides = [1, 1]} : vector<8x32xf32> to vector<2x32xf32>
    %1363 = vector.extract_strided_slice %1151 {offsets = [0, 0], sizes = [2, 32], strides = [1, 1]} : vector<8x32xf32> to vector<2x32xf32>
    %c0_319 = arith.constant 0 : index
    %c0_320 = arith.constant 0 : index
    %1364 = vector.load %arg14[%c0_319, %c0_320] : memref<64x50xf32, #tpu.memory_space<vmem>>, vector<32x50xf32>
    %cst_321 = arith.constant dense<0.000000e+00> : vector<2x50xf32>
    %1365 = tpu.matmul %1362, %1364, %cst_321 {dimension_numbers = #tpu.dot_dimension_numbers<[1], [0], [0], [1], [0, 0, 1, 1], [], []>} : vector<2x32xf32>, vector<32x50xf32>, vector<2x50xf32> -> vector<2x50xf32>
    %c32_322 = arith.constant 32 : index
    %c0_323 = arith.constant 0 : index
    %1366 = vector.load %arg14[%c32_322, %c0_323] : memref<64x50xf32, #tpu.memory_space<vmem>>, vector<32x50xf32>
    %cst_324 = arith.constant dense<0.000000e+00> : vector<2x50xf32>
    %1367 = tpu.matmul %1363, %1366, %cst_324 {dimension_numbers = #tpu.dot_dimension_numbers<[1], [0], [0], [1], [0, 0, 1, 1], [], []>} : vector<2x32xf32>, vector<32x50xf32>, vector<2x50xf32> -> vector<2x50xf32>
    %1368 = arith.addf %1365, %1367 : vector<2x50xf32>
    %c0_325 = arith.constant 0 : index
    %c0_326 = arith.constant 0 : index
    %1369 = vector.load %arg15[%c0_325, %c0_326] : memref<1x50xf32, #tpu.memory_space<vmem>>, vector<1x50xf32>
    %1370 = vector.broadcast %1369 : vector<1x50xf32> to vector<2x50xf32>
    %1371 = arith.addf %1368, %1370 : vector<2x50xf32>
    %cst_327 = arith.constant dense<0.000000e+00> : vector<2xf32>
    %1372 = vector.multi_reduction <add>, %1371, %cst_327 [1] : vector<2x50xf32> to vector<2xf32>
    %1373 = vector.shape_cast %1372 : vector<2xf32> to vector<2x1xf32>
    %cst_328 = arith.constant dense<0.000000e+00> : vector<1xf32>
    %1374 = vector.multi_reduction <add>, %1373, %cst_328 [0] : vector<2x1xf32> to vector<1xf32>
    %1375 = vector.shape_cast %1374 : vector<1xf32> to vector<1x1xf32>
    %cst_329 = arith.constant 1.000000e+02 : f32
    %1376 = vector.broadcast %cst_329 : f32 to vector<1x1xf32>
    %1377 = arith.divf %1375, %1376 : vector<1x1xf32>
    %1378 = vector.broadcast %1377 : vector<1x1xf32> to vector<2x50xf32>
    %1379 = arith.subf %1371, %1378 : vector<2x50xf32>
    %1380 = arith.mulf %1379, %1379 : vector<2x50xf32>
    %cst_330 = arith.constant dense<0.000000e+00> : vector<2xf32>
    %1381 = vector.multi_reduction <add>, %1380, %cst_330 [1] : vector<2x50xf32> to vector<2xf32>
    %1382 = vector.shape_cast %1381 : vector<2xf32> to vector<2x1xf32>
    %cst_331 = arith.constant dense<0.000000e+00> : vector<1xf32>
    %1383 = vector.multi_reduction <add>, %1382, %cst_331 [0] : vector<2x1xf32> to vector<1xf32>
    %1384 = vector.shape_cast %1383 : vector<1xf32> to vector<1x1xf32>
    %cst_332 = arith.constant 1.000000e+02 : f32
    %1385 = vector.broadcast %cst_332 : f32 to vector<1x1xf32>
    %1386 = arith.divf %1384, %1385 : vector<1x1xf32>
    %cst_333 = arith.constant 9.99999974E-6 : f32
    %1387 = vector.broadcast %cst_333 : f32 to vector<1x1xf32>
    %1388 = arith.addf %1386, %1387 : vector<1x1xf32>
    %1389 = math.rsqrt %1388 : vector<1x1xf32>
    %1390 = vector.broadcast %1389 : vector<1x1xf32> to vector<2x50xf32>
    %1391 = arith.mulf %1379, %1390 : vector<2x50xf32>
    %c0_334 = arith.constant 0 : index
    %c0_335 = arith.constant 0 : index
    %1392 = vector.load %arg16[%c0_334, %c0_335] : memref<50x2xf32, #tpu.memory_space<vmem>>, vector<50x2xf32>
    %cst_336 = arith.constant dense<0.000000e+00> : vector<2x2xf32>
    %1393 = tpu.matmul %1391, %1392, %cst_336 {dimension_numbers = #tpu.dot_dimension_numbers<[1], [0], [0], [1], [0, 0, 1, 1], [], []>} : vector<2x50xf32>, vector<50x2xf32>, vector<2x2xf32> -> vector<2x2xf32>
    %c0_337 = arith.constant 0 : index
    %c0_338 = arith.constant 0 : index
    %1394 = vector.load %arg17[%c0_337, %c0_338] : memref<1x2xf32, #tpu.memory_space<vmem>>, vector<1x2xf32>
    %1395 = vector.broadcast %1394 : vector<1x2xf32> to vector<2x2xf32>
    %1396 = arith.addf %1393, %1395 : vector<2x2xf32>
    %c0_339 = arith.constant 0 : index
    %c0_340 = arith.constant 0 : index
    %1397 = vector.load %arg18[%c0_339, %c0_340] : memref<2x2xf32, #tpu.memory_space<vmem>>, vector<2x2xf32>
    tpu.vector_store %arg18[%c0_339, %c0_340], %1396 {strides = array<i32>} : memref<2x2xf32, #tpu.memory_space<vmem>>, vector<2x2xf32>,
    return
  }
}

</mosaic_0001>

<bundles_post_ra>
// kernel: lstm_net_forward.1
= control target key start
LH: loop header
LB: loop body
LE: loop exit
PB: predicated region body
PF: predicated region fallthrough
CT: control target
= control target key end

     0   :  { %s9463_s0 = inlined_call_operand.vmem [shape: s32[64,1], index: 0, kind: input, shape index: {}]   ;;  %s9464_s1 = inlined_call_operand.vmem [shape: f32[50,16], index: 1, kind: input, shape index: {}]   ;;  %s9465_s2 = inlined_call_operand.vmem [shape: f32[2,16,96], index: 2, kind: input, shape index: {}]   ;;  %s9466_s3 = inlined_call_operand.vmem [shape: f32[2,1,96], index: 3, kind: input, shape index: {}]   ;;  %s9467_s4 = inlined_call_operand.vmem [shape: f32[2,32,96], index: 4, kind: input, shape index: {}]   ;;  %s9468_s5 = inlined_call_operand.vmem [shape: f32[2,1,96], index: 5, kind: input, shape index: {}]   ;;  %s9469_s6 = inlined_call_operand.vmem [shape: f32[2,64,96], index: 6, kind: input, shape index: {}]   ;;  %s9470_s7 = inlined_call_operand.vmem [shape: f32[2,1,96], index: 7, kind: input, shape index: {}]   ;;  %s9471_s8 = inlined_call_operand.hbm [shape: f32[2,32,96], index: 8, kind: input, shape index: {}]   ;;  %s9472_s9 = inlined_call_operand.vmem [shape: f32[2,1,96], index: 9, kind: input, shape index: {}]   ;;  %s9473_s10 = inlined_call_operand.vmem [shape: f32[2,64,96], index: 10, kind: input, shape index: {}]   ;;  %s9474_s11 = inlined_call_operand.vmem [shape: f32[2,1,96], index: 11, kind: input, shape index: {}]   ;;  %s9475_s12 = inlined_call_operand.hbm [shape: f32[2,32,96], index: 12, kind: input, shape index: {}]   ;;  %s9476_s13 = inlined_call_operand.vmem [shape: f32[2,1,96], index: 13, kind: input, shape index: {}]   ;;  %s9477_s14 = inlined_call_operand.vmem [shape: f32[64,50], index: 14, kind: input, shape index: {}]   ;;  %s9478_s15 = inlined_call_operand.hbm [shape: f32[1,50], index: 15, kind: input, shape index: {}]   ;;  %s9479_s16 = inlined_call_operand.vmem [shape: f32[50,2], index: 16, kind: input, shape index: {}]   ;;  %s9480_s17 = inlined_call_operand.hbm [shape: f32[1,2], index: 17, kind: input, shape index: {}]   ;;  %s9481_s18 = inlined_call_operand.hbm [shape: f32[2,2], index: 18, kind: output, shape index: {}]  }
   0x1   :  { %9485 = sst [smem:[#allocation17_spill]] %s9463_s0 }
   0x2   :  { %9486 = sst [smem:[#allocation18_spill]] %s9464_s1 }
   0x3   :  { %9487 = sst [smem:[#allocation19_spill]] %s9465_s2 }
   0x4   :  { %23 = vsyncpa [#allocation5], 0 }
   0x5   :  { %24 = vsyncpa [#allocation8], 0 }
   0x6   :  { %25 = vsyncpa [#allocation11], 0 }
   0x7   :  { %26 = vsyncpa [#allocation6], 0  ;;  %s7846_s27 = smov [#allocation7]   ;;  %s7847_s29 = smov [#allocation4]  }
   0x8   :  { %s66_s28 = sshll.u32 %s7846_s27, 4  ;;  %s48_s30 = sshll.u32 %s7847_s29, 4  ;;  %s67_s28 = int_to_ptr.vmem [resolvable:$true] %s66_s28  ;;  %s49_s30 = int_to_ptr.vmem [resolvable:$true] %s48_s30 }
   0x9   :  { %s7746_s0 = scalar_lea.vmem %s67_s28, 1024  ;;  %p7751_p1 = scmp.lt.s32.totalorder %s67_s28, %s67_s28 }
   0xa   :  { %p7747_p0 = scmp.ne.s32.totalorder %s67_s28, %s7746_s0  ;;  %p7752_p2 = scmp.lt.s32.totalorder %s7746_s0, %s7746_s0 }
   0xc   :  { %p7753_p3 = por %p7752_p2, %p7751_p1 }
   0xe   :  { %p7754_p4 = pnand %p7753_p3, %p7747_p0 }
  0x10   :  { %7757 = shalt.err (!%p7754_p4)
}
  0x11   :  { %s7848_s19 = smov 128   ;;  %s7849_s1 = smov 8  }
  0x12   :  { %72 = dma.hbm_to_vmem [thread:$0]  %s9475_s12, 1024, %s67_s28, [#allocation8], %s7848_s19, %s7848_s19, %s7849_s1  }
  0x13   :  { %s7766_s22 = scalar_lea.vmem %s49_s30, 1024  ;;  %p7771_p6 = scmp.lt.s32.totalorder %s49_s30, %s49_s30 }
  0x14   :  { %p7767_p5 = scmp.ne.s32.totalorder %s49_s30, %s7766_s22  ;;  %p7772_p7 = scmp.lt.s32.totalorder %s7766_s22, %s7766_s22 }
  0x16   :  { %p7773_p8 = por %p7772_p7, %p7771_p6 }
  0x18   :  { %p7774_p9 = pnand %p7773_p8, %p7767_p5 }
  0x1a   :  { %7777 = shalt.err (!%p7774_p9)
}
  0x1b   :  { %54 = dma.hbm_to_vmem [thread:$0]  %s9471_s8, 1024, %s49_s30, [#allocation5], %s7848_s19, %s7848_s19, %s7849_s1  }
  0x1c   :  { %s7850_s24 = smov [#allocation9]   ;;  %s7851_s26 = smov [#allocation10]  }
  0x1d   :  { %s83_s25 = sshll.u32 %s7850_s24, 4  ;;  %s95_s27 = sshll.u32 %s7851_s26, 4  ;;  %s84_s25 = int_to_ptr.vmem [resolvable:$true] %s83_s25  ;;  %s96_s27 = int_to_ptr.vmem [resolvable:$true] %s95_s27 }
  0x1e   :  { %s7786_s29 = scalar_lea.vmem %s84_s25, 16  ;;  %s7790_s12 = scalar_lea.vmem %s84_s25, 32 }
  0x1f   :  { %p7787_p10 = scmp.ne.s32.totalorder %s84_s25, %s7786_s29  ;;  %p7791_p11 = scmp.lt.s32.totalorder %s84_s25, %s84_s25 }
  0x20   :  { %p7792_p12 = scmp.lt.s32.totalorder %s7790_s12, %s7786_s29 }
  0x22   :  { %p7793_p13 = por %p7792_p12, %p7791_p11 }
  0x24   :  { %p7794_p0 = pnand %p7793_p13, %p7787_p10 }
  0x26   :  { %7797 = shalt.err (!%p7794_p0)
}
  0x27   :  { %86 = dma.hbm_to_vmem [thread:$0]  %s9478_s15, 16, %s84_s25, [#allocation8]  }
  0x28   :  { %s7806_s20 = scalar_lea.vmem %s96_s27, 16  ;;  %s7810_s8 = scalar_lea.vmem %s96_s27, 32 }
  0x29   :  { %p7807_p1 = scmp.ne.s32.totalorder %s96_s27, %s7806_s20  ;;  %p7811_p2 = scmp.lt.s32.totalorder %s96_s27, %s96_s27 }
  0x2a   :  { %p7812_p3 = scmp.lt.s32.totalorder %s7810_s8, %s7806_s20 }
  0x2c   :  { %p7813_p4 = por %p7812_p3, %p7811_p2 }
  0x2e   :  { %p7814_p5 = pnand %p7813_p4, %p7807_p1 }
  0x30   :  { %7817 = shalt.err (!%p7814_p5)
}
  0x31   :  { %98 = dma.hbm_to_vmem [thread:$0]  %s9480_s17, 16, %s96_s27, [#allocation11]  }
  0x32   :  { %7838 = dma.done.wait [#allocation5], 1024  }
  0x33   :  { %7839 = vsyncadd [#allocation5], 4294966272 }
  0x34   :  { %7840 = dma.done.wait [#allocation8], 1040  }
  0x35   :  { %7841 = vsyncadd [#allocation8], 4294966256 }
  0x36   :  { %7842 = dma.done.wait [#allocation11], 16  }
  0x37   :  { %7843 = vsyncadd [#allocation11], 4294967280  ;;  %v7852_v0 = vmov 0   ;;  %s9488_s21 = sld [smem:[#allocation17_spill]]  ;;  %vm201_vm0 = vcmask 1041408   ;;  %v111_v17 = vlaneseq  ;;  %vm176_vm1 = vcmask 408576  }
  0x38   :  { %7473 = vset.pattern.permute.xlu1 %v7852_v0  ;;  %7472 = vset.pattern.permute.xlu0 %v7852_v0  ;;  %s9489_s29 = sld [smem:[#allocation18_spill]]  ;;  %v7853_v21 = vmov 0.0   ;;  %vm321_vm10 = vcmask 130048   ;;  %v8048_v41 = vld [vmem:[%s9467_s4 + $0x18] sm:$0xff]  ;;  %v8057_v43 = vld [vmem:[%s9467_s4 + $0x10] sm:$0xff]  ;;  %v8067_v45 = vld [vmem:[%s9467_s4 + $0x8] sm:$0xff] }
  0x39   :  { %s9490_s8 = sld [smem:[#allocation19_spill]]  ;;  %v112_v18 = vand.u32 127, %v111_v17  ;;  %v8076_v47 = vld [vmem:[%s9467_s4] sm:$0xff]  ;;  %vm7854_vm11 = vmmov 0   ;;  %v8101_v51 = vld [vmem:[%s9467_s4 + $0x38] sm:$0xff]  ;;  %v8109_v52 = vld [vmem:[%s9467_s4 + $0x30] sm:$0xff] }
  0x3a   :  { %v8118_v53 = vld [vmem:[%s9467_s4 + $0x28] sm:$0xff]  ;;  %v8127_v54 = vld [vmem:[%s9467_s4 + $0x20] sm:$0xff]  ;;  %s7855_s23 = smov 64   ;;  %s7856_s26 = smov 96   ;;  %vm583_vm12 = vcmask 261120   ;;  %vm6037_vm13 = vcmask 402432  }
  0x3b   :  { %v6193_v55 = vld [vmem:[%s9466_s3] ss:$0 sm:$0xff]  ;;  %v6204_v56 = vld [vmem:[%s9466_s3 + $0x1] ss:$0 sm:$0xff]  ;;  %vm6156_vm14 = vcmask 9216  }
  0x3d   :  { %v115_v1 = vld [vmem:[%s9488_s21 + $0x10] sm:$0xff]  ;;  %v113_v2 = vld [vmem:[%s9488_s21] sm:$0xff]  ;;  %v116_v3 = vld [vmem:[%s9488_s21 + $0x18] sm:$0xff] }
  0x3e   :  { %128 = vperm.xlu1 %7473, %v115_v1   ;;  %122 = vperm.xlu0 %7472, %v113_v2   ;;  %v114_v4 = vld [vmem:[%s9488_s21 + $0x8] sm:$0xff]  ;;  %v175_v5 = vld [vmem:[%s9489_s29 + $0x30] sm:$0x3]  ;;  %v173_v7 = vld [vmem:[%s9489_s29 + $0x20] sm:$0xff] }
  0x3f   :  { %6748 = vmatprep.subr.msk.mxu0 %vm201_vm0, %v175_v5  ;;  %v174_v6 = vld [vmem:[%s9489_s29 + $0x28] sm:$0xff]  ;;  %v117_v9 = vld [vmem:[%s9488_s21 + $0x20] sm:$0xff]  ;;  %v172_v10 = vld [vmem:[%s9489_s29 + $0x18] sm:$0xff] }
  0x40   :  { %6749 = vmatpush3.msk.msra.mxu0 %vm201_vm0, %v175_v5  ;;  %v118_v8 = vld [vmem:[%s9488_s21 + $0x28] sm:$0xff]  ;;  %v120_v11 = vld [vmem:[%s9488_s21 + $0x38] sm:$0xff]  ;;  %v119_v12 = vld [vmem:[%s9488_s21 + $0x30] sm:$0xff] }
  0x41   :  { %6750 = vmatprep.subr.mxu0 %v174_v6  ;;  %v171_v13 = vld [vmem:[%s9489_s29 + $0x10] sm:$0xff]  ;;  %v170_v14 = vld [vmem:[%s9489_s29 + $0x8] sm:$0xff]  ;;  %v169_v15 = vld [vmem:[%s9489_s29] sm:$0xff] }
  0x42   :  { %131 = vperm.xlu1 %7473, %v116_v3   ;;  %125 = vperm.xlu0 %7472, %v114_v4   ;;  %v6203_v16 = vld [vmem:[%s9490_s8 + $0x18] sm:$0xff]  ;;  %v8022_v27 = vld [vmem:[%s9490_s8 + $0x10] sm:$0xff]  ;;  %v314_v37 = vld [vmem:[%s9490_s8 + $0x8] sm:$0xff] }
  0x43   :  { %6751 = vmatpush3.msra.mxu0 %v174_v6  ;;  %6774 = vmatprep.subr.mxu1 %v314_v37  ;;  %v313_v38 = vld [vmem:[%s9490_s8] sm:$0xff] }
  0x44   :  { %6752 = vmatprep.subr.mxu0 %v173_v7  ;;  %6775 = vmatpush3.msra.mxu1 %v314_v37  ;;  %v8165_v6 = vld [vmem:[%s9468_s5] ss:$0 sm:$0xff] }
  0x45   :  { %6753 = vmatpush3.msra.mxu0 %v173_v7  ;;  %6776 = vmatprep.subr.mxu1 %v313_v38 }
  0x46   :  { %137 = vperm.xlu1 %7473, %v118_v8   ;;  %134 = vperm.xlu0 %7472, %v117_v9  }
  0x47   :  { %6754 = vmatprep.subr.mxu0 %v172_v10  ;;  %6777 = vmatpush3.msra.mxu1 %v313_v38 }
  0x48   :  { %6755 = vmatpush3.msra.mxu0 %v172_v10  ;;  %7456 = vmatprep.subr.mxu1 %v6203_v16 }
  0x49   :  { %6756 = vmatprep.subr.mxu0 %v171_v13 }
  0x4a   :  { %143 = vperm.xlu1 %7473, %v120_v11   ;;  %140 = vperm.xlu0 %7472, %v119_v12  }
  0x4b   :  { %6757 = vmatpush3.msra.mxu0 %v171_v13 }
  0x4c   :  { %6758 = vmatprep.subr.mxu0 %v170_v14 }
  0x4d   :  { %6759 = vmatpush3.msra.mxu0 %v170_v14 }
  0x4e   :  { %6760 = vmatprep.subr.mxu0 %v169_v15 }
  0x4f   :  { %6761 = vmatpush3.msra.mxu0 %v169_v15 }
  0x50   :  { %6790 = vmatprep.subr.mxu0 %v6203_v16 }
  0xb9   :  { %v129_v19 = vpop.permute.xlu1 %128  ;;  %v123_v20 = vpop.permute.xlu0 %122 }
  0xba   :  { %vm145_vm2 = vcmp.eq.s32.totalorder %v112_v18, %v123_v20  ;;  %vm147_vm3 = vcmp.eq.s32.totalorder %v112_v18, %v129_v19 }
  0xbb   :  { %v6175_v22 = vsel %vm145_vm2, 1.0, %v7853_v21  ;;  %v6177_v25 = vsel %vm147_vm3, 1.0, %v7853_v21 }
  0xbc   :  { %6762 = vmatprep.mubr.msk.f32.mxu0 %vm176_vm1, %v6175_v22 }
  0xbd   :  { %v132_v23 = vpop.permute.xlu1 %131  ;;  %v126_v24 = vpop.permute.xlu0 %125 }
  0xbe   :  { %vm146_vm4 = vcmp.eq.s32.totalorder %v112_v18, %v126_v24  ;;  %vm148_vm5 = vcmp.eq.s32.totalorder %v112_v18, %v132_v23 }
  0xbf   :  { %v6176_v26 = vsel %vm146_vm4, 1.0, %v7853_v21  ;;  %v6178_v30 = vsel %vm148_vm5, 1.0, %v7853_v21 }
  0xc0   :  { %6763 = vmatmul.mubr.msk.f32.vlgmr.msra.gmra.mxu0 %vm176_vm1, %v6176_v26 }
  0xc1   :  { %v138_v28 = vpop.permute.xlu1 %137  ;;  %6765 = vmatprep.mubr.msk.f32.mxu0 %vm176_vm1, %v6177_v25  ;;  %v135_v29 = vpop.permute.xlu0 %134  ;;  %6791 = vmatpush3.msra.mxu0 %v6203_v16 }
  0xc2   :  { %vm149_vm6 = vcmp.eq.s32.totalorder %v112_v18, %v135_v29  ;;  %6792 = vmatprep.subr.mxu0 %v8022_v27  ;;  %vm150_vm7 = vcmp.eq.s32.totalorder %v112_v18, %v138_v28 }
  0xc3   :  { %v6179_v31 = vsel %vm149_vm6, 1.0, %v7853_v21  ;;  %6793 = vmatpush3.msra.mxu0 %v8022_v27  ;;  %v6180_v34 = vsel %vm150_vm7, 1.0, %v7853_v21 }
  0xc4   :  { %6766 = vmatmul.mubr.msk.f32.gmra.mxu0 %vm176_vm1, %v6178_v30  ;;  %6806 = vmatprep.subr.mxu0 %v7853_v21 }
  0xc5   :  { %v144_v32 = vpop.permute.xlu1 %143  ;;  %6768 = vmatprep.mubr.msk.f32.mxu0 %vm176_vm1, %v6179_v31  ;;  %v141_v33 = vpop.permute.xlu0 %140 }
  0xc6   :  { %vm151_vm8 = vcmp.eq.s32.totalorder %v112_v18, %v141_v33  ;;  %vm152_vm9 = vcmp.eq.s32.totalorder %v112_v18, %v144_v32 }
  0xc7   :  { %v6181_v35 = vsel %vm151_vm8, 1.0, %v7853_v21  ;;  %v6182_v36 = vsel %vm152_vm9, 1.0, %v7853_v21 }
  0xc8   :  { %6769 = vmatmul.mubr.msk.f32.gmra.mxu0 %vm176_vm1, %v6180_v34 }
  0xc9   :  { %6771 = vmatprep.mubr.msk.f32.mxu0 %vm176_vm1, %v6181_v35 }
  0xcc   :  { %6772 = vmatmul.mubr.msk.f32.gmra.mxu0 %vm176_vm1, %v6182_v36 }
 0x180   :  { %v6764_v39 = vpop.f32.mrf.mxu0 }
 0x182   :  { %v271_v40 = vpop.f32.mrf.mxu0 }
 0x183   :  { %6778 = vmatprep.mubr.msk.f32.mxu1 %vm321_vm10, %v271_v40  ;;  %6794 = vmatprep.mubr.msk.f32.mxu0 %vm321_vm10, %v271_v40 }
 0x184   :  { %v6767_v42 = vpop.f32.mrf.mxu0  ;;  %6779 = vmatmul.mubr.msk.f32.vlgmr.msra.gmra.mxu1 %vm321_vm10, %v6764_v39  ;;  %6795 = vmatmul.mubr.msk.f32.vlgmr.msra.gmra.mxu0 %vm321_vm10, %v6764_v39 }
 0x185   :  { %6807 = vmatpush3.msra.mxu0 %v8048_v41  ;;  %7458 = vmatpush3.msra.mxu1 %v6203_v16 }
 0x186   :  { %6808 = vmatprep.subr.mxu0 %v7853_v21  ;;  %v281_v44 = vpop.f32.mrf.mxu0  ;;  %7457 = vmatprep.subr.mxu1 %v8022_v27 }
 0x187   :  { %6809 = vmatpush3.msra.mxu0 %v8057_v43  ;;  %6781 = vmatprep.mubr.msk.f32.mxu1 %vm321_vm10, %v281_v44 }
 0x188   :  { %6797 = vmatprep.mubr.msk.f32.mxu0 %vm321_vm10, %v281_v44  ;;  %6810 = vmatprep.subr.mxu0 %v7853_v21  ;;  %v6770_v46 = vpop.f32.mrf.mxu0 }
 0x189   :  { %6782 = vmatmul.mubr.msk.f32.gmra.mxu1 %vm321_vm10, %v6767_v42  ;;  %6798 = vmatmul.mubr.msk.f32.gmra.mxu0 %vm321_vm10, %v6767_v42 }
 0x18a   :  { %6811 = vmatpush3.msra.mxu0 %v8067_v45  ;;  %v291_v48 = vpop.f32.mrf.mxu0  ;;  %6814 = vmatprep.mubr.msk.f32.mxu0 %vm7854_vm11, %v7853_v21 }
 0x18b   :  { %6812 = vmatprep.subr.mxu0 %v7853_v21  ;;  %6784 = vmatprep.mubr.msk.f32.mxu1 %vm321_vm10, %v291_v48 }
 0x18c   :  { %6813 = vmatpush3.msra.mxu0 %v8076_v47  ;;  %v6773_v49 = vpop.f32.mrf.mxu0  ;;  %7459 = vmatpush3.msra.mxu1 %v8022_v27  ;;  %v8188_v27 = vld [vmem:[%s9468_s5 + $0x1] ss:$0 sm:$0xff] }
 0x18d   :  { %6785 = vmatmul.mubr.msk.f32.gmra.mxu1 %vm321_vm10, %v6770_v46  ;;  %6815 = vmatmul.mubr.f32.vlgmr.msra.gmra.mxu0 %v7853_v21 }
 0x18e   :  { %v301_v50 = vpop.f32.mrf.mxu0  ;;  %6817 = vmatprep.subr.mxu1 %v7853_v21  ;;  %6828 = vmatprep.subr.mxu0 %v7853_v21 }
 0x18f   :  { %6787 = vmatprep.mubr.msk.f32.mxu1 %vm321_vm10, %v301_v50  ;;  %6829 = vmatpush3.msra.mxu0 %v8048_v41 }
 0x190   :  { %6830 = vmatprep.subr.mxu0 %v7853_v21  ;;  %6836 = vmatprep.mubr.msk.f32.mxu0 %vm7854_vm11, %v7853_v21 }
 0x191   :  { %6788 = vmatmul.mubr.msk.f32.gmra.mxu1 %vm321_vm10, %v6773_v49  ;;  %6831 = vmatpush3.msra.mxu0 %v8057_v43 }
 0x192   :  { %6800 = vmatprep.mubr.msk.f32.mxu1 %vm321_vm10, %v291_v48  ;;  %6832 = vmatprep.subr.mxu0 %v7853_v21 }
 0x193   :  { %6833 = vmatpush3.msra.mxu0 %v8067_v45 }
 0x194   :  { %6834 = vmatprep.subr.mxu0 %v7853_v21 }
 0x195   :  { %6801 = vmatmul.mubr.msk.f32.vlgmr.msra.gmra.mxu1 %vm321_vm10, %v6770_v46  ;;  %6835 = vmatpush3.msra.mxu0 %v8076_v47 }
 0x196   :  { %6803 = vmatprep.mubr.msk.f32.mxu1 %vm321_vm10, %v301_v50  ;;  %6818 = vmatpush3.msra.mxu1 %v8101_v51 }
 0x197   :  { %6819 = vmatprep.subr.mxu1 %v7853_v21  ;;  %6850 = vmatprep.subr.mxu0 %v7853_v21 }
 0x198   :  { %6820 = vmatpush3.msra.mxu1 %v8109_v52 }
 0x199   :  { %6804 = vmatmul.mubr.msk.f32.gmra.mxu1 %vm321_vm10, %v6773_v49  ;;  %6821 = vmatprep.subr.mxu1 %v7853_v21 }
 0x19a   :  { %6822 = vmatpush3.msra.mxu1 %v8118_v53  ;;  %6825 = vmatprep.mubr.msk.f32.mxu1 %vm7854_vm11, %v7853_v21 }
 0x19b   :  { %6823 = vmatprep.subr.mxu1 %v7853_v21 }
 0x19c   :  { %6824 = vmatpush3.msra.mxu1 %v8127_v54 }
 0x19d   :  { %6826 = vmatmul.mubr.f32.vlgmr.msra.gmra.mxu1 %v7853_v21  ;;  %6839 = vmatprep.subr.mxu1 %v7853_v21 }
 0x19e   :  { %6840 = vmatpush3.msra.mxu1 %v8101_v51  ;;  %6847 = vmatprep.mubr.msk.f32.mxu1 %vm7854_vm11, %v7853_v21 }
 0x19f   :  { %6841 = vmatprep.subr.mxu1 %v7853_v21 }
 0x1a0   :  { %6842 = vmatpush3.msra.mxu1 %v8109_v52 }
 0x1a1   :  { %6843 = vmatprep.subr.mxu1 %v7853_v21 }
 0x1a2   :  { %6844 = vmatpush3.msra.mxu1 %v8118_v53 }
 0x1a3   :  { %6845 = vmatprep.subr.mxu1 %v7853_v21 }
 0x1a4   :  { %6846 = vmatpush3.msra.mxu1 %v8127_v54 }
 0x1a5   :  { %6861 = vmatprep.subr.mxu1 %v7853_v21 }
 0x244   :  { %v6780_v57 = vpop.f32.mrf.mxu1  ;;  %v6796_v58 = vpop.f32.mrf.mxu0 }
 0x245   :  { %v8152_v59 = vadd.f32 %v6780_v57, %v6193_v55  ;;  %v8154_v60 = vadd.f32 %v6796_v58, %v6204_v56 }
 0x246   :  { %v412_v61 = vpop.f32.mrf.mxu1  ;;  %v526_v62 = vpop.f32.mrf.mxu0 }
 0x247   :  { %v8156_v63 = vadd.f32 %v6204_v56, %v526_v62  ;;  %v413_v32 = vadd.f32 %v6193_v55, %v412_v61 }
 0x249   :  { %v6783_v0 = vpop.f32.mrf.mxu1  ;;  %v6799_v1 = vpop.f32.mrf.mxu0 }
 0x24a   :  { %v8158_v2 = vadd.f32 %v6783_v0, %v6193_v55  ;;  %v8160_v3 = vadd.f32 %v6799_v1, %v6204_v56 }
 0x24b   :  { %v422_v4 = vpop.f32.mrf.mxu1  ;;  %v536_v5 = vpop.f32.mrf.mxu0 }
 0x24c   :  { %v8167_v7 = vadd.f32 %v6193_v55, %v422_v4  ;;  %v8169_v8 = vadd.f32 %v6204_v56, %v536_v5 }
 0x24d   :  { %v6786_v9 = vpop.f32.mrf.mxu1  ;;  %v653_v10 = vpop.f32.mrf.mxu0 }
 0x24e   :  { %v8171_v11 = vadd.f32 %v6786_v9, %v6193_v55  ;;  %v654_v12 = vadd.f32 %v8165_v6, %v653_v10 }
 0x24f   :  { %v432_v13 = vpop.f32.mrf.mxu1  ;;  %v6816_v14 = vpop.f32.mrf.mxu0 }
 0x250   :  { %v8174_v15 = vadd.f32 %v6193_v55, %v432_v13  ;;  %665 = vrot.lane.b32.xlu0 %v654_v12, %s7855_s23  ;;  %v657_v33 = vadd.f32 %v654_v12, %v413_v32 }
 0x251   :  { %v6789_v16 = vpop.f32.mrf.mxu1 }
 0x252   :  { %v8177_v17 = vadd.f32 %v6789_v16, %v6193_v55  ;;  %v6219_v34 = vmul.f32 -1.442695, %v657_v33 }
 0x253   :  { %v442_v18 = vpop.f32.mrf.mxu1 }
 0x254   :  { %v8179_v19 = vadd.f32 %v6193_v55, %v442_v18  ;;  %7474 = vpow2.f32 %v6219_v34 }
 0x255   :  { %v6802_v20 = vpop.f32.mrf.mxu1 }
 0x256   :  { %v8181_v22 = vadd.f32 %v6802_v20, %v6204_v56 }
 0x257   :  { %v546_v23 = vpop.f32.mrf.mxu1 }
 0x258   :  { %v8183_v24 = vadd.f32 %v6204_v56, %v546_v23 }
 0x259   :  { %v6805_v25 = vpop.f32.mrf.mxu1 }
 0x25a   :  { %v562_v35 = vadd.f32 %v6805_v25, %v6204_v56 }
 0x25b   :  { %v556_v26 = vpop.f32.mrf.mxu1 }
 0x25c   :  { %v8190_v28 = vadd.f32 %v6204_v56, %v556_v26 }
 0x25d   :  { %v755_v29 = vpop.f32.mrf.mxu1 }
 0x25e   :  { %v756_v30 = vadd.f32 %v8188_v27, %v755_v29 }
 0x25f   :  { %v6827_v31 = vpop.f32.mrf.mxu1 }
 0x260   :  { %767 = vrot.lane.b32.xlu1 %v756_v30, %s7855_s23  ;;  %v759_v36 = vadd.f32 %v756_v30, %v562_v35 }
 0x261   :  { %v7475_v38 = vpop.eup %7474 }
 0x262   :  { %v6221_v37 = vmul.f32 -1.442695, %v759_v36  ;;  %v661_v39 = vadd.f32 1.0, %v7475_v38 }
 0x264   :  { %7476 = vpow2.f32 %v6221_v37 }
 0x265   :  { %7478 = vrcp.f32 %v661_v39 }
 0x271   :  { %v7477_v40 = vpop.eup %7476 }
 0x272   :  { %v763_v42 = vadd.f32 1.0, %v7477_v40  ;;  %v7479_v44 = vpop.eup %7478 }
 0x273   :  { %v675_v1 = vsub.f32 1.0, %v7479_v44  ;;  %v681_v5 = vmul.f32 0.0, %v7479_v44 }
 0x274   :  { %7480 = vrcp.f32 %v763_v42 }
 0x281   :  { %v7481_v49 = vpop.eup %7480 }
 0x282   :  { %v777_v12 = vsub.f32 1.0, %v7481_v49  ;;  %v783_v14 = vmul.f32 0.0, %v7481_v49 }
 0x2c2   :  { %v666_v46 = vpop.permute.xlu0 %665 }
 0x2c3   :  { %v668_v48 = vmul.f32 %v7479_v44, %v666_v46 }
 0x2c5   :  { %670 = vrot.lane.b32.xlu0 %v668_v48, %s7855_s23 }
 0x2d2   :  { %v768_v50 = vpop.permute.xlu1 %767 }
 0x2d3   :  { %v770_v55 = vmul.f32 %v7481_v49, %v768_v50 }
 0x2d5   :  { %772 = vrot.lane.b32.xlu1 %v770_v55, %s7855_s23 }
 0x337   :  { %v671_v56 = vpop.permute.xlu0 %670 }
 0x338   :  { %v673_v57 = vadd.f32 %v671_v56, %v413_v32 }
 0x33a   :  { %7482 = vtanh.f32 %v673_v57 }
 0x347   :  { %v7483_v58 = vpop.eup %7482  ;;  %v773_v61 = vpop.permute.xlu1 %772 }
 0x348   :  { %v775_v62 = vadd.f32 %v773_v61, %v562_v35  ;;  %677 = vrot.lane.b32.xlu0 %v7483_v58, %s7856_s26 }
 0x34a   :  { %7484 = vtanh.f32 %v775_v62 }
 0x357   :  { %v7485_v0 = vpop.eup %7484 }
 0x358   :  { %779 = vrot.lane.b32.xlu1 %v7485_v0, %s7856_s26 }
 0x3ba   :  { %v678_v4 = vpop.permute.xlu0 %677 }
 0x3bb   :  { %v680_v9 = vmul.f32 %v678_v4, %v675_v1 }
 0x3bd   :  { %v8198_v10 = vadd.f32 %v681_v5, %v680_v9 }
 0x3bf   :  { %786 = vrot.lane.b32.xlu0 %v8198_v10, %s7856_s26 }
 0x3ca   :  { %v780_v13 = vpop.permute.xlu1 %779 }
 0x3cb   :  { %v782_v16 = vmul.f32 %v780_v13, %v777_v12 }
 0x3cd   :  { %v8202_v18 = vadd.f32 %v783_v14, %v782_v16 }
 0x3cf   :  { %791 = vrot.lane.b32.xlu1 %v8202_v18, %s7856_s26 }
 0x431   :  { %v787_v20 = vpop.permute.xlu0 %786 }
 0x432   :  { %789 = vst.msk [vmem:[#allocation2] sm:$0xff] %vm583_vm12, %v787_v20  ;;  %6837 = vmatmul.mubr.msk.f32.vlgmr.msra.gmra.mxu0 %vm583_vm12, %v787_v20 }
 0x433   :  { %6851 = vmatpush3.msra.mxu0 %v8048_v41  ;;  %6858 = vmatprep.mubr.msk.f32.mxu0 %vm7854_vm11, %v7853_v21 }
 0x434   :  { %6852 = vmatprep.subr.mxu0 %v7853_v21 }
 0x435   :  { %6853 = vmatpush3.msra.mxu0 %v8057_v43 }
 0x436   :  { %6854 = vmatprep.subr.mxu0 %v7853_v21 }
 0x437   :  { %6855 = vmatpush3.msra.mxu0 %v8067_v45 }
 0x438   :  { %6856 = vmatprep.subr.mxu0 %v7853_v21 }
 0x439   :  { %6857 = vmatpush3.msra.mxu0 %v8076_v47 }
 0x43a   :  { %6872 = vmatprep.subr.mxu0 %v7853_v21 }
 0x441   :  { %v792_v23 = vpop.permute.xlu1 %791 }
 0x442   :  { %794 = vst.msk [vmem:[#allocation3 + $0x38] sm:$0xff] %vm583_vm12, %v792_v23  ;;  %6848 = vmatmul.mubr.msk.f32.vlgmr.msra.gmra.mxu1 %vm583_vm12, %v792_v23 }
 0x443   :  { %6862 = vmatpush3.msra.mxu1 %v8101_v51  ;;  %6869 = vmatprep.mubr.msk.f32.mxu1 %vm7854_vm11, %v7853_v21 }
 0x444   :  { %6863 = vmatprep.subr.mxu1 %v7853_v21 }
 0x445   :  { %6864 = vmatpush3.msra.mxu1 %v8109_v52 }
 0x446   :  { %6865 = vmatprep.subr.mxu1 %v7853_v21 }
 0x447   :  { %6866 = vmatpush3.msra.mxu1 %v8118_v53 }
 0x448   :  { %6867 = vmatprep.subr.mxu1 %v7853_v21 }
 0x449   :  { %6868 = vmatpush3.msra.mxu1 %v8127_v54 }
 0x44a   :  { %6883 = vmatprep.subr.mxu1 %v7853_v21 }
 0x4f2   :  { %v863_v25 = vpop.f32.mrf.mxu0 }
 0x4f3   :  { %v864_v26 = vadd.f32 %v8165_v6, %v863_v25 }
 0x4f4   :  { %v6838_v29 = vpop.f32.mrf.mxu0 }
 0x4f5   :  { %875 = vrot.lane.b32.xlu0 %v864_v26, %s7855_s23  ;;  %v867_v33 = vadd.f32 %v864_v26, %v8152_v59 }
 0x4f7   :  { %v6223_v34 = vmul.f32 -1.442695, %v867_v33 }
 0x4f9   :  { %7486 = vpow2.f32 %v6223_v34 }
 0x502   :  { %v961_v30 = vpop.f32.mrf.mxu1 }
 0x503   :  { %v962_v31 = vadd.f32 %v8188_v27, %v961_v30 }
 0x504   :  { %v6849_v32 = vpop.f32.mrf.mxu1 }
 0x505   :  { %973 = vrot.lane.b32.xlu1 %v962_v31, %s7855_s23  ;;  %v965_v35 = vadd.f32 %v962_v31, %v8190_v28 }
 0x506   :  { %v7487_v37 = vpop.eup %7486 }
 0x507   :  { %v6225_v36 = vmul.f32 -1.442695, %v965_v35  ;;  %v871_v38 = vadd.f32 1.0, %v7487_v37 }
 0x509   :  { %7488 = vpow2.f32 %v6225_v36 }
 0x50a   :  { %7490 = vrcp.f32 %v871_v38 }
 0x516   :  { %v7489_v39 = vpop.eup %7488 }
 0x517   :  { %v969_v40 = vadd.f32 1.0, %v7489_v39  ;;  %v7491_v42 = vpop.eup %7490 }
 0x518   :  { %v885_v0 = vsub.f32 1.0, %v7491_v42  ;;  %v891_v4 = vmul.f32 %v7491_v42, %v8198_v10 }
 0x519   :  { %7492 = vrcp.f32 %v969_v40 }
 0x526   :  { %v7493_v48 = vpop.eup %7492 }
 0x567   :  { %v876_v44 = vpop.permute.xlu0 %875 }
 0x568   :  { %v878_v46 = vmul.f32 %v7491_v42, %v876_v44 }
 0x56a   :  { %880 = vrot.lane.b32.xlu0 %v878_v46, %s7855_s23 }
 0x577   :  { %v974_v49 = vpop.permute.xlu1 %973 }
 0x578   :  { %v976_v50 = vmul.f32 %v7493_v48, %v974_v49 }
 0x57a   :  { %978 = vrot.lane.b32.xlu1 %v976_v50, %s7855_s23 }
 0x5dc   :  { %v881_v55 = vpop.permute.xlu0 %880 }
 0x5dd   :  { %v883_v56 = vadd.f32 %v881_v55, %v8152_v59  ;;  %v983_v59 = vsub.f32 1.0, %v7493_v48 }
 0x5df   :  { %7494 = vtanh.f32 %v883_v56 }
 0x5ec   :  { %v7495_v57 = vpop.eup %7494  ;;  %v979_v58 = vpop.permute.xlu1 %978 }
 0x5ed   :  { %v981_v61 = vadd.f32 %v979_v58, %v8190_v28  ;;  %887 = vrot.lane.b32.xlu0 %v7495_v57, %s7856_s26  ;;  %v989_v28 = vmul.f32 %v7493_v48, %v8202_v18 }
 0x5ef   :  { %7496 = vtanh.f32 %v981_v61 }
 0x5fc   :  { %v7497_v62 = vpop.eup %7496 }
 0x5fd   :  { %985 = vrot.lane.b32.xlu1 %v7497_v62, %s7856_s26 }
 0x65f   :  { %v888_v1 = vpop.permute.xlu0 %887 }
 0x660   :  { %v890_v5 = vmul.f32 %v888_v1, %v885_v0 }
 0x662   :  { %v8243_v9 = vadd.f32 %v891_v4, %v890_v5 }
 0x664   :  { %992 = vrot.lane.b32.xlu0 %v8243_v9, %s7856_s26 }
 0x66f   :  { %v986_v12 = vpop.permute.xlu1 %985 }
 0x670   :  { %v988_v13 = vmul.f32 %v986_v12, %v983_v59 }
 0x672   :  { %v8248_v14 = vadd.f32 %v989_v28, %v988_v13 }
 0x674   :  { %997 = vrot.lane.b32.xlu1 %v8248_v14, %s7856_s26 }
 0x6d6   :  { %v993_v16 = vpop.permute.xlu0 %992 }
 0x6d7   :  { %995 = vst.msk [vmem:[#allocation2 + $0x8] sm:$0xff] %vm583_vm12, %v993_v16  ;;  %6859 = vmatmul.mubr.msk.f32.vlgmr.msra.gmra.mxu0 %vm583_vm12, %v993_v16 }
 0x6d8   :  { %6873 = vmatpush3.msra.mxu0 %v8048_v41  ;;  %6880 = vmatprep.mubr.msk.f32.mxu0 %vm7854_vm11, %v7853_v21 }
 0x6d9   :  { %6874 = vmatprep.subr.mxu0 %v7853_v21 }
 0x6da   :  { %6875 = vmatpush3.msra.mxu0 %v8057_v43 }
 0x6db   :  { %6876 = vmatprep.subr.mxu0 %v7853_v21 }
 0x6dc   :  { %6877 = vmatpush3.msra.mxu0 %v8067_v45 }
 0x6dd   :  { %6878 = vmatprep.subr.mxu0 %v7853_v21 }
 0x6de   :  { %6879 = vmatpush3.msra.mxu0 %v8076_v47 }
 0x6df   :  { %6894 = vmatprep.subr.mxu0 %v7853_v21 }
 0x6e6   :  { %v998_v10 = vpop.permute.xlu1 %997 }
 0x6e7   :  { %1000 = vst.msk [vmem:[#allocation3 + $0x30] sm:$0xff] %vm583_vm12, %v998_v10  ;;  %6870 = vmatmul.mubr.msk.f32.vlgmr.msra.gmra.mxu1 %vm583_vm12, %v998_v10 }
 0x6e8   :  { %6884 = vmatpush3.msra.mxu1 %v8101_v51  ;;  %6891 = vmatprep.mubr.msk.f32.mxu1 %vm7854_vm11, %v7853_v21 }
 0x6e9   :  { %6885 = vmatprep.subr.mxu1 %v7853_v21 }
 0x6ea   :  { %6886 = vmatpush3.msra.mxu1 %v8109_v52 }
 0x6eb   :  { %6887 = vmatprep.subr.mxu1 %v7853_v21 }
 0x6ec   :  { %6888 = vmatpush3.msra.mxu1 %v8118_v53 }
 0x6ed   :  { %6889 = vmatprep.subr.mxu1 %v7853_v21 }
 0x6ee   :  { %6890 = vmatpush3.msra.mxu1 %v8127_v54 }
 0x6ef   :  { %6905 = vmatprep.subr.mxu1 %v7853_v21 }
 0x797   :  { %v1069_v18 = vpop.f32.mrf.mxu0 }
 0x798   :  { %v1070_v20 = vadd.f32 %v8165_v6, %v1069_v18 }
 0x799   :  { %v6860_v23 = vpop.f32.mrf.mxu0 }
 0x79a   :  { %1081 = vrot.lane.b32.xlu0 %v1070_v20, %s7855_s23  ;;  %v1073_v30 = vadd.f32 %v1070_v20, %v8167_v7 }
 0x79c   :  { %v6227_v31 = vmul.f32 -1.442695, %v1073_v30 }
 0x79e   :  { %7498 = vpow2.f32 %v6227_v31 }
 0x7a7   :  { %v1167_v25 = vpop.f32.mrf.mxu1 }
 0x7a8   :  { %v1168_v26 = vadd.f32 %v8188_v27, %v1167_v25 }
 0x7a9   :  { %v6871_v29 = vpop.f32.mrf.mxu1 }
 0x7aa   :  { %1179 = vrot.lane.b32.xlu1 %v1168_v26, %s7855_s23  ;;  %v1171_v32 = vadd.f32 %v1168_v26, %v8181_v22 }
 0x7ab   :  { %v7499_v34 = vpop.eup %7498 }
 0x7ac   :  { %v6229_v33 = vmul.f32 -1.442695, %v1171_v32  ;;  %v1077_v35 = vadd.f32 1.0, %v7499_v34 }
 0x7ae   :  { %7500 = vpow2.f32 %v6229_v33 }
 0x7af   :  { %7502 = vrcp.f32 %v1077_v35 }
 0x7bb   :  { %v7501_v36 = vpop.eup %7500 }
 0x7bc   :  { %v1175_v37 = vadd.f32 1.0, %v7501_v36  ;;  %v7503_v38 = vpop.eup %7502 }
 0x7bd   :  { %v1091_v58 = vsub.f32 1.0, %v7503_v38  ;;  %v1097_v62 = vmul.f32 %v7503_v38, %v8243_v9 }
 0x7be   :  { %7504 = vrcp.f32 %v1175_v37 }
 0x7cb   :  { %v7505_v42 = vpop.eup %7504 }
 0x80c   :  { %v1082_v39 = vpop.permute.xlu0 %1081 }
 0x80d   :  { %v1084_v40 = vmul.f32 %v7503_v38, %v1082_v39 }
 0x80f   :  { %1086 = vrot.lane.b32.xlu0 %v1084_v40, %s7855_s23 }
 0x81c   :  { %v1180_v44 = vpop.permute.xlu1 %1179 }
 0x81d   :  { %v1182_v46 = vmul.f32 %v7505_v42, %v1180_v44 }
 0x81f   :  { %1184 = vrot.lane.b32.xlu1 %v1182_v46, %s7855_s23 }
 0x881   :  { %v1087_v48 = vpop.permute.xlu0 %1086 }
 0x882   :  { %v1089_v49 = vadd.f32 %v1087_v48, %v8167_v7  ;;  %v1189_v7 = vsub.f32 1.0, %v7505_v42 }
 0x884   :  { %7506 = vtanh.f32 %v1089_v49 }
 0x891   :  { %v7507_v50 = vpop.eup %7506  ;;  %v1185_v55 = vpop.permute.xlu1 %1184 }
 0x892   :  { %v1187_v56 = vadd.f32 %v1185_v55, %v8181_v22  ;;  %1093 = vrot.lane.b32.xlu0 %v7507_v50, %s7856_s26  ;;  %v1195_v22 = vmul.f32 %v7505_v42, %v8248_v14 }
 0x894   :  { %7508 = vtanh.f32 %v1187_v56 }
 0x8a1   :  { %v7509_v57 = vpop.eup %7508 }
 0x8a2   :  { %1191 = vrot.lane.b32.xlu1 %v7509_v57, %s7856_s26 }
 0x904   :  { %v1094_v61 = vpop.permute.xlu0 %1093 }
 0x905   :  { %v1096_v0 = vmul.f32 %v1094_v61, %v1091_v58 }
 0x907   :  { %v8289_v1 = vadd.f32 %v1097_v62, %v1096_v0 }
 0x909   :  { %1198 = vrot.lane.b32.xlu0 %v8289_v1, %s7856_s26 }
 0x914   :  { %v1192_v4 = vpop.permute.xlu1 %1191 }
 0x915   :  { %v1194_v5 = vmul.f32 %v1192_v4, %v1189_v7 }
 0x917   :  { %v8294_v59 = vadd.f32 %v1195_v22, %v1194_v5 }
 0x919   :  { %1203 = vrot.lane.b32.xlu1 %v8294_v59, %s7856_s26 }
 0x97b   :  { %v1199_v12 = vpop.permute.xlu0 %1198 }
 0x97c   :  { %1201 = vst.msk [vmem:[#allocation2 + $0x10] sm:$0xff] %vm583_vm12, %v1199_v12  ;;  %6881 = vmatmul.mubr.msk.f32.vlgmr.msra.gmra.mxu0 %vm583_vm12, %v1199_v12 }
 0x97d   :  { %6895 = vmatpush3.msra.mxu0 %v8048_v41  ;;  %6902 = vmatprep.mubr.msk.f32.mxu0 %vm7854_vm11, %v7853_v21 }
 0x97e   :  { %6896 = vmatprep.subr.mxu0 %v7853_v21 }
 0x97f   :  { %6897 = vmatpush3.msra.mxu0 %v8057_v43 }
 0x980   :  { %6898 = vmatprep.subr.mxu0 %v7853_v21 }
 0x981   :  { %6899 = vmatpush3.msra.mxu0 %v8067_v45 }
 0x982   :  { %6900 = vmatprep.subr.mxu0 %v7853_v21 }
 0x983   :  { %6901 = vmatpush3.msra.mxu0 %v8076_v47 }
 0x984   :  { %6916 = vmatprep.subr.mxu0 %v7853_v21 }
 0x98b   :  { %v1204_v9 = vpop.permute.xlu1 %1203 }
 0x98c   :  { %1206 = vst.msk [vmem:[#allocation3 + $0x28] sm:$0xff] %vm583_vm12, %v1204_v9  ;;  %6892 = vmatmul.mubr.msk.f32.vlgmr.msra.gmra.mxu1 %vm583_vm12, %v1204_v9 }
 0x98d   :  { %6906 = vmatpush3.msra.mxu1 %v8101_v51  ;;  %6913 = vmatprep.mubr.msk.f32.mxu1 %vm7854_vm11, %v7853_v21 }
 0x98e   :  { %6907 = vmatprep.subr.mxu1 %v7853_v21 }
 0x98f   :  { %6908 = vmatpush3.msra.mxu1 %v8109_v52 }
 0x990   :  { %6909 = vmatprep.subr.mxu1 %v7853_v21 }
 0x991   :  { %6910 = vmatpush3.msra.mxu1 %v8118_v53 }
 0x992   :  { %6911 = vmatprep.subr.mxu1 %v7853_v21 }
 0x993   :  { %6912 = vmatpush3.msra.mxu1 %v8127_v54 }
 0x994   :  { %6927 = vmatprep.subr.mxu1 %v7853_v21 }
 0xa3c   :  { %v1275_v28 = vpop.f32.mrf.mxu0 }
 0xa3d   :  { %v1276_v13 = vadd.f32 %v8165_v6, %v1275_v28 }
 0xa3e   :  { %v6882_v14 = vpop.f32.mrf.mxu0 }
 0xa3f   :  { %1287 = vrot.lane.b32.xlu0 %v1276_v13, %s7855_s23  ;;  %v1279_v20 = vadd.f32 %v1276_v13, %v8158_v2 }
 0xa41   :  { %v6231_v23 = vmul.f32 -1.442695, %v1279_v20 }
 0xa43   :  { %7510 = vpow2.f32 %v6231_v23 }
 0xa4c   :  { %v1373_v16 = vpop.f32.mrf.mxu1 }
 0xa4d   :  { %v1374_v10 = vadd.f32 %v8188_v27, %v1373_v16 }
 0xa4e   :  { %v6893_v18 = vpop.f32.mrf.mxu1 }
 0xa4f   :  { %1385 = vrot.lane.b32.xlu1 %v1374_v10, %s7855_s23  ;;  %v1377_v25 = vadd.f32 %v1374_v10, %v8183_v24 }
 0xa50   :  { %v7511_v29 = vpop.eup %7510 }
 0xa51   :  { %v6233_v26 = vmul.f32 -1.442695, %v1377_v25  ;;  %v1283_v30 = vadd.f32 1.0, %v7511_v29 }
 0xa53   :  { %7512 = vpow2.f32 %v6233_v26 }
 0xa54   :  { %7514 = vrcp.f32 %v1283_v30 }
 0xa60   :  { %v7513_v31 = vpop.eup %7512 }
 0xa61   :  { %v1381_v32 = vadd.f32 1.0, %v7513_v31  ;;  %v7515_v33 = vpop.eup %7514 }
 0xa62   :  { %v1297_v49 = vsub.f32 1.0, %v7515_v33  ;;  %v1303_v55 = vmul.f32 %v7515_v33, %v8289_v1 }
 0xa63   :  { %7516 = vrcp.f32 %v1381_v32 }
 0xa70   :  { %v7517_v36 = vpop.eup %7516 }
 0xab1   :  { %v1288_v34 = vpop.permute.xlu0 %1287 }
 0xab2   :  { %v1290_v35 = vmul.f32 %v7515_v33, %v1288_v34 }
 0xab4   :  { %1292 = vrot.lane.b32.xlu0 %v1290_v35, %s7855_s23 }
 0xac1   :  { %v1386_v37 = vpop.permute.xlu1 %1385 }
 0xac2   :  { %v1388_v38 = vmul.f32 %v7517_v36, %v1386_v37 }
 0xac4   :  { %1390 = vrot.lane.b32.xlu1 %v1388_v38, %s7855_s23 }
 0xb26   :  { %v1293_v39 = vpop.permute.xlu0 %1292 }
 0xb27   :  { %v1295_v40 = vadd.f32 %v1293_v39, %v8158_v2  ;;  %v1395_v2 = vsub.f32 1.0, %v7517_v36 }
 0xb29   :  { %7518 = vtanh.f32 %v1295_v40 }
 0xb36   :  { %v7519_v42 = vpop.eup %7518  ;;  %v1391_v44 = vpop.permute.xlu1 %1390 }
 0xb37   :  { %v1393_v46 = vadd.f32 %v1391_v44, %v8183_v24  ;;  %1299 = vrot.lane.b32.xlu0 %v7519_v42, %s7856_s26  ;;  %v1401_v24 = vmul.f32 %v7517_v36, %v8294_v59 }
 0xb39   :  { %7520 = vtanh.f32 %v1393_v46 }
 0xb46   :  { %v7521_v48 = vpop.eup %7520 }
 0xb47   :  { %1397 = vrot.lane.b32.xlu1 %v7521_v48, %s7856_s26 }
 0xba9   :  { %v1300_v50 = vpop.permute.xlu0 %1299 }
 0xbaa   :  { %v1302_v56 = vmul.f32 %v1300_v50, %v1297_v49 }
 0xbac   :  { %v8335_v57 = vadd.f32 %v1303_v55, %v1302_v56 }
 0xbae   :  { %1404 = vrot.lane.b32.xlu0 %v8335_v57, %s7856_s26 }
 0xbb9   :  { %v1398_v58 = vpop.permute.xlu1 %1397 }
 0xbba   :  { %v1400_v61 = vmul.f32 %v1398_v58, %v1395_v2 }
 0xbbc   :  { %v8340_v62 = vadd.f32 %v1401_v24, %v1400_v61 }
 0xbbe   :  { %1409 = vrot.lane.b32.xlu1 %v8340_v62, %s7856_s26 }
 0xc20   :  { %v1405_v0 = vpop.permute.xlu0 %1404 }
 0xc21   :  { %1407 = vst.msk [vmem:[#allocation2 + $0x18] sm:$0xff] %vm583_vm12, %v1405_v0  ;;  %6903 = vmatmul.mubr.msk.f32.vlgmr.msra.gmra.mxu0 %vm583_vm12, %v1405_v0 }
 0xc22   :  { %6917 = vmatpush3.msra.mxu0 %v8048_v41  ;;  %6924 = vmatprep.mubr.msk.f32.mxu0 %vm7854_vm11, %v7853_v21 }
 0xc23   :  { %6918 = vmatprep.subr.mxu0 %v7853_v21 }
 0xc24   :  { %6919 = vmatpush3.msra.mxu0 %v8057_v43 }
 0xc25   :  { %6920 = vmatprep.subr.mxu0 %v7853_v21 }
 0xc26   :  { %6921 = vmatpush3.msra.mxu0 %v8067_v45 }
 0xc27   :  { %6922 = vmatprep.subr.mxu0 %v7853_v21 }
 0xc28   :  { %6923 = vmatpush3.msra.mxu0 %v8076_v47 }
 0xc29   :  { %6938 = vmatprep.subr.mxu0 %v7853_v21 }
 0xc30   :  { %v1410_v1 = vpop.permute.xlu1 %1409 }
 0xc31   :  { %1412 = vst.msk [vmem:[#allocation3 + $0x20] sm:$0xff] %vm583_vm12, %v1410_v1  ;;  %6914 = vmatmul.mubr.msk.f32.vlgmr.msra.gmra.mxu1 %vm583_vm12, %v1410_v1 }
 0xc32   :  { %6928 = vmatpush3.msra.mxu1 %v8101_v51  ;;  %6935 = vmatprep.mubr.msk.f32.mxu1 %vm7854_vm11, %v7853_v21 }
 0xc33   :  { %6929 = vmatprep.subr.mxu1 %v7853_v21 }
 0xc34   :  { %6930 = vmatpush3.msra.mxu1 %v8109_v52 }
 0xc35   :  { %6931 = vmatprep.subr.mxu1 %v7853_v21 }
 0xc36   :  { %6932 = vmatpush3.msra.mxu1 %v8118_v53 }
 0xc37   :  { %6933 = vmatprep.subr.mxu1 %v7853_v21 }
 0xc38   :  { %6934 = vmatpush3.msra.mxu1 %v8127_v54 }
 0xc39   :  { %6949 = vmatprep.subr.mxu1 %v7853_v21 }
 0xce1   :  { %v1481_v7 = vpop.f32.mrf.mxu0 }
 0xce2   :  { %v1482_v4 = vadd.f32 %v8165_v6, %v1481_v7 }
 0xce3   :  { %v6904_v22 = vpop.f32.mrf.mxu0 }
 0xce4   :  { %1493 = vrot.lane.b32.xlu0 %v1482_v4, %s7855_s23  ;;  %v1485_v9 = vadd.f32 %v1482_v4, %v8174_v15 }
 0xce6   :  { %v6235_v28 = vmul.f32 -1.442695, %v1485_v9 }
 0xce8   :  { %7522 = vpow2.f32 %v6235_v28 }
 0xcf1   :  { %v1579_v5 = vpop.f32.mrf.mxu1 }
 0xcf2   :  { %v1580_v59 = vadd.f32 %v8188_v27, %v1579_v5 }
 0xcf3   :  { %v6915_v12 = vpop.f32.mrf.mxu1 }
 0xcf4   :  { %1591 = vrot.lane.b32.xlu1 %v1580_v59, %s7855_s23  ;;  %v1583_v13 = vadd.f32 %v1580_v59, %v8160_v3 }
 0xcf5   :  { %v7523_v16 = vpop.eup %7522 }
 0xcf6   :  { %v6237_v14 = vmul.f32 -1.442695, %v1583_v13  ;;  %v1489_v10 = vadd.f32 1.0, %v7523_v16 }
 0xcf8   :  { %7524 = vpow2.f32 %v6237_v14 }
 0xcf9   :  { %7526 = vrcp.f32 %v1489_v10 }
 0xd05   :  { %v7525_v18 = vpop.eup %7524 }
 0xd06   :  { %v1587_v20 = vadd.f32 1.0, %v7525_v18  ;;  %v7527_v23 = vpop.eup %7526 }
 0xd07   :  { %v1503_v38 = vsub.f32 1.0, %v7527_v23  ;;  %v1509_v40 = vmul.f32 %v7527_v23, %v8335_v57 }
 0xd08   :  { %7528 = vrcp.f32 %v1587_v20 }
 0xd15   :  { %v7529_v29 = vpop.eup %7528 }
 0xd56   :  { %v1494_v25 = vpop.permute.xlu0 %1493 }
 0xd57   :  { %v1496_v26 = vmul.f32 %v7527_v23, %v1494_v25 }
 0xd59   :  { %1498 = vrot.lane.b32.xlu0 %v1496_v26, %s7855_s23 }
 0xd66   :  { %v1592_v30 = vpop.permute.xlu1 %1591 }
 0xd67   :  { %v1594_v31 = vmul.f32 %v7529_v29, %v1592_v30 }
 0xd69   :  { %1596 = vrot.lane.b32.xlu1 %v1594_v31, %s7855_s23 }
 0xdcb   :  { %v1499_v32 = vpop.permute.xlu0 %1498 }
 0xdcc   :  { %v1501_v33 = vadd.f32 %v1499_v32, %v8174_v15  ;;  %v1601_v15 = vsub.f32 1.0, %v7529_v29 }
 0xdce   :  { %7530 = vtanh.f32 %v1501_v33 }
 0xddb   :  { %v7531_v34 = vpop.eup %7530  ;;  %v1597_v35 = vpop.permute.xlu1 %1596 }
 0xddc   :  { %v1599_v36 = vadd.f32 %v1597_v35, %v8160_v3  ;;  %1505 = vrot.lane.b32.xlu0 %v7531_v34, %s7856_s26  ;;  %v1607_v3 = vmul.f32 %v7529_v29, %v8340_v62  ;;  %v7722_v34 = vld [vmem:[%s9467_s4 + $0x18] sm:$0xff]  ;;  %v7723_v35 = vld [vmem:[%s9467_s4 + $0x10] sm:$0xff] }
 0xdde   :  { %7532 = vtanh.f32 %v1599_v36  ;;  %v7724_v36 = vld [vmem:[%s9467_s4 + $0x8] sm:$0xff] }
 0xdeb   :  { %v7533_v37 = vpop.eup %7532 }
 0xdec   :  { %1603 = vrot.lane.b32.xlu1 %v7533_v37, %s7856_s26  ;;  %v7725_v37 = vld [vmem:[%s9467_s4] sm:$0xff] }
 0xe4e   :  { %v1506_v39 = vpop.permute.xlu0 %1505 }
 0xe4f   :  { %v1508_v42 = vmul.f32 %v1506_v39, %v1503_v38 }
 0xe51   :  { %v8381_v44 = vadd.f32 %v1509_v40, %v1508_v42 }
 0xe53   :  { %1610 = vrot.lane.b32.xlu0 %v8381_v44, %s7856_s26 }
 0xe5e   :  { %v1604_v46 = vpop.permute.xlu1 %1603 }
 0xe5f   :  { %v1606_v48 = vmul.f32 %v1604_v46, %v1601_v15 }
 0xe61   :  { %v8386_v49 = vadd.f32 %v1607_v3, %v1606_v48 }
 0xe63   :  { %1615 = vrot.lane.b32.xlu1 %v8386_v49, %s7856_s26 }
 0xec5   :  { %v1611_v50 = vpop.permute.xlu0 %1610 }
 0xec6   :  { %1613 = vst.msk [vmem:[#allocation2 + $0x20] sm:$0xff] %vm583_vm12, %v1611_v50  ;;  %6925 = vmatmul.mubr.msk.f32.vlgmr.msra.gmra.mxu0 %vm583_vm12, %v1611_v50 }
 0xec7   :  { %6939 = vmatpush3.msra.mxu0 %v8048_v41  ;;  %6946 = vmatprep.mubr.msk.f32.mxu0 %vm7854_vm11, %v7853_v21 }
 0xec8   :  { %6940 = vmatprep.subr.mxu0 %v7853_v21 }
 0xec9   :  { %6941 = vmatpush3.msra.mxu0 %v8057_v43 }
 0xeca   :  { %6942 = vmatprep.subr.mxu0 %v7853_v21 }
 0xecb   :  { %6943 = vmatpush3.msra.mxu0 %v8067_v45 }
 0xecc   :  { %6944 = vmatprep.subr.mxu0 %v7853_v21 }
 0xecd   :  { %6945 = vmatpush3.msra.mxu0 %v8076_v47 }
 0xece   :  { %6960 = vmatprep.subr.mxu0 %v7853_v21 }
 0xed5   :  { %v1616_v55 = vpop.permute.xlu1 %1615 }
 0xed6   :  { %1618 = vst.msk [vmem:[#allocation3 + $0x18] sm:$0xff] %vm583_vm12, %v1616_v55  ;;  %6936 = vmatmul.mubr.msk.f32.vlgmr.msra.gmra.mxu1 %vm583_vm12, %v1616_v55 }
 0xed7   :  { %6950 = vmatpush3.msra.mxu1 %v8101_v51  ;;  %6957 = vmatprep.mubr.msk.f32.mxu1 %vm7854_vm11, %v7853_v21 }
 0xed8   :  { %6951 = vmatprep.subr.mxu1 %v7853_v21 }
 0xed9   :  { %6952 = vmatpush3.msra.mxu1 %v8109_v52 }
 0xeda   :  { %6953 = vmatprep.subr.mxu1 %v7853_v21 }
 0xedb   :  { %6954 = vmatpush3.msra.mxu1 %v8118_v53 }
 0xedc   :  { %6955 = vmatprep.subr.mxu1 %v7853_v21 }
 0xedd   :  { %6956 = vmatpush3.msra.mxu1 %v8127_v54 }
 0xede   :  { %6971 = vmatprep.subr.mxu1 %v7853_v21 }
 0xf86   :  { %v1687_v41 = vpop.f32.mrf.mxu0 }
 0xf87   :  { %v1688_v43 = vadd.f32 %v8165_v6, %v1687_v41 }
 0xf88   :  { %v6926_v45 = vpop.f32.mrf.mxu0 }
 0xf89   :  { %1699 = vrot.lane.b32.xlu0 %v1688_v43, %s7855_s23  ;;  %v1691_v2 = vadd.f32 %v1688_v43, %v8171_v11 }
 0xf8b   :  { %v6239_v58 = vmul.f32 -1.442695, %v1691_v2 }
 0xf8d   :  { %7534 = vpow2.f32 %v6239_v58 }
 0xf96   :  { %v1785_v47 = vpop.f32.mrf.mxu1 }
 0xf97   :  { %v1786_v56 = vadd.f32 %v8188_v27, %v1785_v47 }
 0xf98   :  { %v6937_v57 = vpop.f32.mrf.mxu1 }
 0xf99   :  { %1797 = vrot.lane.b32.xlu1 %v1786_v56, %s7855_s23  ;;  %v1789_v24 = vadd.f32 %v1786_v56, %v8169_v8 }
 0xf9a   :  { %v7535_v62 = vpop.eup %7534 }
 0xf9b   :  { %v6241_v61 = vmul.f32 -1.442695, %v1789_v24  ;;  %v1695_v0 = vadd.f32 1.0, %v7535_v62 }
 0xf9d   :  { %7536 = vpow2.f32 %v6241_v61  ;;  %v2259_v61 = vld [vmem:[%s9469_s6 + $0x18] sm:$0xff] }
 0xf9e   :  { %7538 = vrcp.f32 %v1695_v0 }
 0xfaa   :  { %v7537_v1 = vpop.eup %7536 }
 0xfab   :  { %v1793_v7 = vadd.f32 1.0, %v7537_v1  ;;  %v7539_v4 = vpop.eup %7538 }
 0xfac   :  { %v1709_v20 = vsub.f32 1.0, %v7539_v4  ;;  %v1715_v25 = vmul.f32 %v7539_v4, %v8381_v44 }
 0xfad   :  { %7540 = vrcp.f32 %v1793_v7 }
 0xfba   :  { %v7541_v59 = vpop.eup %7540 }
 0xffb   :  { %v1700_v22 = vpop.permute.xlu0 %1699 }
 0xffc   :  { %v1702_v5 = vmul.f32 %v7539_v4, %v1700_v22 }
 0xffe   :  { %1704 = vrot.lane.b32.xlu0 %v1702_v5, %s7855_s23 }
0x100b   :  { %v1798_v12 = vpop.permute.xlu1 %1797 }
0x100c   :  { %v1800_v9 = vmul.f32 %v7541_v59, %v1798_v12 }
0x100e   :  { %1802 = vrot.lane.b32.xlu1 %v1800_v9, %s7855_s23 }
0x1070   :  { %v1705_v28 = vpop.permute.xlu0 %1704 }
0x1071   :  { %v1707_v13 = vadd.f32 %v1705_v28, %v8171_v11  ;;  %v1807_v11 = vsub.f32 1.0, %v7541_v59  ;;  %v2258_v28 = vld [vmem:[%s9469_s6 + $0x10] sm:$0xff] }
0x1073   :  { %7542 = vtanh.f32 %v1707_v13  ;;  %v8498_v13 = vld [vmem:[#allocation2] sm:$0xff] }
0x1080   :  { %v7543_v14 = vpop.eup %7542  ;;  %v1803_v16 = vpop.permute.xlu1 %1802 }
0x1081   :  { %v1805_v10 = vadd.f32 %v1803_v16, %v8169_v8  ;;  %1711 = vrot.lane.b32.xlu0 %v7543_v14, %s7856_s26  ;;  %v1813_v8 = vmul.f32 %v7541_v59, %v8386_v49  ;;  %v2257_v14 = vld [vmem:[%s9469_s6 + $0x8] sm:$0xff]  ;;  %v2256_v16 = vld [vmem:[%s9469_s6] sm:$0xff] }
0x1083   :  { %7544 = vtanh.f32 %v1805_v10  ;;  %v8508_v10 = vld [vmem:[#allocation2 + $0x8] sm:$0xff] }
0x1090   :  { %v7545_v18 = vpop.eup %7544 }
0x1091   :  { %1809 = vrot.lane.b32.xlu1 %v7545_v18, %s7856_s26  ;;  %v8512_v18 = vld [vmem:[#allocation2 + $0x10] sm:$0xff] }
0x10f3   :  { %v1712_v23 = vpop.permute.xlu0 %1711 }
0x10f4   :  { %v1714_v26 = vmul.f32 %v1712_v23, %v1709_v20  ;;  %v8516_v20 = vld [vmem:[#allocation2 + $0x18] sm:$0xff]  ;;  %v8520_v23 = vld [vmem:[#allocation2 + $0x20] sm:$0xff] }
0x10f6   :  { %v8427_v29 = vadd.f32 %v1715_v25, %v1714_v26 }
0x10f8   :  { %1816 = vrot.lane.b32.xlu0 %v8427_v29, %s7856_s26 }
0x1103   :  { %v1810_v30 = vpop.permute.xlu1 %1809 }
0x1104   :  { %v1812_v31 = vmul.f32 %v1810_v30, %v1807_v11  ;;  %v7726_v11 = vld [vmem:[%s9468_s5] ss:$0 sm:$0xff] }
0x1106   :  { %v8432_v32 = vadd.f32 %v1813_v8, %v1812_v31 }
0x1108   :  { %1821 = vrot.lane.b32.xlu1 %v8432_v32, %s7856_s26 }
0x116a   :  { %v1817_v33 = vpop.permute.xlu0 %1816 }
0x116b   :  { %1819 = vst.msk [vmem:[#allocation2 + $0x28] sm:$0xff] %vm583_vm12, %v1817_v33  ;;  %6947 = vmatmul.mubr.msk.f32.vlgmr.msra.gmra.mxu0 %vm583_vm12, %v1817_v33 }
0x116c   :  { %6961 = vmatpush3.msra.mxu0 %v7722_v34  ;;  %6968 = vmatprep.mubr.msk.f32.mxu0 %vm7854_vm11, %v7853_v21 }
0x116d   :  { %6962 = vmatprep.subr.mxu0 %v7853_v21 }
0x116e   :  { %6963 = vmatpush3.msra.mxu0 %v7723_v35 }
0x116f   :  { %6964 = vmatprep.subr.mxu0 %v7853_v21 }
0x1170   :  { %6965 = vmatpush3.msra.mxu0 %v7724_v36 }
0x1171   :  { %6966 = vmatprep.subr.mxu0 %v7853_v21 }
0x1172   :  { %6967 = vmatpush3.msra.mxu0 %v7725_v37  ;;  %v8524_v25 = vld [vmem:[#allocation2 + $0x28] sm:$0xff] }
0x117a   :  { %v1822_v38 = vpop.permute.xlu1 %1821 }
0x117b   :  { %1824 = vst.msk [vmem:[#allocation3 + $0x10] sm:$0xff] %vm583_vm12, %v1822_v38  ;;  %6958 = vmatmul.mubr.msk.f32.vlgmr.msra.gmra.mxu1 %vm583_vm12, %v1822_v38 }
0x117c   :  { %6972 = vmatpush3.msra.mxu1 %v8101_v51  ;;  %6979 = vmatprep.mubr.msk.f32.mxu1 %vm7854_vm11, %v7853_v21 }
0x117d   :  { %6973 = vmatprep.subr.mxu1 %v7853_v21 }
0x117e   :  { %6974 = vmatpush3.msra.mxu1 %v8109_v52 }
0x117f   :  { %6975 = vmatprep.subr.mxu1 %v7853_v21 }
0x1180   :  { %6976 = vmatpush3.msra.mxu1 %v8118_v53 }
0x1181   :  { %6977 = vmatprep.subr.mxu1 %v7853_v21 }
0x1182   :  { %6978 = vmatpush3.msra.mxu1 %v8127_v54 }
0x1183   :  { %7002 = vmatprep.subr.mxu1 %v2259_v61 }
0x122b   :  { %v1893_v39 = vpop.f32.mrf.mxu0 }
0x122c   :  { %v1894_v40 = vadd.f32 %v8165_v6, %v1893_v39 }
0x122d   :  { %v6948_v42 = vpop.f32.mrf.mxu0 }
0x122e   :  { %1905 = vrot.lane.b32.xlu0 %v1894_v40, %s7855_s23  ;;  %v1897_v52 = vadd.f32 %v1894_v40, %v8179_v19 }
0x1230   :  { %v6243_v46 = vmul.f32 -1.442695, %v1897_v52 }
0x1232   :  { %7546 = vpow2.f32 %v6243_v46 }
0x123b   :  { %v1991_v51 = vpop.f32.mrf.mxu1 }
0x123c   :  { %v1992_v44 = vadd.f32 %v8188_v27, %v1991_v51 }
0x123d   :  { %v6959_v15 = vpop.f32.mrf.mxu1 }
0x123e   :  { %2003 = vrot.lane.b32.xlu1 %v1992_v44, %s7855_s23  ;;  %v1995_v53 = vadd.f32 %v1992_v44, %v8154_v60 }
0x123f   :  { %v7547_v54 = vpop.eup %7546 }
0x1240   :  { %v6245_v3 = vmul.f32 -1.442695, %v1995_v53  ;;  %v1901_v48 = vadd.f32 1.0, %v7547_v54 }
0x1242   :  { %7548 = vpow2.f32 %v6245_v3 }
0x1243   :  { %7550 = vrcp.f32 %v1901_v48 }
0x124f   :  { %v7549_v6 = vpop.eup %7548 }
0x1250   :  { %v1999_v49 = vadd.f32 1.0, %v7549_v6  ;;  %v7551_v50 = vpop.eup %7550 }
0x1251   :  { %v1915_v62 = vsub.f32 1.0, %v7551_v50 }
0x1252   :  { %7552 = vrcp.f32 %v1999_v49 }
0x125f   :  { %v7553_v27 = vpop.eup %7552 }
0x1260   :  { %v2019_v22 = vmul.f32 %v7553_v27, %v8432_v32  ;;  %v7727_v32 = vld [vmem:[%s9468_s5 + $0x1] ss:$0 sm:$0xff] }
0x12a0   :  { %v1906_v55 = vpop.permute.xlu0 %1905 }
0x12a1   :  { %v1908_v41 = vmul.f32 %v7551_v50, %v1906_v55  ;;  %v6254_v55 = vld [vmem:[%s9469_s6 + $0x58] sm:$0xff] }
0x12a3   :  { %1910 = vrot.lane.b32.xlu0 %v1908_v41, %s7855_s23  ;;  %v6253_v41 = vld [vmem:[%s9469_s6 + $0x50] sm:$0xff] }
0x12b0   :  { %v2004_v43 = vpop.permute.xlu1 %2003 }
0x12b1   :  { %v2006_v45 = vmul.f32 %v7553_v27, %v2004_v43 }
0x12b3   :  { %2008 = vrot.lane.b32.xlu1 %v2006_v45, %s7855_s23 }
0x1315   :  { %v1911_v47 = vpop.permute.xlu0 %1910 }
0x1316   :  { %v1913_v56 = vadd.f32 %v1911_v47, %v8179_v19  ;;  %v1921_v19 = vmul.f32 %v7551_v50, %v8427_v29 }
0x1318   :  { %7554 = vtanh.f32 %v1913_v56 }
0x1325   :  { %v7555_v57 = vpop.eup %7554  ;;  %v2009_v2 = vpop.permute.xlu1 %2008 }
0x1326   :  { %v2011_v58 = vadd.f32 %v2009_v2, %v8154_v60  ;;  %1917 = vrot.lane.b32.xlu0 %v7555_v57, %s7856_s26  ;;  %v2013_v60 = vsub.f32 1.0, %v7553_v27  ;;  %v6251_v27 = vld [vmem:[%s9469_s6 + $0x40] sm:$0xff]  ;;  %v2263_v2 = vld [vmem:[%s9469_s6 + $0x38] sm:$0xff] }
0x1327   :  { %6982 = vmatprep.subr.mxu0 %v2263_v2 }
0x1328   :  { %7556 = vtanh.f32 %v2011_v58  ;;  %v2262_v58 = vld [vmem:[%s9469_s6 + $0x30] sm:$0xff] }
0x1335   :  { %v7557_v24 = vpop.eup %7556 }
0x1336   :  { %2015 = vrot.lane.b32.xlu1 %v7557_v24, %s7856_s26  ;;  %v2261_v24 = vld [vmem:[%s9469_s6 + $0x28] sm:$0xff] }
0x1398   :  { %v1918_v0 = vpop.permute.xlu0 %1917 }
0x1399   :  { %v1920_v1 = vmul.f32 %v1918_v0, %v1915_v62 }
0x139b   :  { %v8482_v7 = vadd.f32 %v1921_v19, %v1920_v1 }
0x139d   :  { %2022 = vrot.lane.b32.xlu0 %v8482_v7, %s7856_s26 }
0x13a8   :  { %v2016_v4 = vpop.permute.xlu1 %2015 }
0x13a9   :  { %v2018_v5 = vmul.f32 %v2016_v4, %v2013_v60  ;;  %v6258_v60 = vld [vmem:[%s9469_s6 + $0x78] sm:$0xff] }
0x13ab   :  { %v8487_v59 = vadd.f32 %v2019_v22, %v2018_v5  ;;  %v8584_v5 = vld [vmem:[#allocation4 + $0x38] sm:$0xff] }
0x13ad   :  { %2027 = vrot.lane.b32.xlu1 %v8487_v59, %s7856_s26 }
0x140f   :  { %v2023_v12 = vpop.permute.xlu0 %2022 }
0x1410   :  { %2025 = vst.msk [vmem:[#allocation2 + $0x30] sm:$0xff] %vm583_vm12, %v2023_v12  ;;  %6969 = vmatmul.mubr.msk.f32.vlgmr.msra.gmra.mxu0 %vm583_vm12, %v2023_v12  ;;  %v8594_v12 = vld [vmem:[#allocation4 + $0x28] sm:$0xff] }
0x1411   :  { %6983 = vmatpush3.msra.mxu0 %v2263_v2 }
0x1412   :  { %6984 = vmatprep.subr.mxu0 %v2262_v58 }
0x1413   :  { %6985 = vmatpush3.msra.mxu0 %v2262_v58 }
0x1414   :  { %6986 = vmatprep.subr.mxu0 %v2261_v24 }
0x1415   :  { %6987 = vmatpush3.msra.mxu0 %v2261_v24 }
0x1417   :  { %v8528_v26 = vld [vmem:[#allocation2 + $0x30] sm:$0xff] }
0x141f   :  { %v2028_v9 = vpop.permute.xlu1 %2027 }
0x1420   :  { %2030 = vst.msk [vmem:[#allocation3 + $0x8] sm:$0xff] %vm583_vm12, %v2028_v9  ;;  %6980 = vmatmul.mubr.msk.f32.vlgmr.msra.gmra.mxu1 %vm583_vm12, %v2028_v9 }
0x1421   :  { %7003 = vmatpush3.msra.mxu1 %v2259_v61  ;;  %7010 = vmatprep.mubr.msk.f32.mxu1 %vm583_vm12, %v8498_v13  ;;  %v2260_v61 = vld [vmem:[%s9469_s6 + $0x20] sm:$0xff] }
0x1422   :  { %7004 = vmatprep.subr.mxu1 %v2258_v28  ;;  %6988 = vmatprep.subr.mxu0 %v2260_v61 }
0x1423   :  { %7005 = vmatpush3.msra.mxu1 %v2258_v28  ;;  %6989 = vmatpush3.msra.mxu0 %v2260_v61  ;;  %v8601_v28 = vld [vmem:[#allocation4 + $0x20] sm:$0xff] }
0x1424   :  { %7006 = vmatprep.subr.mxu1 %v2257_v14  ;;  %7022 = vmatprep.subr.mxu0 %v6258_v60 }
0x1425   :  { %7007 = vmatpush3.msra.mxu1 %v2257_v14 }
0x1426   :  { %7008 = vmatprep.subr.mxu1 %v2256_v16 }
0x1427   :  { %7009 = vmatpush3.msra.mxu1 %v2256_v16  ;;  %v2249_v14 = vld [vmem:[#allocation3 + $0x8] sm:$0xff]  ;;  %v6257_v16 = vld [vmem:[%s9469_s6 + $0x70] sm:$0xff] }
0x1428   :  { %7011 = vmatmul.mubr.msk.f32.vlgmr.msra.gmra.mxu1 %vm583_vm12, %v8508_v10  ;;  %7042 = vmatprep.subr.mxu1 %v6254_v55 }
0x1429   :  { %7013 = vmatprep.mubr.msk.f32.mxu1 %vm583_vm12, %v8512_v18  ;;  %7043 = vmatpush3.msra.mxu1 %v6254_v55 }
0x142a   :  { %7044 = vmatprep.subr.mxu1 %v6253_v41 }
0x142b   :  { %7045 = vmatpush3.msra.mxu1 %v6253_v41 }
0x142c   :  { %7014 = vmatmul.mubr.msk.f32.gmra.mxu1 %vm583_vm12, %v8516_v20 }
0x142d   :  { %7016 = vmatprep.mubr.msk.f32.mxu1 %vm583_vm12, %v8520_v23 }
0x1430   :  { %7017 = vmatmul.mubr.msk.f32.gmra.mxu1 %vm583_vm12, %v8524_v25 }
0x1431   :  { %7019 = vmatprep.mubr.msk.f32.mxu1 %vm583_vm12, %v8528_v26 }
0x14d0   :  { %v2099_v29 = vpop.f32.mrf.mxu0 }
0x14d1   :  { %v2100_v30 = vadd.f32 %v7726_v11, %v2099_v29  ;;  %v2254_v29 = vld [vmem:[#allocation3 + $0x30] sm:$0xff]  ;;  %v2255_v11 = vld [vmem:[#allocation3 + $0x38] sm:$0xff] }
0x14d2   :  { %v6970_v8 = vpop.f32.mrf.mxu0 }
0x14d3   :  { %2111 = vrot.lane.b32.xlu0 %v2100_v30, %s7855_s23  ;;  %v2103_v35 = vadd.f32 %v2100_v30, %v8177_v17  ;;  %v8645_v30 = vld [vmem:[#allocation4 + $0x18] sm:$0xff]  ;;  %v8649_v8 = vld [vmem:[#allocation4 + $0x10] sm:$0xff] }
0x14d5   :  { %v6247_v36 = vmul.f32 -1.442695, %v2103_v35 }
0x14d7   :  { %7558 = vpow2.f32 %v6247_v36 }
0x14e0   :  { %v2197_v31 = vpop.f32.mrf.mxu1 }
0x14e1   :  { %v2198_v33 = vadd.f32 %v7727_v32, %v2197_v31  ;;  %v8654_v31 = vld [vmem:[#allocation4 + $0x8] sm:$0xff]  ;;  %v8659_v32 = vld [vmem:[#allocation4] sm:$0xff] }
0x14e2   :  { %v6981_v34 = vpop.f32.mrf.mxu1 }
0x14e3   :  { %2209 = vrot.lane.b32.xlu1 %v2198_v33, %s7855_s23  ;;  %v2201_v37 = vadd.f32 %v2198_v33, %v8156_v63 }
0x14e4   :  { %v7559_v39 = vpop.eup %7558 }
0x14e5   :  { %v6249_v38 = vmul.f32 -1.442695, %v2201_v37  ;;  %v2107_v40 = vadd.f32 1.0, %v7559_v39 }
0x14e7   :  { %7560 = vpow2.f32 %v6249_v38 }
0x14e8   :  { %7562 = vrcp.f32 %v2107_v40  ;;  %v7012_v33 = vpop.f32.mrf.mxu1 }
0x14ea   :  { %v8682_v34 = vpop.f32.mrf.mxu1 }
0x14ec   :  { %v7015_v35 = vpop.f32.mrf.mxu1 }
0x14ee   :  { %v2502_v36 = vpop.f32.mrf.mxu1 }
0x14f0   :  { %v7018_v37 = vpop.f32.mrf.mxu1 }
0x14f2   :  { %v2512_v38 = vpop.f32.mrf.mxu1 }
0x14f4   :  { %v7561_v42 = vpop.eup %7560 }
0x14f5   :  { %v2205_v51 = vadd.f32 1.0, %v7561_v42  ;;  %v7563_v44 = vpop.eup %7562 }
0x14f6   :  { %v2121_v43 = vsub.f32 1.0, %v7563_v44  ;;  %v2127_v47 = vmul.f32 %v7563_v44, %v8482_v7 }
0x14f7   :  { %7564 = vrcp.f32 %v2205_v51 }
0x1504   :  { %v7565_v46 = vpop.eup %7564 }
0x1505   :  { %v2219_v62 = vsub.f32 1.0, %v7565_v46  ;;  %v2225_v19 = vmul.f32 %v7565_v46, %v8487_v59  ;;  %v8588_v59 = vld [vmem:[#allocation4 + $0x30] sm:$0xff] }
0x1545   :  { %v2112_v15 = vpop.permute.xlu0 %2111 }
0x1546   :  { %v2114_v52 = vmul.f32 %v7563_v44, %v2112_v15 }
0x1548   :  { %2116 = vrot.lane.b32.xlu0 %v2114_v52, %s7855_s23 }
0x1555   :  { %v2210_v53 = vpop.permute.xlu1 %2209 }
0x1556   :  { %v2212_v3 = vmul.f32 %v7565_v46, %v2210_v53 }
0x1558   :  { %2214 = vrot.lane.b32.xlu1 %v2212_v3, %s7855_s23  ;;  %v8687_v3 = vld [vmem:[%s9470_s7] ss:$0 sm:$0xff] }
0x15ba   :  { %v2117_v54 = vpop.permute.xlu0 %2116 }
0x15bb   :  { %v2119_v48 = vadd.f32 %v2117_v54, %v8177_v17 }
0x15bd   :  { %7566 = vtanh.f32 %v2119_v48 }
0x15ca   :  { %v7567_v6 = vpop.eup %7566  ;;  %v2215_v49 = vpop.permute.xlu1 %2214 }
0x15cb   :  { %v2217_v50 = vadd.f32 %v2215_v49, %v8156_v63  ;;  %2123 = vrot.lane.b32.xlu0 %v7567_v6, %s7856_s26  ;;  %v6252_v63 = vld [vmem:[%s9469_s6 + $0x48] sm:$0xff]  ;;  %v8692_v49 = vld [vmem:[%s9472_s9 + $0x1] ss:$0 sm:$0xff] }
0x15cc   :  { %7046 = vmatprep.subr.mxu1 %v6252_v63 }
0x15cd   :  { %7568 = vtanh.f32 %v2217_v50  ;;  %7047 = vmatpush3.msra.mxu1 %v6252_v63 }
0x15ce   :  { %7048 = vmatprep.subr.mxu1 %v6251_v27 }
0x15cf   :  { %7049 = vmatpush3.msra.mxu1 %v6251_v27 }
0x15d0   :  { %7073 = vmatprep.subr.mxu1 %v7853_v21 }
0x15da   :  { %v7569_v17 = vpop.eup %7568 }
0x15db   :  { %2221 = vrot.lane.b32.xlu1 %v7569_v17, %s7856_s26 }
0x163d   :  { %v2124_v45 = vpop.permute.xlu0 %2123 }
0x163e   :  { %v2126_v56 = vmul.f32 %v2124_v45, %v2121_v43 }
0x1640   :  { %v2128_v57 = vadd.f32 %v2127_v47, %v2126_v56 }
0x1642   :  { %2228 = vrot.lane.b32.xlu0 %v2128_v57, %s7856_s26 }
0x164d   :  { %v2222_v0 = vpop.permute.xlu1 %2221 }
0x164e   :  { %v2224_v1 = vmul.f32 %v2222_v0, %v2219_v62 }
0x1650   :  { %v2226_v7 = vadd.f32 %v2225_v19, %v2224_v1 }
0x1652   :  { %2233 = vrot.lane.b32.xlu1 %v2226_v7, %s7856_s26 }
0x16b4   :  { %v2229_v4 = vpop.permute.xlu0 %2228 }
0x16b5   :  { %2231 = vst.msk [vmem:[#allocation2 + $0x38] sm:$0xff] %vm583_vm12, %v2229_v4 }
0x16bc   :  { %v2247_v22 = vld [vmem:[#allocation2 + $0x38] sm:$0xff] }
0x16bd   :  { %7020 = vmatmul.mubr.msk.f32.gmra.mxu1 %vm583_vm12, %v2247_v22 }
0x16be   :  { %7050 = vmatprep.mubr.msk.f32.mxu1 %vm583_vm12, %v8498_v13 }
0x16c1   :  { %7051 = vmatmul.mubr.msk.f32.vlgmr.msra.gmra.mxu1 %vm583_vm12, %v8508_v10  ;;  %v2250_v10 = vld [vmem:[#allocation3 + $0x10] sm:$0xff] }
0x16c2   :  { %7074 = vmatpush3.msra.mxu1 %v8584_v5  ;;  %7053 = vmatprep.mubr.msk.f32.mxu1 %vm583_vm12, %v8512_v18  ;;  %v6256_v18 = vld [vmem:[%s9469_s6 + $0x68] sm:$0xff] }
0x16c3   :  { %7075 = vmatprep.subr.mxu1 %v7853_v21 }
0x16c4   :  { %v2234_v9 = vpop.permute.xlu1 %2233  ;;  %7076 = vmatpush3.msra.mxu1 %v8588_v59 }
0x16c5   :  { %2236 = vst.msk [vmem:[#allocation3] sm:$0xff] %vm583_vm12, %v2234_v9  ;;  %7054 = vmatmul.mubr.msk.f32.gmra.mxu1 %vm583_vm12, %v8516_v20  ;;  %7077 = vmatprep.subr.mxu1 %v7853_v21  ;;  %v2251_v20 = vld [vmem:[#allocation3 + $0x18] sm:$0xff] }
0x16c6   :  { %7056 = vmatprep.mubr.msk.f32.mxu1 %vm583_vm12, %v8520_v23  ;;  %7078 = vmatpush3.msra.mxu1 %v8594_v12  ;;  %v6255_v23 = vld [vmem:[%s9469_s6 + $0x60] sm:$0xff] }
0x16c7   :  { %7079 = vmatprep.subr.mxu1 %v7853_v21 }
0x16c8   :  { %7080 = vmatpush3.msra.mxu1 %v8601_v28 }
0x16c9   :  { %7057 = vmatmul.mubr.msk.f32.gmra.mxu1 %vm583_vm12, %v8524_v25  ;;  %7095 = vmatprep.subr.mxu1 %v7853_v21  ;;  %v2252_v25 = vld [vmem:[#allocation3 + $0x20] sm:$0xff] }
0x16ca   :  { %7059 = vmatprep.mubr.msk.f32.mxu1 %vm583_vm12, %v8528_v26  ;;  %v2253_v26 = vld [vmem:[#allocation3 + $0x28] sm:$0xff] }
0x16cc   :  { %v2248_v13 = vld [vmem:[#allocation3] sm:$0xff] }
0x16cd   :  { %6990 = vmatprep.mubr.msk.f32.mxu0 %vm583_vm12, %v2248_v13  ;;  %7060 = vmatmul.mubr.msk.f32.gmra.mxu1 %vm583_vm12, %v2247_v22  ;;  %v6292_v22 = vld [vmem:[%s9470_s7 + $0x1] ss:$0 sm:$0xff] }
0x16ce   :  { %6991 = vmatmul.mubr.msk.f32.vlgmr.msra.gmra.mxu0 %vm583_vm12, %v2249_v14  ;;  %7081 = vmatprep.mubr.msk.f32.mxu1 %vm7854_vm11, %v7853_v21 }
0x16cf   :  { %6993 = vmatprep.mubr.msk.f32.mxu0 %vm583_vm12, %v2250_v10  ;;  %7023 = vmatpush3.msra.mxu0 %v6258_v60 }
0x16d0   :  { %7024 = vmatprep.subr.mxu0 %v6257_v16 }
0x16d1   :  { %7082 = vmatmul.mubr.f32.vlgmr.msra.gmra.mxu1 %v7853_v21  ;;  %7025 = vmatpush3.msra.mxu0 %v6257_v16 }
0x16d2   :  { %6994 = vmatmul.mubr.msk.f32.gmra.mxu0 %vm583_vm12, %v2251_v20  ;;  %7026 = vmatprep.subr.mxu0 %v6256_v18 }
0x16d3   :  { %6996 = vmatprep.mubr.msk.f32.mxu0 %vm583_vm12, %v2252_v25  ;;  %7027 = vmatpush3.msra.mxu0 %v6256_v18 }
0x16d4   :  { %7028 = vmatprep.subr.mxu0 %v6255_v23  ;;  %7096 = vmatpush3.msra.mxu1 %v8584_v5 }
0x16d5   :  { %7029 = vmatpush3.msra.mxu0 %v6255_v23  ;;  %7097 = vmatprep.subr.mxu1 %v7853_v21 }
0x16d6   :  { %6997 = vmatmul.mubr.msk.f32.gmra.mxu0 %vm583_vm12, %v2253_v26  ;;  %7062 = vmatprep.subr.mxu0 %v7853_v21 }
0x16d7   :  { %6999 = vmatprep.mubr.msk.f32.mxu0 %vm583_vm12, %v2254_v29  ;;  %7098 = vmatpush3.msra.mxu1 %v8588_v59 }
0x16d8   :  { %7099 = vmatprep.subr.mxu1 %v7853_v21  ;;  %7103 = vmatprep.mubr.msk.f32.mxu1 %vm7854_vm11, %v7853_v21 }
0x16d9   :  { %7100 = vmatpush3.msra.mxu1 %v8594_v12 }
0x16da   :  { %7000 = vmatmul.mubr.msk.f32.gmra.mxu0 %vm583_vm12, %v2255_v11  ;;  %7101 = vmatprep.subr.mxu1 %v7853_v21 }
0x16db   :  { %7030 = vmatprep.mubr.msk.f32.mxu0 %vm583_vm12, %v2248_v13  ;;  %7102 = vmatpush3.msra.mxu1 %v8601_v28 }
0x16dc   :  { %7117 = vmatprep.subr.mxu1 %v7853_v21 }
0x16de   :  { %7031 = vmatmul.mubr.msk.f32.vlgmr.msra.gmra.mxu0 %vm583_vm12, %v2249_v14 }
0x16df   :  { %7033 = vmatprep.mubr.msk.f32.mxu0 %vm583_vm12, %v2250_v10  ;;  %7063 = vmatpush3.msra.mxu0 %v8645_v30 }
0x16e0   :  { %7064 = vmatprep.subr.mxu0 %v7853_v21 }
0x16e1   :  { %7065 = vmatpush3.msra.mxu0 %v8649_v8 }
0x16e2   :  { %7034 = vmatmul.mubr.msk.f32.gmra.mxu0 %vm583_vm12, %v2251_v20  ;;  %7066 = vmatprep.subr.mxu0 %v7853_v21 }
0x16e3   :  { %7036 = vmatprep.mubr.msk.f32.mxu0 %vm583_vm12, %v2252_v25  ;;  %7067 = vmatpush3.msra.mxu0 %v8654_v31 }
0x16e4   :  { %7068 = vmatprep.subr.mxu0 %v7853_v21 }
0x16e5   :  { %7069 = vmatpush3.msra.mxu0 %v8659_v32 }
0x16e6   :  { %7037 = vmatmul.mubr.msk.f32.gmra.mxu0 %vm583_vm12, %v2253_v26  ;;  %7084 = vmatprep.subr.mxu0 %v7853_v21 }
0x16e7   :  { %7039 = vmatprep.mubr.msk.f32.mxu0 %vm583_vm12, %v2254_v29 }
0x16ea   :  { %7040 = vmatmul.mubr.msk.f32.gmra.mxu0 %vm583_vm12, %v2255_v11 }
0x16eb   :  { %7070 = vmatprep.mubr.msk.f32.mxu0 %vm7854_vm11, %v7853_v21 }
0x16ee   :  { %7071 = vmatmul.mubr.f32.vlgmr.msra.gmra.mxu0 %v7853_v21 }
0x16ef   :  { %7085 = vmatpush3.msra.mxu0 %v8645_v30  ;;  %7092 = vmatprep.mubr.msk.f32.mxu0 %vm7854_vm11, %v7853_v21 }
0x16f0   :  { %7086 = vmatprep.subr.mxu0 %v7853_v21 }
0x16f1   :  { %7087 = vmatpush3.msra.mxu0 %v8649_v8 }
0x16f2   :  { %7088 = vmatprep.subr.mxu0 %v7853_v21 }
0x16f3   :  { %7089 = vmatpush3.msra.mxu0 %v8654_v31 }
0x16f4   :  { %7090 = vmatprep.subr.mxu0 %v7853_v21 }
0x16f5   :  { %7091 = vmatpush3.msra.mxu0 %v8659_v32 }
0x16f6   :  { %7106 = vmatprep.subr.mxu0 %v7853_v21 }
0x177d   :  { %v7021_v39 = vpop.f32.mrf.mxu1 }
0x177f   :  { %v2522_v40 = vpop.f32.mrf.mxu1 }
0x1781   :  { %v7052_v42 = vpop.f32.mrf.mxu1 }
0x1783   :  { %v2716_v51 = vpop.f32.mrf.mxu1 }
0x1785   :  { %v7055_v44 = vpop.f32.mrf.mxu1 }
0x1787   :  { %v2726_v15 = vpop.f32.mrf.mxu1 }
0x1789   :  { %v7058_v52 = vpop.f32.mrf.mxu1 }
0x178b   :  { %v2736_v46 = vpop.f32.mrf.mxu1 }
0x178d   :  { %v7061_v53 = vpop.f32.mrf.mxu1 }
0x178e   :  { %v6992_v54 = vpop.f32.mrf.mxu0 }
0x178f   :  { %v2498_v48 = vadd.f32 %v7012_v33, %v6992_v54  ;;  %v2746_v6 = vpop.f32.mrf.mxu1 }
0x1790   :  { %v8694_v50 = vpop.f32.mrf.mxu0 }
0x1791   :  { %v8697_v55 = vadd.f32 %v8687_v3, %v2498_v48  ;;  %v2955_v41 = vpop.f32.mrf.mxu1 }
0x1792   :  { %v2956_v17 = vadd.f32 %v8692_v49, %v2955_v41  ;;  %v6995_v63 = vpop.f32.mrf.mxu0 }
0x1793   :  { %v2508_v27 = vadd.f32 %v7015_v35, %v6995_v63  ;;  %v7083_v43 = vpop.f32.mrf.mxu1 }
0x1794   :  { %v2373_v45 = vpop.f32.mrf.mxu0  ;;  %2967 = vrot.lane.b32.xlu0 %v2956_v17, %s7855_s23 }
0x1795   :  { %v8702_v47 = vadd.f32 %v8687_v3, %v2508_v27  ;;  %v2503_v56 = vadd.f32 %v2502_v36, %v2373_v45 }
0x1796   :  { %v6998_v57 = vpop.f32.mrf.mxu0 }
0x1797   :  { %v8705_v2 = vadd.f32 %v8687_v3, %v2503_v56  ;;  %v2518_v58 = vadd.f32 %v7018_v37, %v6998_v57 }
0x1798   :  { %v2383_v24 = vpop.f32.mrf.mxu0 }
0x1799   :  { %v8708_v61 = vadd.f32 %v8687_v3, %v2518_v58  ;;  %v2513_v62 = vadd.f32 %v2512_v38, %v2383_v24 }
0x179a   :  { %v7001_v0 = vpop.f32.mrf.mxu0 }
0x179b   :  { %v8711_v19 = vadd.f32 %v8687_v3, %v2513_v62  ;;  %v2528_v1 = vadd.f32 %v7021_v39, %v7001_v0 }
0x179c   :  { %v2393_v7 = vpop.f32.mrf.mxu0 }
0x179d   :  { %v8714_v60 = vadd.f32 %v8687_v3, %v2528_v1  ;;  %v2523_v4 = vadd.f32 %v2522_v40, %v2393_v7  ;;  %v8743_v7 = vld [vmem:[%s9472_s9] ss:$0 sm:$0xff] }
0x179e   :  { %v7032_v9 = vpop.f32.mrf.mxu0 }
0x179f   :  { %v8720_v13 = vadd.f32 %v8687_v3, %v2523_v4  ;;  %v2722_v14 = vadd.f32 %v7052_v42, %v7032_v9 }
0x17a0   :  { %v2611_v16 = vpop.f32.mrf.mxu0 }
0x17a1   :  { %v8722_v10 = vadd.f32 %v6292_v22, %v2722_v14  ;;  %v2717_v18 = vadd.f32 %v2716_v51, %v2611_v16 }
0x17a2   :  { %v7035_v20 = vpop.f32.mrf.mxu0 }
0x17a3   :  { %v8724_v23 = vadd.f32 %v6292_v22, %v2717_v18  ;;  %v2732_v25 = vadd.f32 %v7055_v44, %v7035_v20 }
0x17a4   :  { %v2621_v26 = vpop.f32.mrf.mxu0 }
0x17a5   :  { %v8726_v29 = vadd.f32 %v6292_v22, %v2732_v25  ;;  %v2727_v11 = vadd.f32 %v2726_v15, %v2621_v26 }
0x17a6   :  { %v7038_v33 = vpop.f32.mrf.mxu0 }
0x17a7   :  { %v8728_v35 = vadd.f32 %v6292_v22, %v2727_v11  ;;  %v2742_v36 = vadd.f32 %v7058_v52, %v7038_v33 }
0x17a8   :  { %v2631_v37 = vpop.f32.mrf.mxu0 }
0x17a9   :  { %v8730_v38 = vadd.f32 %v6292_v22, %v2742_v36  ;;  %v2737_v39 = vadd.f32 %v2736_v46, %v2631_v37 }
0x17aa   :  { %v7041_v40 = vpop.f32.mrf.mxu0 }
0x17ab   :  { %v8732_v42 = vadd.f32 %v6292_v22, %v2737_v39  ;;  %v2752_v63 = vadd.f32 %v7061_v53, %v7041_v40 }
0x17ac   :  { %v2641_v51 = vpop.f32.mrf.mxu0 }
0x17ad   :  { %v2747_v54 = vadd.f32 %v2746_v6, %v2641_v51  ;;  %v2768_v27 = vadd.f32 %v6292_v22, %v2752_v63 }
0x17ae   :  { %v2853_v48 = vpop.f32.mrf.mxu0 }
0x17af   :  { %v8734_v41 = vadd.f32 %v6292_v22, %v2747_v54  ;;  %v2959_v15 = vadd.f32 %v2956_v17, %v2768_v27  ;;  %v2854_v4 = vadd.f32 %v8743_v7, %v2853_v48  ;;  %v2493_v22 = vadd.f32 %v8682_v34, %v8694_v50 }
0x17b0   :  { %v7072_v44 = vpop.f32.mrf.mxu0 }
0x17b1   :  { %v6297_v43 = vmul.f32 -1.442695, %v2959_v15  ;;  %v2537_v9 = vadd.f32 %v8687_v3, %v2493_v22 }
0x17b3   :  { %7570 = vpow2.f32 %v6297_v43  ;;  %v2857_v14 = vadd.f32 %v2854_v4, %v2537_v9 }
0x17b5   :  { %v6295_v16 = vmul.f32 -1.442695, %v2857_v14 }
0x17c0   :  { %v7571_v45 = vpop.eup %7570 }
0x17c1   :  { %v2963_v52 = vadd.f32 1.0, %v7571_v45 }
0x17c3   :  { %7572 = vrcp.f32 %v2963_v52 }
0x17d0   :  { %v7573_v56 = vpop.eup %7572 }
0x17d1   :  { %v2977_v62 = vsub.f32 1.0, %v7573_v56  ;;  %v2983_v0 = vmul.f32 0.0, %v7573_v56 }
0x1806   :  { %v2968_v57 = vpop.permute.xlu0 %2967 }
0x1807   :  { %v2970_v46 = vmul.f32 %v7573_v56, %v2968_v57 }
0x1809   :  { %2972 = vrot.lane.b32.xlu1 %v2970_v46, %s7855_s23 }
0x187b   :  { %v2973_v58 = vpop.permute.xlu1 %2972 }
0x187c   :  { %v2975_v24 = vadd.f32 %v2973_v58, %v2768_v27 }
0x187e   :  { %7574 = vtanh.f32 %v2975_v24 }
0x187f   :  { %7576 = vpow2.f32 %v6295_v16 }
0x188b   :  { %v7575_v6 = vpop.eup %7574 }
0x188c   :  { %2979 = vrot.lane.b32.xlu0 %v7575_v6, %s7856_s26  ;;  %v7577_v18 = vpop.eup %7576 }
0x188d   :  { %v2861_v20 = vadd.f32 1.0, %v7577_v18 }
0x188f   :  { %7578 = vrcp.f32 %v2861_v20 }
0x189c   :  { %v7579_v34 = vpop.eup %7578 }
0x189d   :  { %v2875_v40 = vsub.f32 1.0, %v7579_v34  ;;  %v2881_v54 = vmul.f32 0.0, %v7579_v34 }
0x18fe   :  { %v2980_v53 = vpop.permute.xlu0 %2979 }
0x18ff   :  { %v2982_v17 = vmul.f32 %v2980_v53, %v2977_v62 }
0x1901   :  { %v8738_v1 = vadd.f32 %v2983_v0, %v2982_v17 }
0x1903   :  { %2991 = vrot.lane.b32.xlu1 %v8738_v1, %s7856_s26 }
0x1907   :  { %2865 = vrot.lane.b32.xlu1 %v2854_v4, %s7855_s23 }
0x1975   :  { %v2992_v25 = vpop.permute.xlu1 %2991 }
0x1976   :  { %2994 = vst.msk [vmem:[#allocation3 + $0x38] sm:$0xff] %vm583_vm12, %v2992_v25  ;;  %7104 = vmatmul.mubr.msk.f32.vlgmr.msra.gmra.mxu1 %vm583_vm12, %v2992_v25 }
0x1977   :  { %7118 = vmatpush3.msra.mxu1 %v8584_v5  ;;  %7125 = vmatprep.mubr.msk.f32.mxu1 %vm7854_vm11, %v7853_v21 }
0x1978   :  { %7119 = vmatprep.subr.mxu1 %v7853_v21 }
0x1979   :  { %v2866_v3 = vpop.permute.xlu1 %2865  ;;  %7120 = vmatpush3.msra.mxu1 %v8588_v59 }
0x197a   :  { %v2868_v50 = vmul.f32 %v7579_v34, %v2866_v3  ;;  %7121 = vmatprep.subr.mxu1 %v7853_v21 }
0x197b   :  { %7122 = vmatpush3.msra.mxu1 %v8594_v12 }
0x197c   :  { %2870 = vrot.lane.b32.xlu1 %v2868_v50, %s7855_s23  ;;  %7123 = vmatprep.subr.mxu1 %v7853_v21 }
0x197d   :  { %7124 = vmatpush3.msra.mxu1 %v8601_v28 }
0x197e   :  { %7139 = vmatprep.subr.mxu1 %v7853_v21 }
0x19ee   :  { %v2871_v26 = vpop.permute.xlu1 %2870 }
0x19ef   :  { %v2873_v11 = vadd.f32 %v2871_v26, %v2537_v9 }
0x19f1   :  { %7580 = vtanh.f32 %v2873_v11 }
0x19fe   :  { %v7581_v33 = vpop.eup %7580 }
0x19ff   :  { %2877 = vrot.lane.b32.xlu1 %v7581_v33, %s7856_s26 }
0x1a36   :  { %v3161_v36 = vpop.f32.mrf.mxu1 }
0x1a37   :  { %v3162_v37 = vadd.f32 %v8692_v49, %v3161_v36 }
0x1a38   :  { %v7105_v39 = vpop.f32.mrf.mxu1 }
0x1a39   :  { %3173 = vrot.lane.b32.xlu0 %v3162_v37, %s7855_s23  ;;  %v3165_v63 = vadd.f32 %v3162_v37, %v8734_v41 }
0x1a3b   :  { %v6301_v27 = vmul.f32 -1.442695, %v3165_v63 }
0x1a3d   :  { %7582 = vpow2.f32 %v6301_v27 }
0x1a4a   :  { %v7583_v15 = vpop.eup %7582 }
0x1a4b   :  { %v3169_v43 = vadd.f32 1.0, %v7583_v15 }
0x1a4d   :  { %7584 = vrcp.f32 %v3169_v43 }
0x1a5a   :  { %v7585_v45 = vpop.eup %7584 }
0x1a5b   :  { %v3183_v6 = vsub.f32 1.0, %v7585_v45  ;;  %v3189_v53 = vmul.f32 %v7585_v45, %v8738_v1 }
0x1a71   :  { %v2878_v51 = vpop.permute.xlu1 %2877 }
0x1a72   :  { %v2880_v48 = vmul.f32 %v2878_v51, %v2875_v40 }
0x1a74   :  { %v8768_v44 = vadd.f32 %v2881_v54, %v2880_v48 }
0x1a76   :  { %2986 = vrot.lane.b32.xlu1 %v8768_v44, %s7856_s26 }
0x1aab   :  { %v3174_v52 = vpop.permute.xlu0 %3173 }
0x1aac   :  { %v3176_v56 = vmul.f32 %v7585_v45, %v3174_v52 }
0x1aae   :  { %3178 = vrot.lane.b32.xlu0 %v3176_v56, %s7855_s23 }
0x1ae8   :  { %v2987_v57 = vpop.permute.xlu1 %2986 }
0x1ae9   :  { %2989 = vst.msk [vmem:[#allocation2] sm:$0xff] %vm583_vm12, %v2987_v57  ;;  %7093 = vmatmul.mubr.msk.f32.vlgmr.msra.gmra.mxu0 %vm583_vm12, %v2987_v57 }
0x1aea   :  { %7107 = vmatpush3.msra.mxu0 %v8645_v30  ;;  %7114 = vmatprep.mubr.msk.f32.mxu0 %vm7854_vm11, %v7853_v21 }
0x1aeb   :  { %7108 = vmatprep.subr.mxu0 %v7853_v21 }
0x1aec   :  { %7109 = vmatpush3.msra.mxu0 %v8649_v8 }
0x1aed   :  { %7110 = vmatprep.subr.mxu0 %v7853_v21 }
0x1aee   :  { %7111 = vmatpush3.msra.mxu0 %v8654_v31 }
0x1aef   :  { %7112 = vmatprep.subr.mxu0 %v7853_v21 }
0x1af0   :  { %7113 = vmatpush3.msra.mxu0 %v8659_v32 }
0x1af1   :  { %7128 = vmatprep.subr.mxu0 %v7853_v21 }
0x1b20   :  { %v3179_v46 = vpop.permute.xlu0 %3178 }
0x1b21   :  { %v3181_v58 = vadd.f32 %v3179_v46, %v8734_v41 }
0x1b23   :  { %7586 = vtanh.f32 %v3181_v58 }
0x1b30   :  { %v7587_v24 = vpop.eup %7586 }
0x1b31   :  { %3185 = vrot.lane.b32.xlu0 %v7587_v24, %s7856_s26 }
0x1ba3   :  { %v3186_v62 = vpop.permute.xlu0 %3185 }
0x1ba4   :  { %v3188_v0 = vmul.f32 %v3186_v62, %v3183_v6 }
0x1ba6   :  { %v8789_v17 = vadd.f32 %v3189_v53, %v3188_v0 }
0x1ba8   :  { %3197 = vrot.lane.b32.xlu0 %v8789_v17, %s7856_s26 }
0x1ba9   :  { %v3063_v4 = vpop.f32.mrf.mxu0 }
0x1baa   :  { %v3064_v22 = vadd.f32 %v8743_v7, %v3063_v4 }
0x1bab   :  { %v7094_v9 = vpop.f32.mrf.mxu0 }
0x1bac   :  { %3075 = vrot.lane.b32.xlu1 %v3064_v22, %s7855_s23  ;;  %v3067_v41 = vadd.f32 %v3064_v22, %v8697_v55 }
0x1bae   :  { %v6299_v14 = vmul.f32 -1.442695, %v3067_v41 }
0x1bb0   :  { %7588 = vpow2.f32 %v6299_v14 }
0x1bbd   :  { %v7589_v16 = vpop.eup %7588 }
0x1bbe   :  { %v3071_v18 = vadd.f32 1.0, %v7589_v16 }
0x1bc0   :  { %7590 = vrcp.f32 %v3071_v18 }
0x1bcd   :  { %v7591_v20 = vpop.eup %7590 }
0x1bce   :  { %v3085_v37 = vsub.f32 1.0, %v7591_v20  ;;  %v3091_v40 = vmul.f32 %v7591_v20, %v8768_v44 }
0x1c1a   :  { %v3198_v1 = vpop.permute.xlu0 %3197 }
0x1c1b   :  { %3200 = vst.msk [vmem:[#allocation3 + $0x30] sm:$0xff] %vm583_vm12, %v3198_v1  ;;  %7126 = vmatmul.mubr.msk.f32.vlgmr.msra.gmra.mxu1 %vm583_vm12, %v3198_v1 }
0x1c1c   :  { %7140 = vmatpush3.msra.mxu1 %v8584_v5  ;;  %7147 = vmatprep.mubr.msk.f32.mxu1 %vm7854_vm11, %v7853_v21 }
0x1c1d   :  { %7141 = vmatprep.subr.mxu1 %v7853_v21 }
0x1c1e   :  { %v3076_v25 = vpop.permute.xlu1 %3075  ;;  %7142 = vmatpush3.msra.mxu1 %v8588_v59 }
0x1c1f   :  { %v3078_v34 = vmul.f32 %v7591_v20, %v3076_v25  ;;  %7143 = vmatprep.subr.mxu1 %v7853_v21 }
0x1c20   :  { %7144 = vmatpush3.msra.mxu1 %v8594_v12 }
0x1c21   :  { %3080 = vrot.lane.b32.xlu1 %v3078_v34, %s7855_s23  ;;  %7145 = vmatprep.subr.mxu1 %v7853_v21 }
0x1c22   :  { %7146 = vmatpush3.msra.mxu1 %v8601_v28 }
0x1c23   :  { %7161 = vmatprep.subr.mxu1 %v7853_v21 }
0x1c93   :  { %v3081_v3 = vpop.permute.xlu1 %3080 }
0x1c94   :  { %v3083_v50 = vadd.f32 %v3081_v3, %v8697_v55 }
0x1c96   :  { %7592 = vtanh.f32 %v3083_v50 }
0x1ca3   :  { %v7593_v26 = vpop.eup %7592 }
0x1ca4   :  { %3087 = vrot.lane.b32.xlu1 %v7593_v26, %s7856_s26 }
0x1cdb   :  { %v3367_v11 = vpop.f32.mrf.mxu1 }
0x1cdc   :  { %v3368_v33 = vadd.f32 %v8692_v49, %v3367_v11 }
0x1cdd   :  { %v7127_v36 = vpop.f32.mrf.mxu1 }
0x1cde   :  { %3379 = vrot.lane.b32.xlu0 %v3368_v33, %s7855_s23  ;;  %v3371_v55 = vadd.f32 %v3368_v33, %v8730_v38 }
0x1ce0   :  { %v6305_v48 = vmul.f32 -1.442695, %v3371_v55 }
0x1ce2   :  { %7594 = vpow2.f32 %v6305_v48 }
0x1cef   :  { %v7595_v63 = vpop.eup %7594 }
0x1cf0   :  { %v3375_v27 = vadd.f32 1.0, %v7595_v63 }
0x1cf2   :  { %7596 = vrcp.f32 %v3375_v27 }
0x1cff   :  { %v7597_v15 = vpop.eup %7596 }
0x1d00   :  { %v3389_v46 = vsub.f32 1.0, %v7597_v15  ;;  %v3395_v24 = vmul.f32 %v7597_v15, %v8789_v17 }
0x1d16   :  { %v3088_v39 = vpop.permute.xlu1 %3087 }
0x1d17   :  { %v3090_v51 = vmul.f32 %v3088_v39, %v3085_v37 }
0x1d19   :  { %v8814_v54 = vadd.f32 %v3091_v40, %v3090_v51 }
0x1d1b   :  { %3192 = vrot.lane.b32.xlu1 %v8814_v54, %s7856_s26 }
0x1d50   :  { %v3380_v43 = vpop.permute.xlu0 %3379 }
0x1d51   :  { %v3382_v45 = vmul.f32 %v7597_v15, %v3380_v43 }
0x1d53   :  { %3384 = vrot.lane.b32.xlu0 %v3382_v45, %s7855_s23 }
0x1d8d   :  { %v3193_v52 = vpop.permute.xlu1 %3192 }
0x1d8e   :  { %3195 = vst.msk [vmem:[#allocation2 + $0x8] sm:$0xff] %vm583_vm12, %v3193_v52  ;;  %7115 = vmatmul.mubr.msk.f32.vlgmr.msra.gmra.mxu0 %vm583_vm12, %v3193_v52 }
0x1d8f   :  { %7129 = vmatpush3.msra.mxu0 %v8645_v30  ;;  %7136 = vmatprep.mubr.msk.f32.mxu0 %vm7854_vm11, %v7853_v21 }
0x1d90   :  { %7130 = vmatprep.subr.mxu0 %v7853_v21 }
0x1d91   :  { %7131 = vmatpush3.msra.mxu0 %v8649_v8 }
0x1d92   :  { %7132 = vmatprep.subr.mxu0 %v7853_v21 }
0x1d93   :  { %7133 = vmatpush3.msra.mxu0 %v8654_v31 }
0x1d94   :  { %7134 = vmatprep.subr.mxu0 %v7853_v21 }
0x1d95   :  { %7135 = vmatpush3.msra.mxu0 %v8659_v32 }
0x1d96   :  { %7150 = vmatprep.subr.mxu0 %v7853_v21 }
0x1dc5   :  { %v3385_v44 = vpop.permute.xlu0 %3384 }
0x1dc6   :  { %v3387_v56 = vadd.f32 %v3385_v44, %v8730_v38 }
0x1dc8   :  { %7598 = vtanh.f32 %v3387_v56 }
0x1dd5   :  { %v7599_v57 = vpop.eup %7598 }
0x1dd6   :  { %3391 = vrot.lane.b32.xlu0 %v7599_v57, %s7856_s26 }
0x1e48   :  { %v3392_v58 = vpop.permute.xlu0 %3391 }
0x1e49   :  { %v3394_v6 = vmul.f32 %v3392_v58, %v3389_v46 }
0x1e4b   :  { %v8835_v62 = vadd.f32 %v3395_v24, %v3394_v6 }
0x1e4d   :  { %3403 = vrot.lane.b32.xlu0 %v8835_v62, %s7856_s26 }
0x1e4e   :  { %v3269_v53 = vpop.f32.mrf.mxu0 }
0x1e4f   :  { %v3270_v0 = vadd.f32 %v8743_v7, %v3269_v53 }
0x1e50   :  { %v7116_v4 = vpop.f32.mrf.mxu0 }
0x1e51   :  { %3281 = vrot.lane.b32.xlu1 %v3270_v0, %s7855_s23  ;;  %v3273_v38 = vadd.f32 %v3270_v0, %v8705_v2 }
0x1e53   :  { %v6303_v22 = vmul.f32 -1.442695, %v3273_v38 }
0x1e55   :  { %7600 = vpow2.f32 %v6303_v22 }
0x1e62   :  { %v7601_v9 = vpop.eup %7600 }
0x1e63   :  { %v3277_v41 = vadd.f32 1.0, %v7601_v9 }
0x1e65   :  { %7602 = vrcp.f32 %v3277_v41 }
0x1e72   :  { %v7603_v14 = vpop.eup %7602 }
0x1e73   :  { %v3291_v26 = vsub.f32 1.0, %v7603_v14  ;;  %v3297_v33 = vmul.f32 %v7603_v14, %v8814_v54 }
0x1ebf   :  { %v3404_v17 = vpop.permute.xlu0 %3403 }
0x1ec0   :  { %3406 = vst.msk [vmem:[#allocation3 + $0x28] sm:$0xff] %vm583_vm12, %v3404_v17  ;;  %7148 = vmatmul.mubr.msk.f32.vlgmr.msra.gmra.mxu1 %vm583_vm12, %v3404_v17 }
0x1ec1   :  { %7162 = vmatpush3.msra.mxu1 %v8584_v5  ;;  %7169 = vmatprep.mubr.msk.f32.mxu1 %vm7854_vm11, %v7853_v21 }
0x1ec2   :  { %7163 = vmatprep.subr.mxu1 %v7853_v21 }
0x1ec3   :  { %v3282_v16 = vpop.permute.xlu1 %3281  ;;  %7164 = vmatpush3.msra.mxu1 %v8588_v59 }
0x1ec4   :  { %v3284_v18 = vmul.f32 %v7603_v14, %v3282_v16  ;;  %7165 = vmatprep.subr.mxu1 %v7853_v21 }
0x1ec5   :  { %7166 = vmatpush3.msra.mxu1 %v8594_v12 }
0x1ec6   :  { %3286 = vrot.lane.b32.xlu1 %v3284_v18, %s7855_s23  ;;  %7167 = vmatprep.subr.mxu1 %v7853_v21 }
0x1ec7   :  { %7168 = vmatpush3.msra.mxu1 %v8601_v28 }
0x1ec8   :  { %7183 = vmatprep.subr.mxu1 %v7853_v21 }
0x1f38   :  { %v3287_v1 = vpop.permute.xlu1 %3286 }
0x1f39   :  { %v3289_v20 = vadd.f32 %v3287_v1, %v8705_v2 }
0x1f3b   :  { %7604 = vtanh.f32 %v3289_v20 }
0x1f48   :  { %v7605_v25 = vpop.eup %7604 }
0x1f49   :  { %3293 = vrot.lane.b32.xlu1 %v7605_v25, %s7856_s26 }
0x1f80   :  { %v3573_v34 = vpop.f32.mrf.mxu1 }
0x1f81   :  { %v3574_v3 = vadd.f32 %v8692_v49, %v3573_v34 }
0x1f82   :  { %v7149_v50 = vpop.f32.mrf.mxu1 }
0x1f83   :  { %3585 = vrot.lane.b32.xlu0 %v3574_v3, %s7855_s23  ;;  %v3577_v2 = vadd.f32 %v3574_v3, %v8732_v42 }
0x1f85   :  { %v6309_v39 = vmul.f32 -1.442695, %v3577_v2 }
0x1f87   :  { %7606 = vpow2.f32 %v6309_v39 }
0x1f94   :  { %v7607_v40 = vpop.eup %7606 }
0x1f95   :  { %v3581_v51 = vadd.f32 1.0, %v7607_v40 }
0x1f97   :  { %7608 = vrcp.f32 %v3581_v51 }
0x1fa4   :  { %v7609_v55 = vpop.eup %7608 }
0x1fa5   :  { %v3595_v45 = vsub.f32 1.0, %v7609_v55  ;;  %v3601_v44 = vmul.f32 %v7609_v55, %v8835_v62 }
0x1fbb   :  { %v3294_v11 = vpop.permute.xlu1 %3293 }
0x1fbc   :  { %v3296_v36 = vmul.f32 %v3294_v11, %v3291_v26 }
0x1fbe   :  { %v8860_v37 = vadd.f32 %v3297_v33, %v3296_v36 }
0x1fc0   :  { %3398 = vrot.lane.b32.xlu1 %v8860_v37, %s7856_s26 }
0x1ff5   :  { %v3586_v48 = vpop.permute.xlu0 %3585 }
0x1ff6   :  { %v3588_v63 = vmul.f32 %v7609_v55, %v3586_v48 }
0x1ff8   :  { %3590 = vrot.lane.b32.xlu0 %v3588_v63, %s7855_s23 }
0x2032   :  { %v3399_v27 = vpop.permute.xlu1 %3398 }
0x2033   :  { %3401 = vst.msk [vmem:[#allocation2 + $0x10] sm:$0xff] %vm583_vm12, %v3399_v27  ;;  %7137 = vmatmul.mubr.msk.f32.vlgmr.msra.gmra.mxu0 %vm583_vm12, %v3399_v27 }
0x2034   :  { %7151 = vmatpush3.msra.mxu0 %v8645_v30  ;;  %7158 = vmatprep.mubr.msk.f32.mxu0 %vm7854_vm11, %v7853_v21 }
0x2035   :  { %7152 = vmatprep.subr.mxu0 %v7853_v21 }
0x2036   :  { %7153 = vmatpush3.msra.mxu0 %v8649_v8 }
0x2037   :  { %7154 = vmatprep.subr.mxu0 %v7853_v21 }
0x2038   :  { %7155 = vmatpush3.msra.mxu0 %v8654_v31 }
0x2039   :  { %7156 = vmatprep.subr.mxu0 %v7853_v21 }
0x203a   :  { %7157 = vmatpush3.msra.mxu0 %v8659_v32 }
0x203b   :  { %7172 = vmatprep.subr.mxu0 %v7853_v21 }
0x206a   :  { %v3591_v54 = vpop.permute.xlu0 %3590 }
0x206b   :  { %v3593_v15 = vadd.f32 %v3591_v54, %v8732_v42 }
0x206d   :  { %7610 = vtanh.f32 %v3593_v15 }
0x207a   :  { %v7611_v43 = vpop.eup %7610 }
0x207b   :  { %3597 = vrot.lane.b32.xlu0 %v7611_v43, %s7856_s26 }
0x20ed   :  { %v3598_v52 = vpop.permute.xlu0 %3597 }
0x20ee   :  { %v3600_v56 = vmul.f32 %v3598_v52, %v3595_v45 }
0x20f0   :  { %v8881_v57 = vadd.f32 %v3601_v44, %v3600_v56 }
0x20f2   :  { %3609 = vrot.lane.b32.xlu0 %v8881_v57, %s7856_s26 }
0x20f3   :  { %v3475_v46 = vpop.f32.mrf.mxu0 }
0x20f4   :  { %v3476_v58 = vadd.f32 %v8743_v7, %v3475_v46 }
0x20f5   :  { %v7138_v24 = vpop.f32.mrf.mxu0 }
0x20f6   :  { %3487 = vrot.lane.b32.xlu1 %v3476_v58, %s7855_s23  ;;  %v3479_v42 = vadd.f32 %v3476_v58, %v8702_v47 }
0x20f8   :  { %v6307_v6 = vmul.f32 -1.442695, %v3479_v42 }
0x20fa   :  { %7612 = vpow2.f32 %v6307_v6 }
0x2107   :  { %v7613_v53 = vpop.eup %7612 }
0x2108   :  { %v3483_v0 = vadd.f32 1.0, %v7613_v53 }
0x210a   :  { %7614 = vrcp.f32 %v3483_v0 }
0x2117   :  { %v7615_v4 = vpop.eup %7614 }
0x2118   :  { %v3497_v1 = vsub.f32 1.0, %v7615_v4  ;;  %v3503_v25 = vmul.f32 %v7615_v4, %v8860_v37 }
0x2164   :  { %v3610_v62 = vpop.permute.xlu0 %3609 }
0x2165   :  { %3612 = vst.msk [vmem:[#allocation3 + $0x20] sm:$0xff] %vm583_vm12, %v3610_v62  ;;  %7170 = vmatmul.mubr.msk.f32.vlgmr.msra.gmra.mxu1 %vm583_vm12, %v3610_v62 }
0x2166   :  { %7184 = vmatpush3.msra.mxu1 %v8584_v5  ;;  %7191 = vmatprep.mubr.msk.f32.mxu1 %vm7854_vm11, %v7853_v21 }
0x2167   :  { %7185 = vmatprep.subr.mxu1 %v7853_v21 }
0x2168   :  { %v3488_v38 = vpop.permute.xlu1 %3487  ;;  %7186 = vmatpush3.msra.mxu1 %v8588_v59 }
0x2169   :  { %v3490_v22 = vmul.f32 %v7615_v4, %v3488_v38  ;;  %7187 = vmatprep.subr.mxu1 %v7853_v21 }
0x216a   :  { %7188 = vmatpush3.msra.mxu1 %v8594_v12 }
0x216b   :  { %3492 = vrot.lane.b32.xlu1 %v3490_v22, %s7855_s23  ;;  %7189 = vmatprep.subr.mxu1 %v7853_v21 }
0x216c   :  { %7190 = vmatpush3.msra.mxu1 %v8601_v28 }
0x216d   :  { %7205 = vmatprep.subr.mxu1 %v7853_v21 }
0x21dd   :  { %v3493_v9 = vpop.permute.xlu1 %3492 }
0x21de   :  { %v3495_v41 = vadd.f32 %v3493_v9, %v8702_v47 }
0x21e0   :  { %7616 = vtanh.f32 %v3495_v41 }
0x21ed   :  { %v7617_v17 = vpop.eup %7616 }
0x21ee   :  { %3499 = vrot.lane.b32.xlu1 %v7617_v17, %s7856_s26 }
0x2225   :  { %v3779_v14 = vpop.f32.mrf.mxu1 }
0x2226   :  { %v3780_v16 = vadd.f32 %v8692_v49, %v3779_v14 }
0x2227   :  { %v7171_v18 = vpop.f32.mrf.mxu1 }
0x2228   :  { %3791 = vrot.lane.b32.xlu0 %v3780_v16, %s7855_s23  ;;  %v3783_v47 = vadd.f32 %v3780_v16, %v8726_v29 }
0x222a   :  { %v6313_v50 = vmul.f32 -1.442695, %v3783_v47 }
0x222c   :  { %7618 = vpow2.f32 %v6313_v50 }
0x2239   :  { %v7619_v26 = vpop.eup %7618 }
0x223a   :  { %v3787_v11 = vadd.f32 1.0, %v7619_v26 }
0x223c   :  { %7620 = vrcp.f32 %v3787_v11 }
0x2249   :  { %v7621_v33 = vpop.eup %7620 }
0x224a   :  { %v3801_v55 = vsub.f32 1.0, %v7621_v33  ;;  %v3807_v63 = vmul.f32 %v7621_v33, %v8881_v57 }
0x2260   :  { %v3500_v20 = vpop.permute.xlu1 %3499 }
0x2261   :  { %v3502_v34 = vmul.f32 %v3500_v20, %v3497_v1 }
0x2263   :  { %v8906_v3 = vadd.f32 %v3503_v25, %v3502_v34 }
0x2265   :  { %3604 = vrot.lane.b32.xlu1 %v8906_v3, %s7856_s26 }
0x229a   :  { %v3792_v36 = vpop.permute.xlu0 %3791 }
0x229b   :  { %v3794_v2 = vmul.f32 %v7621_v33, %v3792_v36 }
0x229d   :  { %3796 = vrot.lane.b32.xlu0 %v3794_v2, %s7855_s23  ;;  %v7728_v2 = vld [vmem:[#allocation4 + $0x38] sm:$0xff] }
0x22d7   :  { %v3605_v39 = vpop.permute.xlu1 %3604 }
0x22d8   :  { %3607 = vst.msk [vmem:[#allocation2 + $0x18] sm:$0xff] %vm583_vm12, %v3605_v39  ;;  %7159 = vmatmul.mubr.msk.f32.vlgmr.msra.gmra.mxu0 %vm583_vm12, %v3605_v39 }
0x22d9   :  { %7173 = vmatpush3.msra.mxu0 %v8645_v30  ;;  %7180 = vmatprep.mubr.msk.f32.mxu0 %vm7854_vm11, %v7853_v21 }
0x22da   :  { %7174 = vmatprep.subr.mxu0 %v7853_v21 }
0x22db   :  { %7175 = vmatpush3.msra.mxu0 %v8649_v8 }
0x22dc   :  { %7176 = vmatprep.subr.mxu0 %v7853_v21 }
0x22dd   :  { %7177 = vmatpush3.msra.mxu0 %v8654_v31 }
0x22de   :  { %7178 = vmatprep.subr.mxu0 %v7853_v21 }
0x22df   :  { %7179 = vmatpush3.msra.mxu0 %v8659_v32 }
0x22e0   :  { %7194 = vmatprep.subr.mxu0 %v7853_v21 }
0x230f   :  { %v3797_v37 = vpop.permute.xlu0 %3796 }
0x2310   :  { %v3799_v40 = vadd.f32 %v3797_v37, %v8726_v29 }
0x2312   :  { %7622 = vtanh.f32 %v3799_v40  ;;  %v7729_v40 = vld [vmem:[#allocation4 + $0x30] sm:$0xff] }
0x231f   :  { %v7623_v51 = vpop.eup %7622 }
0x2320   :  { %3803 = vrot.lane.b32.xlu0 %v7623_v51, %s7856_s26 }
0x2392   :  { %v3804_v48 = vpop.permute.xlu0 %3803 }
0x2393   :  { %v3806_v27 = vmul.f32 %v3804_v48, %v3801_v55  ;;  %v7730_v55 = vld [vmem:[#allocation4 + $0x28] sm:$0xff]  ;;  %v7731_v48 = vld [vmem:[#allocation4 + $0x20] sm:$0xff] }
0x2395   :  { %v8927_v54 = vadd.f32 %v3807_v63, %v3806_v27 }
0x2397   :  { %3815 = vrot.lane.b32.xlu0 %v8927_v54, %s7856_s26 }
0x2398   :  { %v3681_v15 = vpop.f32.mrf.mxu0 }
0x2399   :  { %v3682_v43 = vadd.f32 %v8743_v7, %v3681_v15 }
0x239a   :  { %v7160_v45 = vpop.f32.mrf.mxu0 }
0x239b   :  { %3693 = vrot.lane.b32.xlu1 %v3682_v43, %s7855_s23  ;;  %v3685_v29 = vadd.f32 %v3682_v43, %v8711_v19 }
0x239d   :  { %v6311_v52 = vmul.f32 -1.442695, %v3685_v29 }
0x239f   :  { %7624 = vpow2.f32 %v6311_v52 }
0x23ac   :  { %v7625_v44 = vpop.eup %7624 }
0x23ad   :  { %v3689_v56 = vadd.f32 1.0, %v7625_v44 }
0x23af   :  { %7626 = vrcp.f32 %v3689_v56 }
0x23bc   :  { %v7627_v46 = vpop.eup %7626 }
0x23bd   :  { %v3709_v4 = vmul.f32 %v7627_v46, %v8906_v3 }
0x2409   :  { %v3816_v57 = vpop.permute.xlu0 %3815 }
0x240a   :  { %3818 = vst.msk [vmem:[#allocation3 + $0x18] sm:$0xff] %vm583_vm12, %v3816_v57  ;;  %7192 = vmatmul.mubr.msk.f32.vlgmr.msra.gmra.mxu1 %vm583_vm12, %v3816_v57 }
0x240b   :  { %7206 = vmatpush3.msra.mxu1 %v8584_v5  ;;  %7213 = vmatprep.mubr.msk.f32.mxu1 %vm7854_vm11, %v7853_v21 }
0x240c   :  { %7207 = vmatprep.subr.mxu1 %v7853_v21 }
0x240d   :  { %v3694_v58 = vpop.permute.xlu1 %3693  ;;  %7208 = vmatpush3.msra.mxu1 %v8588_v59 }
0x240e   :  { %v3696_v24 = vmul.f32 %v7627_v46, %v3694_v58  ;;  %7209 = vmatprep.subr.mxu1 %v7853_v21 }
0x240f   :  { %7210 = vmatpush3.msra.mxu1 %v8594_v12  ;;  %v3703_v12 = vsub.f32 1.0, %v7627_v46 }
0x2410   :  { %3698 = vrot.lane.b32.xlu1 %v3696_v24, %s7855_s23  ;;  %7211 = vmatprep.subr.mxu1 %v7853_v21 }
0x2411   :  { %7212 = vmatpush3.msra.mxu1 %v8601_v28 }
0x2412   :  { %7227 = vmatprep.subr.mxu1 %v7853_v21 }
0x2482   :  { %v3699_v5 = vpop.permute.xlu1 %3698 }
0x2483   :  { %v3701_v42 = vadd.f32 %v3699_v5, %v8711_v19 }
0x2485   :  { %7628 = vtanh.f32 %v3701_v42 }
0x2492   :  { %v7629_v6 = vpop.eup %7628 }
0x2493   :  { %3705 = vrot.lane.b32.xlu1 %v7629_v6, %s7856_s26 }
0x24ca   :  { %v3985_v59 = vpop.f32.mrf.mxu1 }
0x24cb   :  { %v3986_v53 = vadd.f32 %v8692_v49, %v3985_v59  ;;  %v7732_v59 = vld [vmem:[#allocation4 + $0x18] sm:$0xff] }
0x24cc   :  { %v7193_v0 = vpop.f32.mrf.mxu1 }
0x24cd   :  { %3997 = vrot.lane.b32.xlu0 %v3986_v53, %s7855_s23  ;;  %v3989_v19 = vadd.f32 %v3986_v53, %v8728_v35  ;;  %v7733_v53 = vld [vmem:[#allocation4 + $0x10] sm:$0xff]  ;;  %v7734_v0 = vld [vmem:[#allocation4 + $0x8] sm:$0xff] }
0x24cf   :  { %v6317_v22 = vmul.f32 -1.442695, %v3989_v19 }
0x24d1   :  { %7630 = vpow2.f32 %v6317_v22 }
0x24de   :  { %v7631_v9 = vpop.eup %7630 }
0x24df   :  { %v3993_v41 = vadd.f32 1.0, %v7631_v9 }
0x24e1   :  { %7632 = vrcp.f32 %v3993_v41 }
0x24ee   :  { %v7633_v17 = vpop.eup %7632 }
0x24ef   :  { %v4007_v25 = vsub.f32 1.0, %v7633_v17 }
0x2505   :  { %v3706_v62 = vpop.permute.xlu1 %3705 }
0x2506   :  { %v3708_v28 = vmul.f32 %v3706_v62, %v3703_v12  ;;  %v7735_v12 = vld [vmem:[#allocation4] sm:$0xff] }
0x2508   :  { %v8952_v38 = vadd.f32 %v3709_v4, %v3708_v28 }
0x250a   :  { %3810 = vrot.lane.b32.xlu1 %v8952_v38, %s7856_s26 }
0x253f   :  { %v3998_v14 = vpop.permute.xlu0 %3997 }
0x2540   :  { %v4000_v16 = vmul.f32 %v7633_v17, %v3998_v14 }
0x2542   :  { %4002 = vrot.lane.b32.xlu0 %v4000_v16, %s7855_s23 }
0x257c   :  { %v3811_v18 = vpop.permute.xlu1 %3810 }
0x257d   :  { %3813 = vst.msk [vmem:[#allocation2 + $0x20] sm:$0xff] %vm583_vm12, %v3811_v18  ;;  %7181 = vmatmul.mubr.msk.f32.vlgmr.msra.gmra.mxu0 %vm583_vm12, %v3811_v18 }
0x257e   :  { %7195 = vmatpush3.msra.mxu0 %v8645_v30  ;;  %7202 = vmatprep.mubr.msk.f32.mxu0 %vm7854_vm11, %v7853_v21 }
0x257f   :  { %7196 = vmatprep.subr.mxu0 %v7853_v21 }
0x2580   :  { %7197 = vmatpush3.msra.mxu0 %v8649_v8  ;;  %v4013_v8 = vmul.f32 %v7633_v17, %v8927_v54 }
0x2581   :  { %7198 = vmatprep.subr.mxu0 %v7853_v21 }
0x2582   :  { %7199 = vmatpush3.msra.mxu0 %v8654_v31 }
0x2583   :  { %7200 = vmatprep.subr.mxu0 %v7853_v21 }
0x2584   :  { %7201 = vmatpush3.msra.mxu0 %v8659_v32 }
0x2585   :  { %7216 = vmatprep.subr.mxu0 %v7853_v21 }
0x25b4   :  { %v4003_v1 = vpop.permute.xlu0 %4002 }
0x25b5   :  { %v4005_v30 = vadd.f32 %v4003_v1, %v8728_v35 }
0x25b7   :  { %7634 = vtanh.f32 %v4005_v30 }
0x25c4   :  { %v7635_v20 = vpop.eup %7634 }
0x25c5   :  { %4009 = vrot.lane.b32.xlu0 %v7635_v20, %s7856_s26 }
0x2637   :  { %v4010_v34 = vpop.permute.xlu0 %4009 }
0x2638   :  { %v4012_v3 = vmul.f32 %v4010_v34, %v4007_v25  ;;  %v4458_v34 = vld [vmem:[%s9473_s10 + $0x10] sm:$0xff] }
0x263a   :  { %v8973_v47 = vadd.f32 %v4013_v8, %v4012_v3  ;;  %v4457_v8 = vld [vmem:[%s9473_s10 + $0x8] sm:$0xff] }
0x263c   :  { %4021 = vrot.lane.b32.xlu0 %v8973_v47, %s7856_s26 }
0x263d   :  { %v3887_v31 = vpop.f32.mrf.mxu0 }
0x263e   :  { %v3888_v32 = vadd.f32 %v8743_v7, %v3887_v31  ;;  %v4456_v31 = vld [vmem:[%s9473_s10] sm:$0xff] }
0x263f   :  { %v7182_v50 = vpop.f32.mrf.mxu0 }
0x2640   :  { %3899 = vrot.lane.b32.xlu1 %v3888_v32, %s7855_s23  ;;  %v3891_v35 = vadd.f32 %v3888_v32, %v8708_v61  ;;  %v9035_v50 = vld [vmem:[#allocation2 + $0x8] sm:$0xff] }
0x2642   :  { %v6315_v26 = vmul.f32 -1.442695, %v3891_v35  ;;  %v9039_v35 = vld [vmem:[#allocation2 + $0x10] sm:$0xff] }
0x2644   :  { %7636 = vpow2.f32 %v6315_v26  ;;  %v9043_v26 = vld [vmem:[#allocation2 + $0x18] sm:$0xff] }
0x2651   :  { %v7637_v11 = vpop.eup %7636 }
0x2652   :  { %v3895_v33 = vadd.f32 1.0, %v7637_v11  ;;  %v9047_v11 = vld [vmem:[#allocation2 + $0x20] sm:$0xff] }
0x2654   :  { %7638 = vrcp.f32 %v3895_v33 }
0x2661   :  { %v7639_v39 = vpop.eup %7638 }
0x2662   :  { %v3909_v29 = vsub.f32 1.0, %v7639_v39  ;;  %v3915_v44 = vmul.f32 %v7639_v39, %v8952_v38  ;;  %v4459_v38 = vld [vmem:[%s9473_s10 + $0x18] sm:$0xff] }
0x26ae   :  { %v4022_v36 = vpop.permute.xlu0 %4021 }
0x26af   :  { %4024 = vst.msk [vmem:[#allocation3 + $0x10] sm:$0xff] %vm583_vm12, %v4022_v36  ;;  %7214 = vmatmul.mubr.msk.f32.vlgmr.msra.gmra.mxu1 %vm583_vm12, %v4022_v36 }
0x26b0   :  { %7228 = vmatpush3.msra.mxu1 %v7728_v2  ;;  %7235 = vmatprep.mubr.msk.f32.mxu1 %vm7854_vm11, %v7853_v21 }
0x26b1   :  { %7229 = vmatprep.subr.mxu1 %v7853_v21 }
0x26b2   :  { %v3900_v37 = vpop.permute.xlu1 %3899  ;;  %7230 = vmatpush3.msra.mxu1 %v7729_v40  ;;  %v7736_v40 = vld [vmem:[%s9472_s9 + $0x1] ss:$0 sm:$0xff] }
0x26b3   :  { %v3902_v51 = vmul.f32 %v7639_v39, %v3900_v37  ;;  %7231 = vmatprep.subr.mxu1 %v7853_v21 }
0x26b4   :  { %7232 = vmatpush3.msra.mxu1 %v7730_v55 }
0x26b5   :  { %3904 = vrot.lane.b32.xlu1 %v3902_v51, %s7855_s23  ;;  %7233 = vmatprep.subr.mxu1 %v7853_v21 }
0x26b6   :  { %7234 = vmatpush3.msra.mxu1 %v7731_v48 }
0x26b7   :  { %7258 = vmatprep.subr.mxu1 %v4459_v38 }
0x2727   :  { %v3905_v63 = vpop.permute.xlu1 %3904 }
0x2728   :  { %v3907_v27 = vadd.f32 %v3905_v63, %v8708_v61 }
0x272a   :  { %7640 = vtanh.f32 %v3907_v27 }
0x2737   :  { %v7641_v54 = vpop.eup %7640 }
0x2738   :  { %3911 = vrot.lane.b32.xlu1 %v7641_v54, %s7856_s26 }
0x276f   :  { %v4191_v15 = vpop.f32.mrf.mxu1 }
0x2770   :  { %v4192_v43 = vadd.f32 %v8692_v49, %v4191_v15 }
0x2771   :  { %v7215_v45 = vpop.f32.mrf.mxu1 }
0x2772   :  { %4203 = vrot.lane.b32.xlu0 %v4192_v43, %s7855_s23  ;;  %v4195_v61 = vadd.f32 %v4192_v43, %v8722_v10 }
0x2774   :  { %v6321_v46 = vmul.f32 -1.442695, %v4195_v61 }
0x2776   :  { %7642 = vpow2.f32 %v6321_v46 }
0x2783   :  { %v7643_v58 = vpop.eup %7642 }
0x2784   :  { %v4199_v24 = vadd.f32 1.0, %v7643_v58 }
0x2786   :  { %7644 = vrcp.f32 %v4199_v24 }
0x2793   :  { %v7645_v49 = vpop.eup %7644 }
0x2794   :  { %v4213_v19 = vsub.f32 1.0, %v7645_v49  ;;  %v4219_v9 = vmul.f32 %v7645_v49, %v8973_v47 }
0x27aa   :  { %v3912_v52 = vpop.permute.xlu1 %3911 }
0x27ab   :  { %v3914_v56 = vmul.f32 %v3912_v52, %v3909_v29 }
0x27ad   :  { %v8993_v57 = vadd.f32 %v3915_v44, %v3914_v56 }
0x27af   :  { %4016 = vrot.lane.b32.xlu1 %v8993_v57, %s7856_s26 }
0x27e4   :  { %v4204_v5 = vpop.permute.xlu0 %4203 }
0x27e5   :  { %v4206_v42 = vmul.f32 %v7645_v49, %v4204_v5  ;;  %v4463_v49 = vld [vmem:[%s9473_s10 + $0x38] sm:$0xff]  ;;  %v4462_v5 = vld [vmem:[%s9473_s10 + $0x30] sm:$0xff] }
0x27e7   :  { %4208 = vrot.lane.b32.xlu0 %v4206_v42, %s7855_s23  ;;  %v4461_v42 = vld [vmem:[%s9473_s10 + $0x28] sm:$0xff] }
0x2821   :  { %v4017_v6 = vpop.permute.xlu1 %4016 }
0x2822   :  { %4019 = vst.msk [vmem:[#allocation2 + $0x28] sm:$0xff] %vm583_vm12, %v4017_v6  ;;  %7203 = vmatmul.mubr.msk.f32.vlgmr.msra.gmra.mxu0 %vm583_vm12, %v4017_v6 }
0x2823   :  { %7217 = vmatpush3.msra.mxu0 %v7732_v59  ;;  %7224 = vmatprep.mubr.msk.f32.mxu0 %vm7854_vm11, %v7853_v21 }
0x2824   :  { %7218 = vmatprep.subr.mxu0 %v7853_v21 }
0x2825   :  { %7219 = vmatpush3.msra.mxu0 %v7733_v53  ;;  %v6334_v53 = vld [vmem:[%s9473_s10 + $0x78] sm:$0xff] }
0x2826   :  { %7220 = vmatprep.subr.mxu0 %v7853_v21 }
0x2827   :  { %7221 = vmatpush3.msra.mxu0 %v7734_v0 }
0x2828   :  { %7222 = vmatprep.subr.mxu0 %v7853_v21 }
0x2829   :  { %7223 = vmatpush3.msra.mxu0 %v7735_v12  ;;  %v9051_v33 = vld [vmem:[#allocation2 + $0x28] sm:$0xff] }
0x282a   :  { %7238 = vmatprep.subr.mxu0 %v4463_v49 }
0x2859   :  { %v4209_v62 = vpop.permute.xlu0 %4208 }
0x285a   :  { %v4211_v4 = vadd.f32 %v4209_v62, %v8722_v10 }
0x285c   :  { %7646 = vtanh.f32 %v4211_v4 }
0x2869   :  { %v7647_v28 = vpop.eup %7646 }
0x286a   :  { %4215 = vrot.lane.b32.xlu0 %v7647_v28, %s7856_s26 }
0x28dc   :  { %v4216_v22 = vpop.permute.xlu0 %4215 }
0x28dd   :  { %v4218_v41 = vmul.f32 %v4216_v22, %v4213_v19 }
0x28df   :  { %v9012_v17 = vadd.f32 %v4219_v9, %v4218_v41  ;;  %v6333_v9 = vld [vmem:[%s9473_s10 + $0x70] sm:$0xff] }
0x28e0   :  { %v4450_v41 = vld [vmem:[#allocation3 + $0x10] sm:$0xff] }
0x28e1   :  { %4227 = vrot.lane.b32.xlu0 %v9012_v17, %s7856_s26 }
0x28e2   :  { %v4093_v10 = vpop.f32.mrf.mxu0 }
0x28e3   :  { %v4094_v14 = vadd.f32 %v8743_v7, %v4093_v10  ;;  %v9024_v7 = vld [vmem:[#allocation2] sm:$0xff]  ;;  %v4451_v10 = vld [vmem:[#allocation3 + $0x18] sm:$0xff] }
0x28e4   :  { %v7204_v16 = vpop.f32.mrf.mxu0 }
0x28e5   :  { %4105 = vrot.lane.b32.xlu1 %v4094_v14, %s7855_s23  ;;  %v4097_v18 = vadd.f32 %v4094_v14, %v8720_v13  ;;  %v6331_v14 = vld [vmem:[%s9473_s10 + $0x60] sm:$0xff] }
0x28e6   :  { %v4452_v16 = vld [vmem:[#allocation3 + $0x20] sm:$0xff] }
0x28e7   :  { %v6319_v1 = vmul.f32 -1.442695, %v4097_v18  ;;  %v4453_v18 = vld [vmem:[#allocation3 + $0x28] sm:$0xff] }
0x28e9   :  { %7648 = vpow2.f32 %v6319_v1  ;;  %v4454_v1 = vld [vmem:[#allocation3 + $0x30] sm:$0xff] }
0x28f6   :  { %v7649_v30 = vpop.eup %7648 }
0x28f7   :  { %v4101_v20 = vadd.f32 1.0, %v7649_v30  ;;  %v4455_v30 = vld [vmem:[#allocation3 + $0x38] sm:$0xff] }
0x28f9   :  { %7650 = vrcp.f32 %v4101_v20  ;;  %v9115_v20 = vld [vmem:[#allocation7 + $0x18] sm:$0xff] }
0x2906   :  { %v7651_v3 = vpop.eup %7650 }
0x2907   :  { %v4115_v48 = vsub.f32 1.0, %v7651_v3  ;;  %v4121_v27 = vmul.f32 %v7651_v3, %v8993_v57 }
0x2953   :  { %v4228_v25 = vpop.permute.xlu0 %4227 }
0x2954   :  { %4230 = vst.msk [vmem:[#allocation3 + $0x8] sm:$0xff] %vm583_vm12, %v4228_v25  ;;  %7236 = vmatmul.mubr.msk.f32.vlgmr.msra.gmra.mxu1 %vm583_vm12, %v4228_v25  ;;  %v9118_v25 = vld [vmem:[#allocation7 + $0x10] sm:$0xff] }
0x2955   :  { %7259 = vmatpush3.msra.mxu1 %v4459_v38  ;;  %7266 = vmatprep.mubr.msk.f32.mxu1 %vm583_vm12, %v9024_v7 }
0x2956   :  { %7260 = vmatprep.subr.mxu1 %v4458_v34 }
0x2957   :  { %7261 = vmatpush3.msra.mxu1 %v4458_v34  ;;  %v4106_v47 = vpop.permute.xlu1 %4105  ;;  %v9123_v34 = vld [vmem:[#allocation7 + $0x8] sm:$0xff] }
0x2958   :  { %v4108_v32 = vmul.f32 %v7651_v3, %v4106_v47  ;;  %7262 = vmatprep.subr.mxu1 %v4457_v8 }
0x2959   :  { %7263 = vmatpush3.msra.mxu1 %v4457_v8  ;;  %v9128_v8 = vld [vmem:[#allocation7] sm:$0xff] }
0x295a   :  { %7264 = vmatprep.subr.mxu1 %v4456_v31  ;;  %4110 = vrot.lane.b32.xlu1 %v4108_v32, %s7855_s23 }
0x295b   :  { %7265 = vmatpush3.msra.mxu1 %v4456_v31  ;;  %v4449_v22 = vld [vmem:[#allocation3 + $0x8] sm:$0xff] }
0x295c   :  { %7267 = vmatmul.mubr.msk.f32.vlgmr.msra.gmra.mxu1 %vm583_vm12, %v9035_v50 }
0x295d   :  { %7269 = vmatprep.mubr.msk.f32.mxu1 %vm583_vm12, %v9039_v35 }
0x2960   :  { %7270 = vmatmul.mubr.msk.f32.gmra.mxu1 %vm583_vm12, %v9043_v26 }
0x2961   :  { %7272 = vmatprep.mubr.msk.f32.mxu1 %vm583_vm12, %v9047_v11 }
0x2964   :  { %7273 = vmatmul.mubr.msk.f32.gmra.mxu1 %vm583_vm12, %v9051_v33 }
0x29cc   :  { %v4111_v36 = vpop.permute.xlu1 %4110 }
0x29cd   :  { %v4113_v2 = vadd.f32 %v4111_v36, %v8720_v13 }
0x29cf   :  { %7652 = vtanh.f32 %v4113_v2 }
0x29dc   :  { %v7653_v39 = vpop.eup %7652 }
0x29dd   :  { %4117 = vrot.lane.b32.xlu1 %v7653_v39, %s7856_s26 }
0x2a14   :  { %v4397_v37 = vpop.f32.mrf.mxu1 }
0x2a15   :  { %v4398_v51 = vadd.f32 %v7736_v40, %v4397_v37 }
0x2a16   :  { %v7237_v55 = vpop.f32.mrf.mxu1 }
0x2a17   :  { %4409 = vrot.lane.b32.xlu0 %v4398_v51, %s7855_s23  ;;  %v4401_v13 = vadd.f32 %v4398_v51, %v8724_v23 }
0x2a19   :  { %v6325_v43 = vmul.f32 -1.442695, %v4401_v13 }
0x2a1b   :  { %7654 = vpow2.f32 %v6325_v43  ;;  %v9170_v43 = vld [vmem:[%s9476_s13] ss:$0 sm:$0xff] }
0x2a28   :  { %v7655_v45 = vpop.eup %7654 }
0x2a29   :  { %v4405_v29 = vadd.f32 1.0, %v7655_v45 }
0x2a2b   :  { %7656 = vrcp.f32 %v4405_v29 }
0x2a38   :  { %v7657_v52 = vpop.eup %7656 }
0x2a39   :  { %v4419_v6 = vsub.f32 1.0, %v7657_v52  ;;  %v4425_v0 = vmul.f32 %v7657_v52, %v9012_v17  ;;  %v6332_v17 = vld [vmem:[%s9473_s10 + $0x68] sm:$0xff] }
0x2a4f   :  { %v4118_v63 = vpop.permute.xlu1 %4117 }
0x2a50   :  { %v4120_v54 = vmul.f32 %v4118_v63, %v4115_v48 }
0x2a52   :  { %v9062_v15 = vadd.f32 %v4121_v27, %v4120_v54 }
0x2a54   :  { %4222 = vrot.lane.b32.xlu1 %v9062_v15, %s7856_s26 }
0x2a89   :  { %v4410_v44 = vpop.permute.xlu0 %4409 }
0x2a8a   :  { %v4412_v56 = vmul.f32 %v7657_v52, %v4410_v44  ;;  %v9174_v44 = vpop.f32.mrf.mxu1 }
0x2a8c   :  { %4414 = vrot.lane.b32.xlu0 %v4412_v56, %s7855_s23  ;;  %v4692_v56 = vpop.f32.mrf.mxu1 }
0x2ac6   :  { %v4223_v61 = vpop.permute.xlu1 %4222 }
0x2ac7   :  { %4225 = vst.msk [vmem:[#allocation2 + $0x30] sm:$0xff] %vm583_vm12, %v4223_v61  ;;  %7225 = vmatmul.mubr.msk.f32.vlgmr.msra.gmra.mxu0 %vm583_vm12, %v4223_v61 }
0x2ac8   :  { %7239 = vmatpush3.msra.mxu0 %v4463_v49 }
0x2ac9   :  { %7240 = vmatprep.subr.mxu0 %v4462_v5 }
0x2aca   :  { %7241 = vmatpush3.msra.mxu0 %v4462_v5 }
0x2acb   :  { %7242 = vmatprep.subr.mxu0 %v4461_v42 }
0x2acc   :  { %7243 = vmatpush3.msra.mxu0 %v4461_v42 }
0x2ace   :  { %v9070_v57 = vld [vmem:[#allocation2 + $0x30] sm:$0xff] }
0x2acf   :  { %7275 = vmatprep.mubr.msk.f32.mxu1 %vm583_vm12, %v9070_v57 }
0x2afe   :  { %v4415_v46 = vpop.permute.xlu0 %4414 }
0x2aff   :  { %v4417_v58 = vadd.f32 %v4415_v46, %v8724_v23  ;;  %v4460_v23 = vld [vmem:[%s9473_s10 + $0x20] sm:$0xff] }
0x2b00   :  { %7244 = vmatprep.subr.mxu0 %v4460_v23  ;;  %v9179_v46 = vld [vmem:[%s9474_s11] ss:$0 sm:$0xff] }
0x2b01   :  { %7658 = vtanh.f32 %v4417_v58  ;;  %7245 = vmatpush3.msra.mxu0 %v4460_v23 }
0x2b02   :  { %7278 = vmatprep.subr.mxu0 %v6334_v53 }
0x2b0e   :  { %v7659_v24 = vpop.eup %7658 }
0x2b0f   :  { %4421 = vrot.lane.b32.xlu0 %v7659_v24, %s7856_s26 }
0x2b81   :  { %v4422_v59 = vpop.permute.xlu0 %4421 }
0x2b82   :  { %v4424_v12 = vmul.f32 %v4422_v59, %v4419_v6 }
0x2b84   :  { %v4426_v62 = vadd.f32 %v4425_v0, %v4424_v12 }
0x2b86   :  { %4433 = vrot.lane.b32.xlu0 %v4426_v62, %s7856_s26  ;;  %v7737_v62 = vld [vmem:[%s9472_s9] ss:$0 sm:$0xff] }
0x2b87   :  { %v9093_v4 = vpop.f32.mrf.mxu0 }
0x2b89   :  { %v7226_v28 = vpop.f32.mrf.mxu0 }
0x2b8a   :  { %v4300_v28 = vadd.f32 %v7737_v62, %v9093_v4 }
0x2bf8   :  { %v4434_v38 = vpop.permute.xlu0 %4433 }
0x2bf9   :  { %4436 = vst.msk [vmem:[#allocation3] sm:$0xff] %vm583_vm12, %v4434_v38  ;;  %v4303_v38 = vadd.f32 %v4300_v28, %v8714_v60 }
0x2c00   :  { %v4448_v19 = vld [vmem:[#allocation3] sm:$0xff] }
0x2c01   :  { %7246 = vmatprep.mubr.msk.f32.mxu0 %vm583_vm12, %v4448_v19 }
0x2c02   :  { %7247 = vmatmul.mubr.msk.f32.vlgmr.msra.gmra.mxu0 %vm583_vm12, %v4449_v22 }
0x2c03   :  { %7279 = vmatpush3.msra.mxu0 %v6334_v53  ;;  %7249 = vmatprep.mubr.msk.f32.mxu0 %vm583_vm12, %v4450_v41 }
0x2c04   :  { %7280 = vmatprep.subr.mxu0 %v6333_v9 }
0x2c05   :  { %7281 = vmatpush3.msra.mxu0 %v6333_v9 }
0x2c06   :  { %7250 = vmatmul.mubr.msk.f32.gmra.mxu0 %vm583_vm12, %v4451_v10  ;;  %7282 = vmatprep.subr.mxu0 %v6332_v17 }
0x2c07   :  { %7252 = vmatprep.mubr.msk.f32.mxu0 %vm583_vm12, %v4452_v16  ;;  %7283 = vmatpush3.msra.mxu0 %v6332_v17 }
0x2c08   :  { %7284 = vmatprep.subr.mxu0 %v6331_v14 }
0x2c09   :  { %7285 = vmatpush3.msra.mxu0 %v6331_v14 }
0x2c0a   :  { %7253 = vmatmul.mubr.msk.f32.gmra.mxu0 %vm583_vm12, %v4453_v18  ;;  %7318 = vmatprep.subr.mxu0 %v7853_v21 }
0x2c0b   :  { %7255 = vmatprep.mubr.msk.f32.mxu0 %vm583_vm12, %v4454_v1 }
0x2c0e   :  { %7256 = vmatmul.mubr.msk.f32.gmra.mxu0 %vm583_vm12, %v4455_v30 }
0x2c0f   :  { %7286 = vmatprep.mubr.msk.f32.mxu0 %vm583_vm12, %v4448_v19  ;;  %v6323_v19 = vmul.f32 -1.442695, %v4303_v38 }
0x2c12   :  { %7287 = vmatmul.mubr.msk.f32.vlgmr.msra.gmra.mxu0 %vm583_vm12, %v4449_v22 }
0x2c13   :  { %7319 = vmatpush3.msra.mxu0 %v9115_v20  ;;  %7289 = vmatprep.mubr.msk.f32.mxu0 %vm583_vm12, %v4450_v41 }
0x2c14   :  { %7320 = vmatprep.subr.mxu0 %v7853_v21 }
0x2c15   :  { %7321 = vmatpush3.msra.mxu0 %v9118_v25 }
0x2c16   :  { %7290 = vmatmul.mubr.msk.f32.gmra.mxu0 %vm583_vm12, %v4451_v10  ;;  %7322 = vmatprep.subr.mxu0 %v7853_v21 }
0x2c17   :  { %7292 = vmatprep.mubr.msk.f32.mxu0 %vm583_vm12, %v4452_v16  ;;  %7323 = vmatpush3.msra.mxu0 %v9123_v34 }
0x2c18   :  { %7324 = vmatprep.subr.mxu0 %v7853_v21 }
0x2c19   :  { %7325 = vmatpush3.msra.mxu0 %v9128_v8 }
0x2c1a   :  { %7293 = vmatmul.mubr.msk.f32.gmra.mxu0 %vm583_vm12, %v4453_v18  ;;  %7340 = vmatprep.subr.mxu0 %v7853_v21 }
0x2c1b   :  { %7295 = vmatprep.mubr.msk.f32.mxu0 %vm583_vm12, %v4454_v1 }
0x2c1e   :  { %7296 = vmatmul.mubr.msk.f32.gmra.mxu0 %vm583_vm12, %v4455_v30 }
0x2c1f   :  { %7326 = vmatprep.mubr.msk.f32.mxu0 %vm7854_vm11, %v7853_v21 }
0x2c22   :  { %7327 = vmatmul.mubr.f32.vlgmr.msra.gmra.mxu0 %v7853_v21 }
0x2c23   :  { %7341 = vmatpush3.msra.mxu0 %v9115_v20  ;;  %7348 = vmatprep.mubr.msk.f32.mxu0 %vm7854_vm11, %v7853_v21 }
0x2c24   :  { %7342 = vmatprep.subr.mxu0 %v7853_v21 }
0x2c25   :  { %7343 = vmatpush3.msra.mxu0 %v9118_v25 }
0x2c26   :  { %7344 = vmatprep.subr.mxu0 %v7853_v21 }
0x2c27   :  { %7345 = vmatpush3.msra.mxu0 %v9123_v34 }
0x2c28   :  { %7346 = vmatprep.subr.mxu0 %v7853_v21 }
0x2c29   :  { %7347 = vmatpush3.msra.mxu0 %v9128_v8 }
0x2c2a   :  { %7362 = vmatprep.subr.mxu0 %v7853_v21 }
0x2cc2   :  { %v9151_v3 = vpop.f32.mrf.mxu0 }
0x2cc4   :  { %v4563_v47 = vpop.f32.mrf.mxu0 }
0x2cc5   :  { %v4693_v61 = vadd.f32 %v4692_v56, %v4563_v47 }
0x2cc6   :  { %v9153_v31 = vpop.f32.mrf.mxu0 }
0x2cc7   :  { %v4737_v58 = vadd.f32 %v9179_v46, %v4693_v61 }
0x2cc8   :  { %v9155_v32 = vpop.f32.mrf.mxu0 }
0x2cca   :  { %v9157_v36 = vpop.f32.mrf.mxu0 }
0x2ccc   :  { %v9159_v2 = vpop.f32.mrf.mxu0 }
0x2cce   :  { %v9161_v39 = vpop.f32.mrf.mxu0 }
0x2cd0   :  { %v9163_v37 = vpop.f32.mrf.mxu0 }
0x2cd2   :  { %v7288_v40 = vpop.f32.mrf.mxu0 }
0x2cd4   :  { %v4811_v51 = vpop.f32.mrf.mxu0 }
0x2cd6   :  { %v7291_v55 = vpop.f32.mrf.mxu0 }
0x2cd7   :  { %v6329_v55 = vld [vmem:[%s9473_s10 + $0x50] sm:$0xff] }
0x2cd8   :  { %v4819_v48 = vpop.f32.mrf.mxu0 }
0x2cda   :  { %v7294_v63 = vpop.f32.mrf.mxu0 }
0x2cdc   :  { %v4827_v27 = vpop.f32.mrf.mxu0 }
0x2cdd   :  { %v6328_v27 = vld [vmem:[%s9473_s10 + $0x48] sm:$0xff] }
0x2cde   :  { %v9165_v54 = vpop.f32.mrf.mxu0 }
0x2ce0   :  { %v4835_v13 = vpop.f32.mrf.mxu0 }
0x2ce2   :  { %v5032_v45 = vpop.f32.mrf.mxu0 }
0x2ce3   :  { %v5033_v29 = vadd.f32 %v9170_v43, %v5032_v45 }
0x2ce4   :  { %v7328_v52 = vpop.f32.mrf.mxu0 }
0x2ce5   :  { %5044 = vrot.lane.b32.xlu0 %v5033_v29, %s7855_s23  ;;  %v5036_v24 = vadd.f32 %v5033_v29, %v4737_v58  ;;  %v6327_v29 = vld [vmem:[%s9473_s10 + $0x40] sm:$0xff] }
0x2ce7   :  { %v6371_v49 = vmul.f32 -1.442695, %v5036_v24 }
0x2ce9   :  { %7660 = vpow2.f32 %v6371_v49  ;;  %v4698_v49 = vadd.f32 %v9174_v44, %v9151_v3 }
0x2cf6   :  { %v7661_v5 = vpop.eup %7660 }
0x2cf7   :  { %v5040_v42 = vadd.f32 1.0, %v7661_v5  ;;  %v4956_v5 = vld [vmem:[#allocation7 + $0x38] sm:$0xff] }
0x2cf9   :  { %7662 = vrcp.f32 %v5040_v42  ;;  %v4955_v42 = vld [vmem:[#allocation7 + $0x30] sm:$0xff] }
0x2d06   :  { %v7663_v23 = vpop.eup %7662 }
0x2d07   :  { %v5054_v41 = vsub.f32 1.0, %v7663_v23  ;;  %v5060_v10 = vmul.f32 0.0, %v7663_v23 }
0x2d57   :  { %v5045_v6 = vpop.permute.xlu0 %5044 }
0x2d58   :  { %v5047_v59 = vmul.f32 %v7663_v23, %v5045_v6  ;;  %v4738_v23 = vadd.f32 %v9179_v46, %v4698_v49  ;;  %v4954_v6 = vld [vmem:[#allocation7 + $0x28] sm:$0xff] }
0x2d5a   :  { %5049 = vrot.lane.b32.xlu1 %v5047_v59, %s7855_s23 }
0x2dcc   :  { %v5050_v53 = vpop.permute.xlu1 %5049 }
0x2dcd   :  { %v5052_v0 = vadd.f32 %v5050_v53, %v4737_v58  ;;  %v9263_v53 = vpop.f32.mrf.mxu1 }
0x2dcf   :  { %7664 = vtanh.f32 %v5052_v0 }
0x2dd0   :  { %7666 = vpow2.f32 %v6323_v19 }
0x2ddc   :  { %v7665_v12 = vpop.eup %7664 }
0x2ddd   :  { %5056 = vrot.lane.b32.xlu0 %v7665_v12, %s7856_s26  ;;  %v7667_v22 = vpop.eup %7666  ;;  %v4702_v12 = vpop.f32.mrf.mxu1 }
0x2dde   :  { %v4307_v9 = vadd.f32 1.0, %v7667_v22 }
0x2ddf   :  { %v9266_v62 = vpop.f32.mrf.mxu1 }
0x2de0   :  { %7668 = vrcp.f32 %v4307_v9 }
0x2de1   :  { %4311 = vrot.lane.b32.xlu0 %v4300_v28, %s7855_s23  ;;  %v9268_v28 = vpop.f32.mrf.mxu1 }
0x2ded   :  { %v7669_v18 = vpop.eup %7668 }
0x2dee   :  { %v4321_v48 = vsub.f32 1.0, %v7669_v18  ;;  %v4327_v13 = vmul.f32 %v7669_v18, %v9062_v15 }
0x2e4f   :  { %v5057_v17 = vpop.permute.xlu0 %5056 }
0x2e50   :  { %v5059_v14 = vmul.f32 %v5057_v17, %v5054_v41 }
0x2e52   :  { %v9190_v16 = vadd.f32 %v5060_v10, %v5059_v14 }
0x2e53   :  { %v4312_v1 = vpop.permute.xlu0 %4311 }
0x2e54   :  { %v4314_v30 = vmul.f32 %v7669_v18, %v4312_v1  ;;  %5165 = vrot.lane.b32.xlu1 %v9190_v16, %s7856_s26 }
0x2e56   :  { %4316 = vrot.lane.b32.xlu0 %v4314_v30, %s7855_s23 }
0x2ec6   :  { %v5166_v4 = vpop.permute.xlu1 %5165 }
0x2ec7   :  { %7349 = vmatmul.mubr.msk.f32.vlgmr.msra.gmra.mxu0 %vm583_vm12, %v5166_v4 }
0x2ec8   :  { %v4317_v47 = vpop.permute.xlu0 %4316  ;;  %7363 = vmatpush3.msra.mxu0 %v9115_v20  ;;  %7370 = vmatprep.mubr.msk.f32.mxu0 %vm7854_vm11, %v7853_v21 }
0x2ec9   :  { %v4319_v40 = vadd.f32 %v4317_v47, %v8714_v60  ;;  %7364 = vmatprep.subr.mxu0 %v7853_v21  ;;  %v6330_v60 = vld [vmem:[%s9473_s10 + $0x58] sm:$0xff] }
0x2eca   :  { %7365 = vmatpush3.msra.mxu0 %v9118_v25  ;;  %7298 = vmatprep.subr.mxu1 %v6330_v60 }
0x2ecb   :  { %7670 = vtanh.f32 %v4319_v40  ;;  %7366 = vmatprep.subr.mxu0 %v7853_v21  ;;  %7299 = vmatpush3.msra.mxu1 %v6330_v60 }
0x2ecc   :  { %7367 = vmatpush3.msra.mxu0 %v9123_v34  ;;  %7300 = vmatprep.subr.mxu1 %v6329_v55 }
0x2ecd   :  { %7368 = vmatprep.subr.mxu0 %v7853_v21  ;;  %7301 = vmatpush3.msra.mxu1 %v6329_v55 }
0x2ece   :  { %7369 = vmatpush3.msra.mxu0 %v9128_v8  ;;  %7302 = vmatprep.subr.mxu1 %v6328_v27 }
0x2ecf   :  { %7384 = vmatprep.subr.mxu0 %v7853_v21  ;;  %7303 = vmatpush3.msra.mxu1 %v6328_v27 }
0x2ed0   :  { %7304 = vmatprep.subr.mxu1 %v6327_v29 }
0x2ed1   :  { %7305 = vmatpush3.msra.mxu1 %v6327_v29 }
0x2ed2   :  { %7329 = vmatprep.subr.mxu1 %v7853_v21 }
0x2ed8   :  { %v7671_v51 = vpop.eup %7670 }
0x2ed9   :  { %4323 = vrot.lane.b32.xlu0 %v7671_v51, %s7856_s26 }
0x2f4b   :  { %v4324_v63 = vpop.permute.xlu0 %4323 }
0x2f4c   :  { %v4326_v45 = vmul.f32 %v4324_v63, %v4321_v48 }
0x2f4e   :  { %v4328_v52 = vadd.f32 %v4327_v13, %v4326_v45  ;;  %v4703_v13 = vadd.f32 %v4702_v12, %v9155_v32 }
0x2f50   :  { %4428 = vrot.lane.b32.xlu0 %v4328_v52, %s7856_s26  ;;  %v4739_v45 = vadd.f32 %v9179_v46, %v4703_v13 }
0x2f87   :  { %v5235_v56 = vpop.f32.mrf.mxu0 }
0x2f88   :  { %v5236_v61 = vadd.f32 %v9170_v43, %v5235_v56 }
0x2f89   :  { %v7350_v58 = vpop.f32.mrf.mxu0 }
0x2f8a   :  { %5247 = vrot.lane.b32.xlu1 %v5236_v61, %s7855_s23  ;;  %v5239_v59 = vadd.f32 %v5236_v61, %v4738_v23 }
0x2fc2   :  { %v4429_v15 = vpop.permute.xlu0 %4428 }
0x2fc3   :  { %4431 = vst.msk [vmem:[#allocation2 + $0x38] sm:$0xff] %vm583_vm12, %v4429_v15 }
0x2fca   :  { %v4447_v24 = vld [vmem:[#allocation2 + $0x38] sm:$0xff] }
0x2fcb   :  { %7276 = vmatmul.mubr.msk.f32.gmra.mxu1 %vm583_vm12, %v4447_v24 }
0x2fcc   :  { %7306 = vmatprep.mubr.msk.f32.mxu1 %vm583_vm12, %v9024_v7  ;;  %v4953_v7 = vld [vmem:[#allocation7 + $0x20] sm:$0xff] }
0x2fcf   :  { %7307 = vmatmul.mubr.msk.f32.vlgmr.msra.gmra.mxu1 %vm583_vm12, %v9035_v50  ;;  %v6375_v50 = vmul.f32 -1.442695, %v5239_v59 }
0x2fd0   :  { %7309 = vmatprep.mubr.msk.f32.mxu1 %vm583_vm12, %v9039_v35  ;;  %7330 = vmatpush3.msra.mxu1 %v4956_v5 }
0x2fd1   :  { %7331 = vmatprep.subr.mxu1 %v7853_v21  ;;  %7672 = vpow2.f32 %v6375_v50 }
0x2fd2   :  { %7332 = vmatpush3.msra.mxu1 %v4955_v42 }
0x2fd3   :  { %7310 = vmatmul.mubr.msk.f32.gmra.mxu1 %vm583_vm12, %v9043_v26  ;;  %7333 = vmatprep.subr.mxu1 %v7853_v21 }
0x2fd4   :  { %7312 = vmatprep.mubr.msk.f32.mxu1 %vm583_vm12, %v9047_v11  ;;  %7334 = vmatpush3.msra.mxu1 %v4954_v6 }
0x2fd5   :  { %7335 = vmatprep.subr.mxu1 %v7853_v21 }
0x2fd6   :  { %7336 = vmatpush3.msra.mxu1 %v4953_v7 }
0x2fd7   :  { %7313 = vmatmul.mubr.msk.f32.gmra.mxu1 %vm583_vm12, %v9051_v33  ;;  %7351 = vmatprep.subr.mxu1 %v7853_v21 }
0x2fd8   :  { %7315 = vmatprep.mubr.msk.f32.mxu1 %vm583_vm12, %v9070_v57 }
0x2fdb   :  { %7316 = vmatmul.mubr.msk.f32.gmra.mxu1 %vm583_vm12, %v4447_v24 }
0x2fdc   :  { %7337 = vmatprep.mubr.msk.f32.mxu1 %vm7854_vm11, %v7853_v21 }
0x2fde   :  { %v7673_v35 = vpop.eup %7672 }
0x2fdf   :  { %7338 = vmatmul.mubr.f32.vlgmr.msra.gmra.mxu1 %v7853_v21  ;;  %v5243_v26 = vadd.f32 1.0, %v7673_v35 }
0x2fe0   :  { %7352 = vmatpush3.msra.mxu1 %v9115_v20  ;;  %7359 = vmatprep.mubr.msk.f32.mxu1 %vm7854_vm11, %v7853_v21 }
0x2fe1   :  { %7353 = vmatprep.subr.mxu1 %v7853_v21  ;;  %7674 = vrcp.f32 %v5243_v26 }
0x2fe2   :  { %7354 = vmatpush3.msra.mxu1 %v9118_v25 }
0x2fe3   :  { %7355 = vmatprep.subr.mxu1 %v7853_v21 }
0x2fe4   :  { %7356 = vmatpush3.msra.mxu1 %v9123_v34 }
0x2fe5   :  { %7357 = vmatprep.subr.mxu1 %v7853_v21 }
0x2fe6   :  { %7358 = vmatpush3.msra.mxu1 %v9128_v8 }
0x2fe7   :  { %7373 = vmatprep.subr.mxu1 %v7853_v21 }
0x2fee   :  { %v7675_v11 = vpop.eup %7674 }
0x2fef   :  { %v5257_v47 = vsub.f32 1.0, %v7675_v11  ;;  %v5263_v51 = vmul.f32 %v7675_v11, %v9190_v16 }
0x2ffc   :  { %v5248_v33 = vpop.permute.xlu1 %5247 }
0x2ffd   :  { %v5250_v57 = vmul.f32 %v7675_v11, %v5248_v33  ;;  %v4708_v33 = vadd.f32 %v9263_v53, %v9153_v31 }
0x2fff   :  { %5252 = vrot.lane.b32.xlu1 %v5250_v57, %s7855_s23  ;;  %v4740_v57 = vadd.f32 %v9179_v46, %v4708_v33 }
0x3071   :  { %v5253_v3 = vpop.permute.xlu1 %5252 }
0x3072   :  { %v5255_v44 = vadd.f32 %v5253_v3, %v4738_v23 }
0x3074   :  { %7676 = vtanh.f32 %v5255_v44 }
0x3081   :  { %v7677_v0 = vpop.eup %7676 }
0x3082   :  { %5259 = vrot.lane.b32.xlu1 %v7677_v0, %s7856_s26 }
0x308b   :  { %v9270_v38 = vpop.f32.mrf.mxu1 }
0x308d   :  { %v9272_v19 = vpop.f32.mrf.mxu1 }
0x308f   :  { %v7308_v22 = vpop.f32.mrf.mxu1 }
0x3091   :  { %v4909_v9 = vpop.f32.mrf.mxu1 }
0x3093   :  { %v7311_v41 = vpop.f32.mrf.mxu1 }
0x3095   :  { %v4917_v17 = vpop.f32.mrf.mxu1 }
0x3097   :  { %v7314_v10 = vpop.f32.mrf.mxu1 }
0x3099   :  { %v4925_v14 = vpop.f32.mrf.mxu1 }
0x309b   :  { %v9274_v18 = vpop.f32.mrf.mxu1 }
0x309d   :  { %v4933_v1 = vpop.f32.mrf.mxu1 }
0x309f   :  { %v9276_v30 = vpop.f32.mrf.mxu1 }
0x30a1   :  { %v7339_v4 = vpop.f32.mrf.mxu1 }
0x30f4   :  { %v5260_v40 = vpop.permute.xlu1 %5259 }
0x30f5   :  { %v5262_v60 = vmul.f32 %v5260_v40, %v5257_v47 }
0x30f7   :  { %v5264_v55 = vadd.f32 %v5263_v51, %v5262_v60 }
0x30f9   :  { %5266 = vrot.lane.b32.xlu1 %v5264_v55, %s7856_s26 }
0x316b   :  { %v5267_v48 = vpop.permute.xlu1 %5266 }
0x316c   :  { %7360 = vmatmul.mubr.msk.f32.vlgmr.msra.gmra.mxu1 %vm583_vm12, %v5267_v48  ;;  %v4713_v48 = vadd.f32 %v9268_v28, %v9159_v2 }
0x316d   :  { %7374 = vmatpush3.msra.mxu1 %v9115_v20  ;;  %7381 = vmatprep.mubr.msk.f32.mxu1 %vm7854_vm11, %v7853_v21 }
0x316e   :  { %7375 = vmatprep.subr.mxu1 %v7853_v21 }
0x316f   :  { %7376 = vmatpush3.msra.mxu1 %v9118_v25 }
0x3170   :  { %7377 = vmatprep.subr.mxu1 %v7853_v21 }
0x3171   :  { %7378 = vmatpush3.msra.mxu1 %v9123_v34 }
0x3172   :  { %7379 = vmatprep.subr.mxu1 %v7853_v21 }
0x3173   :  { %7380 = vmatpush3.msra.mxu1 %v9128_v8 }
0x3174   :  { %7395 = vmatprep.subr.mxu1 %v7853_v21 }
0x322c   :  { %v5336_v16 = vpop.f32.mrf.mxu1 }
0x322d   :  { %v5337_v63 = vadd.f32 %v9170_v43, %v5336_v16  ;;  %v4741_v16 = vadd.f32 %v9179_v46, %v4713_v48  ;;  %v4938_v48 = vadd.f32 %v9274_v18, %v9165_v54 }
0x322e   :  { %v7361_v27 = vpop.f32.mrf.mxu1 }
0x322f   :  { %5348 = vrot.lane.b32.xlu0 %v5337_v63, %s7855_s23  ;;  %v5340_v29 = vadd.f32 %v5337_v63, %v4739_v45 }
0x3231   :  { %v6377_v52 = vmul.f32 -1.442695, %v5340_v29 }
0x3233   :  { %7678 = vpow2.f32 %v6377_v52 }
0x3240   :  { %v7679_v56 = vpop.eup %7678 }
0x3241   :  { %v5344_v61 = vadd.f32 1.0, %v7679_v56 }
0x3243   :  { %7680 = vrcp.f32 %v5344_v61 }
0x3250   :  { %v7681_v58 = vpop.eup %7680 }
0x3251   :  { %v5358_v32 = vsub.f32 1.0, %v7681_v58  ;;  %v5364_v6 = vmul.f32 %v7681_v58, %v5264_v55 }
0x32a1   :  { %v5349_v15 = vpop.permute.xlu0 %5348 }
0x32a2   :  { %v5351_v24 = vmul.f32 %v7681_v58, %v5349_v15 }
0x32a4   :  { %5353 = vrot.lane.b32.xlu1 %v5351_v24, %s7855_s23 }
0x3316   :  { %v5354_v49 = vpop.permute.xlu1 %5353 }
0x3317   :  { %v5356_v5 = vadd.f32 %v5354_v49, %v4739_v45 }
0x3319   :  { %7682 = vtanh.f32 %v5356_v5 }
0x3326   :  { %v7683_v42 = vpop.eup %7682 }
0x3327   :  { %5360 = vrot.lane.b32.xlu0 %v7683_v42, %s7856_s26 }
0x3399   :  { %v5361_v23 = vpop.permute.xlu0 %5360 }
0x339a   :  { %v5363_v59 = vmul.f32 %v5361_v23, %v5358_v32 }
0x339c   :  { %v5365_v7 = vadd.f32 %v5364_v6, %v5363_v59  ;;  %v4718_v6 = vadd.f32 %v9266_v62, %v9157_v36 }
0x339e   :  { %5367 = vrot.lane.b32.xlu1 %v5365_v7, %s7856_s26 }
0x3410   :  { %v5368_v50 = vpop.permute.xlu1 %5367 }
0x3411   :  { %7371 = vmatmul.mubr.msk.f32.vlgmr.msra.gmra.mxu0 %vm583_vm12, %v5368_v50 }
0x3412   :  { %7385 = vmatpush3.msra.mxu0 %v9115_v20  ;;  %7392 = vmatprep.mubr.msk.f32.mxu0 %vm7854_vm11, %v7853_v21 }
0x3413   :  { %7386 = vmatprep.subr.mxu0 %v7853_v21 }
0x3414   :  { %7387 = vmatpush3.msra.mxu0 %v9118_v25 }
0x3415   :  { %7388 = vmatprep.subr.mxu0 %v7853_v21 }
0x3416   :  { %7389 = vmatpush3.msra.mxu0 %v9123_v34 }
0x3417   :  { %7390 = vmatprep.subr.mxu0 %v7853_v21 }
0x3418   :  { %7391 = vmatpush3.msra.mxu0 %v9128_v8 }
0x3419   :  { %7406 = vmatprep.subr.mxu0 %v7853_v21 }
0x34d1   :  { %v5437_v35 = vpop.f32.mrf.mxu0 }
0x34d2   :  { %v5438_v26 = vadd.f32 %v9170_v43, %v5437_v35 }
0x34d3   :  { %v7372_v11 = vpop.f32.mrf.mxu0 }
0x34d4   :  { %5449 = vrot.lane.b32.xlu0 %v5438_v26, %s7855_s23  ;;  %v5441_v3 = vadd.f32 %v5438_v26, %v4740_v57 }
0x34d6   :  { %v6379_v44 = vmul.f32 -1.442695, %v5441_v3 }
0x34d8   :  { %7684 = vpow2.f32 %v6379_v44 }
0x34e5   :  { %v7685_v0 = vpop.eup %7684 }
0x34e6   :  { %v5445_v12 = vadd.f32 1.0, %v7685_v0 }
0x34e8   :  { %7686 = vrcp.f32 %v5445_v12 }
0x34f5   :  { %v7687_v22 = vpop.eup %7686 }
0x34f6   :  { %v5459_v31 = vsub.f32 1.0, %v7687_v22  ;;  %v5465_v1 = vmul.f32 %v7687_v22, %v5365_v7 }
0x3546   :  { %v5450_v9 = vpop.permute.xlu0 %5449 }
0x3547   :  { %v5452_v41 = vmul.f32 %v7687_v22, %v5450_v9 }
0x3549   :  { %5454 = vrot.lane.b32.xlu1 %v5452_v41, %s7855_s23 }
0x35bb   :  { %v5455_v17 = vpop.permute.xlu1 %5454 }
0x35bc   :  { %v5457_v10 = vadd.f32 %v5455_v17, %v4740_v57  ;;  %v4723_v17 = vadd.f32 %v9272_v19, %v9163_v37  ;;  %v6372_v37 = vld [vmem:[%s9476_s13 + $0x1] ss:$0 sm:$0xff] }
0x35bd   :  { %v5135_v19 = vadd.f32 %v6372_v37, %v9276_v30 }
0x35be   :  { %7688 = vtanh.f32 %v5457_v10  ;;  %v4743_v10 = vadd.f32 %v9179_v46, %v4723_v17 }
0x35cb   :  { %v7689_v14 = vpop.eup %7688 }
0x35cc   :  { %5461 = vrot.lane.b32.xlu0 %v7689_v14, %s7856_s26 }
0x363e   :  { %v5462_v53 = vpop.permute.xlu0 %5461 }
0x363f   :  { %v5464_v4 = vmul.f32 %v5462_v53, %v5459_v31 }
0x3641   :  { %v5466_v47 = vadd.f32 %v5465_v1, %v5464_v4 }
0x3643   :  { %5468 = vrot.lane.b32.xlu1 %v5466_v47, %s7856_s26 }
0x36b5   :  { %v5469_v40 = vpop.permute.xlu1 %5468 }
0x36b6   :  { %7382 = vmatmul.mubr.msk.f32.vlgmr.msra.gmra.mxu1 %vm583_vm12, %v5469_v40 }
0x36b7   :  { %7396 = vmatpush3.msra.mxu1 %v9115_v20  ;;  %7403 = vmatprep.mubr.msk.f32.mxu1 %vm7854_vm11, %v7853_v21 }
0x36b8   :  { %7397 = vmatprep.subr.mxu1 %v7853_v21 }
0x36b9   :  { %7398 = vmatpush3.msra.mxu1 %v9118_v25 }
0x36ba   :  { %7399 = vmatprep.subr.mxu1 %v7853_v21 }
0x36bb   :  { %7400 = vmatpush3.msra.mxu1 %v9123_v34 }
0x36bc   :  { %7401 = vmatprep.subr.mxu1 %v7853_v21 }
0x36bd   :  { %7402 = vmatpush3.msra.mxu1 %v9128_v8 }
0x36be   :  { %7417 = vmatprep.subr.mxu1 %v7853_v21 }
0x3776   :  { %v5538_v51 = vpop.f32.mrf.mxu1 }
0x3777   :  { %v5539_v60 = vadd.f32 %v9170_v43, %v5538_v51 }
0x3778   :  { %v7383_v55 = vpop.f32.mrf.mxu1 }
0x3779   :  { %5550 = vrot.lane.b32.xlu0 %v5539_v60, %s7855_s23  ;;  %v5542_v63 = vadd.f32 %v5539_v60, %v4741_v16 }
0x377b   :  { %v6381_v27 = vmul.f32 -1.442695, %v5542_v63 }
0x377d   :  { %7690 = vpow2.f32 %v6381_v27 }
0x378a   :  { %v7691_v13 = vpop.eup %7690 }
0x378b   :  { %v5546_v45 = vadd.f32 1.0, %v7691_v13 }
0x378d   :  { %7692 = vrcp.f32 %v5546_v45 }
0x379a   :  { %v7693_v29 = vpop.eup %7692 }
0x379b   :  { %v5560_v2 = vsub.f32 1.0, %v7693_v29  ;;  %v5566_v24 = vmul.f32 %v7693_v29, %v5466_v47 }
0x37eb   :  { %v5551_v52 = vpop.permute.xlu0 %5550 }
0x37ec   :  { %v5553_v56 = vmul.f32 %v7693_v29, %v5551_v52 }
0x37ee   :  { %5555 = vrot.lane.b32.xlu1 %v5553_v56, %s7855_s23 }
0x3860   :  { %v5556_v61 = vpop.permute.xlu1 %5555 }
0x3861   :  { %v5558_v58 = vadd.f32 %v5556_v61, %v4741_v16  ;;  %v6368_v16 = vld [vmem:[%s9474_s11 + $0x1] ss:$0 sm:$0xff] }
0x3862   :  { %v4947_v63 = vadd.f32 %v6368_v16, %v4938_v48 }
0x3863   :  { %7694 = vtanh.f32 %v5558_v58 }
0x3864   :  { %v5138_v27 = vadd.f32 %v5135_v19, %v4947_v63 }
0x3866   :  { %v6373_v13 = vmul.f32 -1.442695, %v5138_v27 }
0x3870   :  { %v7695_v15 = vpop.eup %7694 }
0x3871   :  { %5562 = vrot.lane.b32.xlu0 %v7695_v15, %s7856_s26 }
0x38e3   :  { %v5563_v28 = vpop.permute.xlu0 %5562 }
0x38e4   :  { %v5565_v49 = vmul.f32 %v5563_v28, %v5560_v2 }
0x38e6   :  { %v5567_v5 = vadd.f32 %v5566_v24, %v5565_v49 }
0x38e8   :  { %5569 = vrot.lane.b32.xlu1 %v5567_v5, %s7856_s26 }
0x395a   :  { %v5570_v42 = vpop.permute.xlu1 %5569 }
0x395b   :  { %7393 = vmatmul.mubr.msk.f32.vlgmr.msra.gmra.mxu0 %vm583_vm12, %v5570_v42  ;;  %v5877_v42 = vld [vmem:[%s9477_s14 + $0x30] sm:$0xff] }
0x395c   :  { %7407 = vmatpush3.msra.mxu0 %v9115_v20  ;;  %7414 = vmatprep.mubr.msk.f32.mxu0 %vm7854_vm11, %v7853_v21 }
0x395d   :  { %7408 = vmatprep.subr.mxu0 %v7853_v21 }
0x395e   :  { %7409 = vmatpush3.msra.mxu0 %v9118_v25  ;;  %v4742_v25 = vadd.f32 %v9179_v46, %v4718_v6 }
0x395f   :  { %7410 = vmatprep.subr.mxu0 %v7853_v21 }
0x3960   :  { %7411 = vmatpush3.msra.mxu0 %v9123_v34 }
0x3961   :  { %7412 = vmatprep.subr.mxu0 %v7853_v21 }
0x3962   :  { %7413 = vmatpush3.msra.mxu0 %v9128_v8 }
0x3963   :  { %7428 = vmatprep.subr.mxu0 %v7853_v21 }
0x3a1b   :  { %v5639_v32 = vpop.f32.mrf.mxu0 }
0x3a1c   :  { %v5640_v20 = vadd.f32 %v9170_v43, %v5639_v32  ;;  %v5876_v32 = vld [vmem:[%s9477_s14 + $0x28] sm:$0xff] }
0x3a1d   :  { %v7394_v23 = vpop.f32.mrf.mxu0 }
0x3a1e   :  { %5651 = vrot.lane.b32.xlu0 %v5640_v20, %s7855_s23  ;;  %v5643_v59 = vadd.f32 %v5640_v20, %v4742_v25  ;;  %v5875_v20 = vld [vmem:[%s9477_s14 + $0x20] sm:$0xff] }
0x3a20   :  { %v6383_v7 = vmul.f32 -1.442695, %v5643_v59 }
0x3a22   :  { %7696 = vpow2.f32 %v6383_v7 }
0x3a2f   :  { %v7697_v34 = vpop.eup %7696 }
0x3a30   :  { %v5647_v50 = vadd.f32 1.0, %v7697_v34 }
0x3a32   :  { %7698 = vrcp.f32 %v5647_v50 }
0x3a3f   :  { %v7699_v8 = vpop.eup %7698 }
0x3a40   :  { %v5661_v36 = vsub.f32 1.0, %v7699_v8  ;;  %v5667_v3 = vmul.f32 %v7699_v8, %v5567_v5  ;;  %v5878_v5 = vld [vmem:[%s9477_s14 + $0x38] sm:$0xff] }
0x3a90   :  { %v5652_v35 = vpop.permute.xlu0 %5651 }
0x3a91   :  { %v5654_v26 = vmul.f32 %v7699_v8, %v5652_v35 }
0x3a93   :  { %5656 = vrot.lane.b32.xlu1 %v5654_v26, %s7855_s23  ;;  %v4728_v26 = vadd.f32 %v9270_v38, %v9161_v39  ;;  %v5874_v39 = vld [vmem:[%s9477_s14 + $0x18] sm:$0xff]  ;;  %v5872_v38 = vld [vmem:[%s9477_s14 + $0x8] sm:$0xff] }
0x3b05   :  { %v5657_v11 = vpop.permute.xlu1 %5656 }
0x3b06   :  { %v5659_v33 = vadd.f32 %v5657_v11, %v4742_v25  ;;  %v4744_v11 = vadd.f32 %v9179_v46, %v4728_v26  ;;  %v5873_v46 = vld [vmem:[%s9477_s14 + $0x10] sm:$0xff] }
0x3b08   :  { %7700 = vtanh.f32 %v5659_v33 }
0x3b15   :  { %v7701_v57 = vpop.eup %7700 }
0x3b16   :  { %5663 = vrot.lane.b32.xlu0 %v7701_v57, %s7856_s26 }
0x3b88   :  { %v5664_v62 = vpop.permute.xlu0 %5663 }
0x3b89   :  { %v5666_v44 = vmul.f32 %v5664_v62, %v5661_v36 }
0x3b8b   :  { %v5668_v0 = vadd.f32 %v5667_v3, %v5666_v44 }
0x3b8d   :  { %5670 = vrot.lane.b32.xlu1 %v5668_v0, %s7856_s26 }
0x3bff   :  { %v5671_v12 = vpop.permute.xlu1 %5670 }
0x3c00   :  { %7404 = vmatmul.mubr.msk.f32.vlgmr.msra.gmra.mxu1 %vm583_vm12, %v5671_v12 }
0x3c01   :  { %7425 = vmatprep.mubr.msk.f32.mxu1 %vm7854_vm11, %v7853_v21  ;;  %7418 = vmatpush3.msra.mxu1 %v5878_v5 }
0x3c02   :  { %7419 = vmatprep.subr.mxu1 %v7853_v21 }
0x3c03   :  { %7420 = vmatpush3.msra.mxu1 %v5877_v42 }
0x3c04   :  { %7421 = vmatprep.subr.mxu1 %v7853_v21 }
0x3c05   :  { %7422 = vmatpush3.msra.mxu1 %v5876_v32 }
0x3c06   :  { %7423 = vmatprep.subr.mxu1 %v7853_v21 }
0x3c07   :  { %7424 = vmatpush3.msra.mxu1 %v5875_v20 }
0x3c08   :  { %7439 = vmatprep.subr.mxu1 %v7853_v21 }
0x3cc0   :  { %v5740_v22 = vpop.f32.mrf.mxu1 }
0x3cc1   :  { %v5741_v9 = vadd.f32 %v9170_v43, %v5740_v22  ;;  %v5871_v22 = vld [vmem:[%s9477_s14] sm:$0xff] }
0x3cc2   :  { %v7405_v41 = vpop.f32.mrf.mxu1 }
0x3cc3   :  { %5752 = vrot.lane.b32.xlu0 %v5741_v9, %s7855_s23  ;;  %v5744_v14 = vadd.f32 %v5741_v9, %v4743_v10 }
0x3cc5   :  { %v6385_v31 = vmul.f32 -1.442695, %v5744_v14 }
0x3cc7   :  { %7702 = vpow2.f32 %v6385_v31 }
0x3cd4   :  { %v7703_v53 = vpop.eup %7702 }
0x3cd5   :  { %v5748_v1 = vadd.f32 1.0, %v7703_v53 }
0x3cd7   :  { %7704 = vrcp.f32 %v5748_v1 }
0x3ce4   :  { %v7705_v4 = vpop.eup %7704 }
0x3ce5   :  { %v5762_v52 = vsub.f32 1.0, %v7705_v4  ;;  %v5768_v61 = vmul.f32 %v7705_v4, %v5668_v0 }
0x3d35   :  { %v5753_v47 = vpop.permute.xlu0 %5752 }
0x3d36   :  { %v5755_v40 = vmul.f32 %v7705_v4, %v5753_v47 }
0x3d38   :  { %5757 = vrot.lane.b32.xlu1 %v5755_v40, %s7855_s23  ;;  %v6390_v40 = vld [vmem:[#allocation9] ss:$0 sm:$0xff] }
0x3daa   :  { %v5758_v51 = vpop.permute.xlu1 %5757 }
0x3dab   :  { %v5760_v60 = vadd.f32 %v5758_v51, %v4743_v10 }
0x3dad   :  { %7706 = vtanh.f32 %v5760_v60 }
0x3dae   :  { %7708 = vpow2.f32 %v6373_v13 }
0x3dba   :  { %v7707_v55 = vpop.eup %7706 }
0x3dbb   :  { %5764 = vrot.lane.b32.xlu0 %v7707_v55, %s7856_s26  ;;  %v7709_v45 = vpop.eup %7708 }
0x3dbc   :  { %v5142_v29 = vadd.f32 1.0, %v7709_v45 }
0x3dbe   :  { %7710 = vrcp.f32 %v5142_v29 }
0x3dbf   :  { %5146 = vrot.lane.b32.xlu0 %v5135_v19, %s7855_s23 }
0x3dcb   :  { %v7711_v15 = vpop.eup %7710 }
0x3dcc   :  { %v5156_v23 = vsub.f32 1.0, %v7711_v15  ;;  %v5162_v25 = vmul.f32 0.0, %v7711_v15 }
0x3e2d   :  { %v5765_v56 = vpop.permute.xlu0 %5764 }
0x3e2e   :  { %v5767_v30 = vmul.f32 %v5765_v56, %v5762_v52 }
0x3e30   :  { %v9375_v58 = vadd.f32 %v5768_v61, %v5767_v30 }
0x3e31   :  { %v5147_v2 = vpop.permute.xlu0 %5146 }
0x3e32   :  { %v5149_v54 = vmul.f32 %v7711_v15, %v5147_v2  ;;  %5771 = vrot.lane.b32.xlu1 %v9375_v58, %s7856_s26  ;;  %v6071_v15 = vld [vmem:[%s9479_s16 + $0x28] sm:$0xff]  ;;  %v6070_v2 = vld [vmem:[%s9479_s16 + $0x20] sm:$0xff] }
0x3e34   :  { %5151 = vrot.lane.b32.xlu0 %v5149_v54, %s7855_s23  ;;  %v6069_v54 = vld [vmem:[%s9479_s16 + $0x18] sm:$0xff] }
0x3ea4   :  { %v5772_v18 = vpop.permute.xlu1 %5771 }
0x3ea5   :  { %7415 = vmatmul.mubr.msk.f32.vlgmr.msra.gmra.mxu0 %vm583_vm12, %v5772_v18  ;;  %v6068_v18 = vld [vmem:[%s9479_s16 + $0x10] sm:$0xff] }
0x3ea6   :  { %v5152_v28 = vpop.permute.xlu0 %5151  ;;  %7436 = vmatprep.mubr.msk.f32.mxu0 %vm7854_vm11, %v7853_v21  ;;  %7429 = vmatpush3.msra.mxu0 %v5874_v39 }
0x3ea7   :  { %v5154_v24 = vadd.f32 %v5152_v28, %v4947_v63  ;;  %7430 = vmatprep.subr.mxu0 %v7853_v21  ;;  %v6067_v28 = vld [vmem:[%s9479_s16 + $0x8] sm:$0xff] }
0x3ea8   :  { %7431 = vmatpush3.msra.mxu0 %v5873_v46 }
0x3ea9   :  { %7712 = vtanh.f32 %v5154_v24  ;;  %7432 = vmatprep.subr.mxu0 %v7853_v21  ;;  %v6066_v24 = vld [vmem:[%s9479_s16] sm:$0xff] }
0x3eaa   :  { %7433 = vmatpush3.msra.mxu0 %v5872_v38 }
0x3eab   :  { %7434 = vmatprep.subr.mxu0 %v7853_v21 }
0x3eac   :  { %7435 = vmatpush3.msra.mxu0 %v5871_v22 }
0x3eb6   :  { %v7713_v49 = vpop.eup %7712 }
0x3eb7   :  { %5158 = vrot.lane.b32.xlu0 %v7713_v49, %s7856_s26 }
0x3f29   :  { %v5159_v6 = vpop.permute.xlu0 %5158 }
0x3f2a   :  { %v5161_v59 = vmul.f32 %v5159_v6, %v5156_v23 }
0x3f2c   :  { %v5163_v7 = vadd.f32 %v5162_v25, %v5161_v59 }
0x3f2e   :  { %5880 = vrot.lane.b32.xlu0 %v5163_v7, %s7856_s26 }
0x3f65   :  { %v5841_v34 = vpop.f32.mrf.mxu0 }
0x3f66   :  { %v5842_v50 = vadd.f32 %v9170_v43, %v5841_v34 }
0x3f67   :  { %v7416_v8 = vpop.f32.mrf.mxu0 }
0x3f68   :  { %5853 = vrot.lane.b32.xlu1 %v5842_v50, %s7855_s23  ;;  %v5845_v33 = vadd.f32 %v5842_v50, %v4744_v11  ;;  %v6391_v8 = vld [vmem:[#allocation10] ss:$0 sm:$0xff] }
0x3f6a   :  { %v6387_v57 = vmul.f32 -1.442695, %v5845_v33 }
0x3f6c   :  { %7714 = vpow2.f32 %v6387_v57 }
0x3f79   :  { %v7715_v36 = vpop.eup %7714 }
0x3f7a   :  { %v5849_v62 = vadd.f32 1.0, %v7715_v36 }
0x3f7c   :  { %7716 = vrcp.f32 %v5849_v62 }
0x3f89   :  { %v7717_v43 = vpop.eup %7716 }
0x3f8a   :  { %v5863_v10 = vsub.f32 1.0, %v7717_v43  ;;  %v5869_v31 = vmul.f32 %v7717_v43, %v9375_v58  ;;  %v6072_v58 = vld [vmem:[%s9479_s16 + $0x30] sm:$0x3]  ;;  %s7857_s16 = smov [#allocation12]  }
0x3f8b   :  { %s6164_s13 = sshll.u32 %s7857_s16, 4  ;;  %s6165_s13 = int_to_ptr.vmem [resolvable:$true] %s6164_s13 }
0x3f8c   :  { %s7818_s7 = scalar_lea.vmem %s6165_s13, 32  ;;  %p7823_p7 = scmp.lt.s32.totalorder %s6165_s13, %s6165_s13 }
0x3f8d   :  { %p7819_p6 = scmp.ne.s32.totalorder %s6165_s13, %s7818_s7  ;;  %p7824_p8 = scmp.lt.s32.totalorder %s7818_s7, %s7818_s7 }
0x3f8f   :  { %p7825_p9 = por %p7824_p8, %p7823_p7 }
0x3f91   :  { %p7826_p10 = pnand %p7825_p9, %p7819_p6 }
0x3fa0   :  { %v5881_v35 = vpop.permute.xlu0 %5880 }
0x3fa1   :  { %7426 = vmatmul.mubr.msk.f32.vlgmr.msra.gmra.mxu1 %vm583_vm12, %v5881_v35 }
0x3fa2   :  { %7453 = vmatprep.mubr.msk.f32.mxu1 %vm7854_vm11, %v7853_v21  ;;  %7440 = vmatpush3.msk.msra.mxu1 %vm201_vm0, %v6072_v58 }
0x3fa3   :  { %7441 = vmatprep.subr.mxu1 %v7853_v21 }
0x3fa4   :  { %7442 = vmatpush3.msra.mxu1 %v6071_v15 }
0x3fa5   :  { %7443 = vmatprep.subr.mxu1 %v7853_v21 }
0x3fa6   :  { %7444 = vmatpush3.msra.mxu1 %v6070_v2 }
0x3fa7   :  { %7445 = vmatprep.subr.mxu1 %v7853_v21 }
0x3fa8   :  { %7446 = vmatpush3.msra.mxu1 %v6069_v54 }
0x3fa9   :  { %7447 = vmatprep.subr.mxu1 %v7853_v21 }
0x3faa   :  { %7448 = vmatpush3.msra.mxu1 %v6068_v18 }
0x3fab   :  { %7449 = vmatprep.subr.mxu1 %v7853_v21 }
0x3fac   :  { %7450 = vmatpush3.msra.mxu1 %v6067_v28 }
0x3fad   :  { %7451 = vmatprep.subr.mxu1 %v7853_v21 }
0x3fae   :  { %7452 = vmatpush3.msra.mxu1 %v6066_v24 }
0x3fda   :  { %v5854_v3 = vpop.permute.xlu1 %5853 }
0x3fdb   :  { %v5856_v44 = vmul.f32 %v7717_v43, %v5854_v3 }
0x3fdd   :  { %5858 = vrot.lane.b32.xlu1 %v5856_v44, %s7855_s23 }
0x404f   :  { %v5859_v0 = vpop.permute.xlu1 %5858 }
0x4050   :  { %v5861_v12 = vadd.f32 %v5859_v0, %v4744_v11 }
0x4052   :  { %7718 = vtanh.f32 %v5861_v12 }
0x405f   :  { %v7719_v9 = vpop.eup %7718 }
0x4060   :  { %5865 = vrot.lane.b32.xlu1 %v7719_v9, %s7856_s26 }
0x4061   :  { %v5950_v41 = vpop.f32.mrf.mxu1 }
0x4063   :  { %v7427_v17 = vpop.f32.mrf.mxu1 }
0x40d2   :  { %v5866_v14 = vpop.permute.xlu1 %5865 }
0x40d3   :  { %v5868_v53 = vmul.f32 %v5866_v14, %v5863_v10 }
0x40d5   :  { %v5870_v1 = vadd.f32 %v5869_v31, %v5868_v53 }
0x40d7   :  { %5955 = vrot.lane.b32.xlu1 %v5870_v1, %s7856_s26 }
0x4149   :  { %v5956_v4 = vpop.permute.xlu1 %5955 }
0x414a   :  { %7437 = vmatmul.mubr.msk.f32.vlgmr.msra.gmra.mxu0 %vm583_vm12, %v5956_v4 }
0x420a   :  { %v6025_v47 = vpop.f32.mrf.mxu0 }
0x420b   :  { %v6026_v51 = vadd.f32 %v6025_v47, %v5950_v41 }
0x420c   :  { %v7438_v60 = vpop.f32.mrf.mxu0 }
0x420d   :  { %v6036_v55 = vadd.f32 %v6390_v40, %v6026_v51 }
0x420f   :  { %v6038_v37 = vsel %vm6037_vm13, %v6036_v55, 0.0 }
0x4210   :  { %6039 = vadd.xlane.f32.xlu0 %v6038_v37 }
0x4299   :  { %v6040_v19 = vpop.xlane.xlu0 %6039 }
0x429a   :  { %v6041_v48 = vsel %vm201_vm0, %v6040_v19, 0.0 }
0x429b   :  { %v6042_v16 = vrot.slane %v6041_v48, 4 }
0x429d   :  { %v6043_v63 = vadd.f32 %v6042_v16, %v6041_v48 }
0x429f   :  { %v6044_v27 = vrot.slane %v6043_v63, 2 }
0x42a1   :  { %v6045_v13 = vadd.f32 %v6044_v27, %v6043_v63 }
0x42a3   :  { %v6046_v45 = vrot.slane %v6045_v13, 1 }
0x42a5   :  { %v6047_v29 = vadd.f32 %v6046_v45, %v6045_v13 }
0x42a7   :  { %v6049_v52 = vmul.f32 0.01, %v6047_v29 }
0x42a9   :  { %v6050_v56 = vsub.f32 %v6036_v55, %v6049_v52 }
0x42ab   :  { %v6051_v61 = vmul.f32 %v6050_v56, %v6050_v56 }
0x42ad   :  { %v6052_v30 = vsel %vm6037_vm13, %v6051_v61, 0.0 }
0x42ae   :  { %6053 = vadd.xlane.f32.xlu1 %v6052_v30 }
0x4337   :  { %v6054_v49 = vpop.xlane.xlu1 %6053 }
0x4338   :  { %v6055_v5 = vsel %vm201_vm0, %v6054_v49, 0.0 }
0x4339   :  { %v6056_v42 = vrot.slane %v6055_v5, 4 }
0x433b   :  { %v6057_v32 = vadd.f32 %v6056_v42, %v6055_v5 }
0x433d   :  { %v6058_v20 = vrot.slane %v6057_v32, 2 }
0x433f   :  { %v6059_v23 = vadd.f32 %v6058_v20, %v6057_v32 }
0x4341   :  { %v6060_v6 = vrot.slane %v6059_v23, 1 }
0x4343   :  { %v6061_v25 = vadd.f32 %v6060_v6, %v6059_v23 }
0x4345   :  { %v6062_v59 = vmul.f32 0.01, %v6061_v25 }
0x4347   :  { %v6063_v7 = vadd.f32 1e-05, %v6062_v59 }
0x4349   :  { %7720 = vrsqrt.f32 %v6063_v7 }
0x4356   :  { %v7721_v34 = vpop.eup %7720 }
0x4357   :  { %v6065_v50 = vmul.f32 %v7721_v34, %v6050_v56 }
0x4359   :  { %7454 = vmatmul.mubr.msk.f32.vlgmr.msra.gmra.mxu1 %vm176_vm1, %v6065_v50 }
0x4419   :  { %v6152_v21 = vpop.f32.mrf.mxu1 }
0x441a   :  { %v6153_v35 = vadd.f32 %v6391_v8, %v6152_v21 }
0x441b   :  { %v7455_v26 = vpop.f32.mrf.mxu1 }
0x441c   :  { %6157 = vst.msk [vmem:[#allocation12] sm:$0x3] %vm6156_vm14, %v6153_v35 }
0x441d   :  { %7829 = shalt.err (!%p7826_p10)
}
0x441e   :  { %6167 = dma.vmem_to_hbm [thread:$0]  %s6165_s13, 32, %s9481_s18, [#allocation6]  }
0x441f   :  { %7844 = dma.done.wait [#allocation6], 32  }
0x4420   :  { %7845 = vsyncadd [#allocation6], 4294967264 }
0x4421   :  { %6171 = vsyncpa [#allocation5], 1 }
0x4422   :  { %6172 = vsyncpa [#allocation8], 1 }
0x4423   :  { %6173 = vsyncpa [#allocation11], 1 }
0x4424   :  { %6174 = vsyncpa [#allocation6], 1 }

</bundles_post_ra>
